<compile_context>
chip_gen: v5e
topology: v5e:2x2
jax: 0.10.0
libtpu: 0.0.40
codegen_flags: <defaults>
</compile_context>

<pallas_src>
import jax
import jax.numpy as jnp
from jax import lax
from jax.experimental import pallas as pl
from jax.experimental.pallas import tpu as pltpu

FMIN = 32.70
FMAX = 2000.0
DB_RANGE = 80.0
LN_EPS = 1e-5
LRELU_SLOPE = 0.01
LANE = 128
SUBLANE = 8


# ---------------------------------------------------------------------------
# Parameter construction (deterministic, synthetic).  Weight matrices are
# stored pre-transposed to (in, out).  Stacked layers use a leading axis of 3.
# ---------------------------------------------------------------------------
def init_params(key, hidden, output_dim):
    H, O = hidden, output_dim
    ks = jax.random.split(key, 16)
    n = lambda k, shape, s: (s * jax.random.normal(k, shape)).astype(jnp.float32)
    sH = 1.0 / float(jnp.sqrt(H))
    return {
        # mlp_0: Linear(2,H) + 2 x Linear(H,H), each with LayerNorm affine
        "m0_w0":   n(ks[0], (2, H), 0.5),
        "m0_w12":  n(ks[1], (2, H, H), sH),
        "m0_b":    n(ks[2], (3, H), 0.1),
        "m0_g":    1.0 + n(ks[3], (3, H), 0.1),
        "m0_beta": n(ks[4], (3, H), 0.1),
        # GRU (weights pre-transposed: (H_in, H_out) per gate, gate order r,z,n)
        "wih":  n(ks[5], (3, H, H), sH),
        "whh":  n(ks[6], (3, H, H), sH),
        "bih":  n(ks[7], (3, H), 0.1),
        "bhh":  n(ks[8], (3, H), 0.1),
        # mlp_1: 3 x Linear(H,H) + LayerNorm affine
        "m1_w":    n(ks[9], (3, H, H), sH),
        "m1_b":    n(ks[10], (3, H), 0.1),
        "m1_g":    1.0 + n(ks[11], (3, H), 0.1),
        "m1_beta": n(ks[12], (3, H), 0.1),
        # out: Linear(H, O)
        "w_out": n(ks[13], (H, O), sH),
        "b_out": n(ks[14], (1, O), 0.1),
    }


def _round_up(x, m):
    return (x + m - 1) // m * m


def _pad_axis(x, axis, new_size):
    if x.shape[axis] == new_size:
        return x
    pads = [(0, 0)] * x.ndim
    pads[axis] = (0, new_size - x.shape[axis])
    return jnp.pad(x, pads)


# ---------------------------------------------------------------------------
# Pallas kernel + wrapper
# ---------------------------------------------------------------------------
def estimator_fl_pallas(f0, loud, params, output_dim,
                        batch_tile=None, time_chunk=None, use_bf16=True):
    B, T, _ = f0.shape
    H = params["m0_w0"].shape[1]
    O = output_dim
    Hp = _round_up(H, LANE)               # lane-padded hidden width
    Op = _round_up(O, LANE)               # lane-padded output width
    mm_dtype = jnp.bfloat16 if use_bf16 else jnp.float32

    # --- batch tiling: BT is a multiple of 8 (full sublanes); >= 2 programs on
    # the "parallel" batch axis whenever B >= 2 so both v7x TCs get work.
    # (On v5e/v6e a caller may pass batch_tile=B for a single bigger program.)
    if batch_tile is None:
        batch_tile = SUBLANE
    BT = _round_up(max(1, batch_tile), SUBLANE)
    min_programs = 2 if B >= 2 else 1
    NT = max(min_programs, pl.cdiv(B, BT))
    Bp = NT * BT                          # batch padded with zero rows

    # --- time chunking: activation VMEM scales with the chunk, not with T.
    if time_chunk is None:
        time_chunk = max(d for d in range(1, min(T, 128) + 1) if T % d == 0)
    assert T % time_chunk == 0, "time_chunk must divide T"
    TCH = time_chunk
    NC = T // TCH
    Mc = TCH * BT                         # rows per program (t-major in chunk)
    unroll = max(1, min(8, TCH))

    # ---- pad / stack parameters (zero padding keeps the math exact) -------
    p = params
    w0p  = _pad_axis(p["m0_w0"], 1, Hp)                                 # (2, Hp)
    w12p = _pad_axis(_pad_axis(p["m0_w12"], 1, Hp), 2, Hp).astype(mm_dtype)
    b0p  = _pad_axis(p["m0_b"], 1, Hp)                                  # (3, Hp)
    g0p  = _pad_axis(p["m0_g"], 1, Hp)
    be0p = _pad_axis(p["m0_beta"], 1, Hp)

    def stack_gates(w):                   # (3,H,H) -> (Hp, 3*Hp), order r,z,n
        w = _pad_axis(_pad_axis(w, 1, Hp), 2, Hp)
        return jnp.concatenate([w[0], w[1], w[2]], axis=1).astype(mm_dtype)

    def stack_bias(b):                    # (3,H) -> (1, 3*Hp), same order
        return _pad_axis(b, 1, Hp).reshape(1, 3 * Hp)

    wih_st = stack_gates(p["wih"])
    whh_st = stack_gates(p["whh"])
    bih_st = stack_bias(p["bih"])
    bhh_st = stack_bias(p["bhh"])

    w1p  = _pad_axis(_pad_axis(p["m1_w"], 1, Hp), 2, Hp).astype(mm_dtype)
    b1p  = _pad_axis(p["m1_b"], 1, Hp)
    g1p  = _pad_axis(p["m1_g"], 1, Hp)
    be1p = _pad_axis(p["m1_beta"], 1, Hp)

    woutp = _pad_axis(_pad_axis(p["w_out"], 0, Hp), 1, Op).astype(mm_dtype)
    boutp = _pad_axis(p["b_out"], 1, Op)                                # (1, Op)

    # ---- pack inputs into one lane-dense, t-major slab per batch tile -----
    x = jnp.concatenate([f0, loud], axis=-1)                 # (B, T, 2)
    x = _pad_axis(x, 0, Bp)                                  # (Bp, T, 2)
    x = (x.reshape(NT, BT, T, 2).transpose(0, 2, 1, 3)       # (NT, T, BT, 2)
           .reshape(NT, T * BT, 2))

    def kernel(x_ref,
               w0_ref, w12_ref, b0_ref, g0_ref, be0_ref,
               wih_ref, whh_ref, bih_ref, bhh_ref,
               w1_ref, b1_ref, g1_ref, be1_ref,
               wout_ref, bout_ref,
               out_ref,
               xg_ref, hc_ref):
        c = pl.program_id(1)
        inv_H = 1.0 / H

        def ln_lrelu(h, gamma, beta):
            # Pad lanes of h / gamma / beta are all exactly zero, so the
            # un-masked sums equal the sums over the real H features (torch's
            # biased variance) and pad lanes stay zero after the affine.
            mu = jnp.sum(h, axis=-1, keepdims=True) * inv_H
            var = jnp.sum(h * h, axis=-1, keepdims=True) * inv_H - mu * mu
            hn = (h - mu) * lax.rsqrt(var + LN_EPS) * gamma + beta
            return jnp.where(hn >= 0, hn, LRELU_SLOPE * hn)

        # ---- conditioning normalization (lane slices of the packed input) -
        xin = x_ref[0]                                        # (Mc, 2)
        f0n = (xin[:, 0:1] - FMIN) * (1.0 / (FMAX - FMIN))    # (Mc, 1)
        loudn = xin[:, 1:2] * (1.0 / DB_RANGE) + 1.0          # (Mc, 1)

        # ---- mlp_0 ---------------------------------------------------------
        # layer 0: Linear(2,H) as rank-1 outer products (avoids a K=2 matmul)
        h = f0n * w0_ref[0:1, :] + loudn * w0_ref[1:2, :] + b0_ref[0:1, :]
        h = ln_lrelu(h, g0_ref[0:1, :], be0_ref[0:1, :])
        for l in range(2):
            h = jnp.dot(h.astype(mm_dtype), w12_ref[l],
                        preferred_element_type=jnp.float32) + b0_ref[l + 1:l + 2, :]
            h = ln_lrelu(h, g0_ref[l + 1:l + 2, :], be0_ref[l + 1:l + 2, :])

        # ---- GRU -----------------------------------------------------------
        # Fused input-side gates for the whole chunk: one (Mc,Hp)@(Hp,3Hp) matmul.
        xg_ref[...] = jnp.dot(h.astype(mm_dtype), wih_ref[...],
                              preferred_element_type=jnp.float32) + bih_ref[...]

        @pl.when(c == 0)                  # fresh batch tile -> zero hidden state
        def _():
            hc_ref[...] = jnp.zeros_like(hc_ref)

        def sig(v):                       # one EUP tanh instead of exp + divide
            return 0.5 * jnp.tanh(0.5 * v) + 0.5

        # TODO(synk): on v5e, keep whh resident in the MXU across the time loop
        # via pltpu.matmul_push_rhs / matmul_acc_lhs / matmul_pop.
        def gru_step(t, hprev):           # hprev: (BT, Hp) f32
            hg = jnp.dot(hprev.astype(mm_dtype), whh_ref[...],
                         preferred_element_type=jnp.float32) + bhh_ref[...]
            row = pl.multiple_of(t * BT, BT)
            xg = xg_ref[pl.ds(row, BT), :]                    # (BT, 3Hp)
            r = sig(xg[:, 0:Hp] + hg[:, 0:Hp])
            z = sig(xg[:, Hp:2 * Hp] + hg[:, Hp:2 * Hp])
            n = jnp.tanh(xg[:, 2 * Hp:3 * Hp] + r * hg[:, 2 * Hp:3 * Hp])
            h_new = n + z * (hprev - n)
            # Reuse the already-consumed first Hp lanes of xg as output storage.
            xg_ref[pl.ds(row, BT), 0:Hp] = h_new
            return h_new

        h_last = lax.fori_loop(0, TCH, gru_step, hc_ref[...], unroll=unroll)
        hc_ref[...] = h_last              # carried into the next time chunk

        # ---- mlp_1 + out + sigmoid ----------------------------------------
        y = xg_ref[:, 0:Hp]                                   # (Mc, Hp)
        for l in range(3):
            y = jnp.dot(y.astype(mm_dtype), w1_ref[l],
                        preferred_element_type=jnp.float32) + b1_ref[l:l + 1, :]
            y = ln_lrelu(y, g1_ref[l:l + 1, :], be1_ref[l:l + 1, :])

        logits = jnp.dot(y.astype(mm_dtype), wout_ref[...],
                         preferred_element_type=jnp.float32) + bout_ref[...]
        out_ref[0] = jax.nn.sigmoid(logits).astype(out_ref.dtype)    # (Mc, Op)

    weights = [w0p, w12p, b0p, g0p, be0p,
               wih_st, whh_st, bih_st, bhh_st,
               w1p, b1p, g1p, be1p, woutp, boutp]

    def weight_spec(arr):
        nd = arr.ndim
        # Grid-invariant index map -> single-buffer; double-buffering these
        # constants would only burn VMEM.
        return pl.BlockSpec(arr.shape, lambda i, c, _nd=nd: (0,) * _nd,
                            pipeline_mode=pl.Buffered(1))

    in_specs = [pl.BlockSpec((1, Mc, 2), lambda i, c: (i, c, 0))]   # packed f0/loud
    in_specs += [weight_spec(w) for w in weights]

    out = pl.pallas_call(
        kernel,
        out_shape=jax.ShapeDtypeStruct((NT, T * BT, Op), jnp.float32),
        grid=(NT, NC),
        in_specs=in_specs,
        out_specs=pl.BlockSpec((1, Mc, Op), lambda i, c: (i, c, 0)),
        scratch_shapes=[pltpu.VMEM((Mc, 3 * Hp), jnp.float32),   # fused x-gates / GRU out
                        pltpu.VMEM((BT, Hp), jnp.float32)],      # GRU hidden carry
        compiler_params=pltpu.CompilerParams(
            dimension_semantics=("parallel", "arbitrary"),
            vmem_limit_bytes=64 * 1024 * 1024),
    )(x, *weights)

    # un-tile: (NT, T*BT, Op) -> (B, T, O)  (wrapper-side layout plumbing)
    y = (out.reshape(NT, T, BT, Op).transpose(0, 2, 1, 3)
            .reshape(Bp, T, Op)[:B, :, :O])
    return y


# ---------------------------------------------------------------------------
# Pure-JAX reference (same math, unpadded, f32) used as a correctness check.
# ---------------------------------------------------------------------------
def reference(f0, loud, p, hidden):
    H = hidden
    f0n = (f0 - FMIN) / (FMAX - FMIN)
    loudn = loud / DB_RANGE + 1.0
    x = jnp.concatenate([f0n, loudn], axis=-1)              # (B, T, 2)

    def ln_lrelu(h, g, be):
        mu = jnp.mean(h, -1, keepdims=True)
        var = jnp.mean((h - mu) ** 2, -1, keepdims=True)
        hn = (h - mu) * lax.rsqrt(var + LN_EPS) * g + be
        return jnp.where(hn >= 0, hn, LRELU_SLOPE * hn)

    h = ln_lrelu(x @ p["m0_w0"] + p["m0_b"][0], p["m0_g"][0], p["m0_beta"][0])
    for l in range(2):
        h = ln_lrelu(h @ p["m0_w12"][l] + p["m0_b"][l + 1],
                     p["m0_g"][l + 1], p["m0_beta"][l + 1])

    def step(hc, x_t):                                       # hc, x_t: (B, H)
        gi = jnp.einsum("bh,ghk->gbk", x_t, p["wih"]) + p["bih"][:, None, :]
        gh = jnp.einsum("bh,ghk->gbk", hc, p["whh"]) + p["bhh"][:, None, :]
        r = jax.nn.sigmoid(gi[0] + gh[0])
        z = jax.nn.sigmoid(gi[1] + gh[1])
        n = jnp.tanh(gi[2] + r * gh[2])
        hn = (1.0 - z) * n + z * hc
        return hn, hn

    B = x.shape[0]
    _, ys = lax.scan(step, jnp.zeros((B, H), jnp.float32), jnp.swapaxes(h, 0, 1))
    y = jnp.swapaxes(ys, 0, 1)                               # (B, T, H)

    for l in range(3):
        y = ln_lrelu(y @ p["m1_w"][l] + p["m1_b"][l], p["m1_g"][l], p["m1_beta"][l])
    return jax.nn.sigmoid(y @ p["w_out"] + p["b_out"])


if __name__ == "__main__":
    B, T, H, O = 2, 8, 32, 16

    key = jax.random.PRNGKey(0)
    k_f0, k_loud, k_par = jax.random.split(key, 3)
    f0 = jax.random.uniform(k_f0, (B, T, 1), jnp.float32, minval=FMIN, maxval=FMAX)
    loud = jax.random.uniform(k_loud, (B, T, 1), jnp.float32,
                              minval=-DB_RANGE, maxval=0.0)
    params = init_params(k_par, H, O)
    y_ref = reference(f0, loud, params, H)

    # 1) f32-matmul path: tight structural check of the kernel vs the reference.
    y32 = jax.block_until_ready(
        estimator_fl_pallas(f0, loud, params, O, use_bf16=False))
    assert y32.shape == (B, T, O)
    err32 = float(jnp.max(jnp.abs(y32 - y_ref)))
    assert err32 < 1e-4, f"f32 path mismatch vs reference: {err32}"

    # 2) f32 path with a non-trivial time-chunk grid: exercises the GRU hidden
    #    state carry across the "arbitrary" grid axis.
    ychunk = jax.block_until_ready(
        estimator_fl_pallas(f0, loud, params, O, use_bf16=False, time_chunk=4))
    errc = float(jnp.max(jnp.abs(ychunk - y_ref)))
    assert errc < 1e-4, f"time-chunked path mismatch vs reference: {errc}"

    # 3) Default fast path (bf16 MXU operands, f32 accumulation): looser
    #    tolerance vs the f32 reference due to bf16 rounding of matmul operands.
    y16 = jax.block_until_ready(estimator_fl_pallas(f0, loud, params, O))
    err16 = float(jnp.max(jnp.abs(y16 - y_ref)))
    assert err16 < 5e-2, f"bf16 path mismatch vs reference: {err16}"

    print("KERNEL_OK")
</pallas_src>

<mosaic_0001>
module attributes {stable_mosaic.version = 11 : i64} {
  func.func @kernel(%arg0: i32, %arg1: i32, %arg2: memref<1x64x2xf32, #tpu.memory_space<vmem>>, %arg3: memref<2x128xf32, #tpu.memory_space<vmem>>, %arg4: memref<2x128x128xf32, #tpu.memory_space<vmem>>, %arg5: memref<3x128xf32, #tpu.memory_space<vmem>>, %arg6: memref<3x128xf32, #tpu.memory_space<vmem>>, %arg7: memref<3x128xf32, #tpu.memory_space<vmem>>, %arg8: memref<128x384xf32, #tpu.memory_space<vmem>>, %arg9: memref<128x384xf32, #tpu.memory_space<vmem>>, %arg10: memref<1x384xf32, #tpu.memory_space<vmem>>, %arg11: memref<1x384xf32, #tpu.memory_space<vmem>>, %arg12: memref<3x128x128xf32, #tpu.memory_space<vmem>>, %arg13: memref<3x128xf32, #tpu.memory_space<vmem>>, %arg14: memref<3x128xf32, #tpu.memory_space<vmem>>, %arg15: memref<3x128xf32, #tpu.memory_space<vmem>>, %arg16: memref<128x128xf32, #tpu.memory_space<vmem>>, %arg17: memref<1x128xf32, #tpu.memory_space<vmem>>, %arg18: memref<1x64x128xf32, #tpu.memory_space<vmem>>, %arg19: memref<64x384xf32, #tpu.memory_space<vmem>>, %arg20: memref<8x128xf32, #tpu.memory_space<vmem>>) attributes {dimension_semantics = [#tpu.dimension_semantics<parallel>, #tpu.dimension_semantics<arbitrary>], iteration_bounds = array<i64: 2, 1>, scalar_prefetch = 0 : i64, scratch_operands = 2 : i64, tpu.core_type = #tpu.core_type<tc>, window_params = [{transform_indices = @transform_0, window_bounds = array<i64: 1, 64, 2>}, {pipeline_mode = #tpu.pipeline_mode<synchronous>, transform_indices = @transform_1, window_bounds = array<i64: 2, 128>}, {pipeline_mode = #tpu.pipeline_mode<synchronous>, transform_indices = @transform_2, window_bounds = array<i64: 2, 128, 128>}, {pipeline_mode = #tpu.pipeline_mode<synchronous>, transform_indices = @transform_3, window_bounds = array<i64: 3, 128>}, {pipeline_mode = #tpu.pipeline_mode<synchronous>, transform_indices = @transform_4, window_bounds = array<i64: 3, 128>}, {pipeline_mode = #tpu.pipeline_mode<synchronous>, transform_indices = @transform_5, window_bounds = array<i64: 3, 128>}, {pipeline_mode = #tpu.pipeline_mode<synchronous>, transform_indices = @transform_6, window_bounds = array<i64: 128, 384>}, {pipeline_mode = #tpu.pipeline_mode<synchronous>, transform_indices = @transform_7, window_bounds = array<i64: 128, 384>}, {pipeline_mode = #tpu.pipeline_mode<synchronous>, transform_indices = @transform_8, window_bounds = array<i64: 1, 384>}, {pipeline_mode = #tpu.pipeline_mode<synchronous>, transform_indices = @transform_9, window_bounds = array<i64: 1, 384>}, {pipeline_mode = #tpu.pipeline_mode<synchronous>, transform_indices = @transform_10, window_bounds = array<i64: 3, 128, 128>}, {pipeline_mode = #tpu.pipeline_mode<synchronous>, transform_indices = @transform_11, window_bounds = array<i64: 3, 128>}, {pipeline_mode = #tpu.pipeline_mode<synchronous>, transform_indices = @transform_12, window_bounds = array<i64: 3, 128>}, {pipeline_mode = #tpu.pipeline_mode<synchronous>, transform_indices = @transform_13, window_bounds = array<i64: 3, 128>}, {pipeline_mode = #tpu.pipeline_mode<synchronous>, transform_indices = @transform_14, window_bounds = array<i64: 128, 128>}, {pipeline_mode = #tpu.pipeline_mode<synchronous>, transform_indices = @transform_15, window_bounds = array<i64: 1, 128>}, {transform_indices = @transform_16, window_bounds = array<i64: 1, 64, 128>}]} {
    %c0 = arith.constant 0 : index
    %c0_0 = arith.constant 0 : index
    %c0_1 = arith.constant 0 : index
    %0 = vector.load %arg2[%c0, %c0_0, %c0_1] : memref<1x64x2xf32, #tpu.memory_space<vmem>>, vector<1x64x2xf32>
    %1 = vector.shape_cast %0 : vector<1x64x2xf32> to vector<64x2xf32>
    %2 = vector.extract_strided_slice %1 {offsets = [0, 0], sizes = [64, 1], strides = [1, 1]} : vector<64x2xf32> to vector<64x1xf32>
    %cst = arith.constant 3.270000e+01 : f32
    %3 = vector.broadcast %cst : f32 to vector<64x1xf32>
    %4 = arith.subf %2, %3 : vector<64x1xf32>
    %cst_2 = arith.constant 5.08310855E-4 : f32
    %5 = vector.broadcast %cst_2 : f32 to vector<64x1xf32>
    %6 = arith.mulf %4, %5 : vector<64x1xf32>
    %7 = vector.extract_strided_slice %1 {offsets = [0, 1], sizes = [64, 1], strides = [1, 1]} : vector<64x2xf32> to vector<64x1xf32>
    %cst_3 = arith.constant 1.250000e-02 : f32
    %8 = vector.broadcast %cst_3 : f32 to vector<64x1xf32>
    %9 = arith.mulf %7, %8 : vector<64x1xf32>
    %cst_4 = arith.constant 1.000000e+00 : f32
    %10 = vector.broadcast %cst_4 : f32 to vector<64x1xf32>
    %11 = arith.addf %9, %10 : vector<64x1xf32>
    %c0_5 = arith.constant 0 : index
    %c0_6 = arith.constant 0 : index
    %12 = vector.load %arg3[%c0_5, %c0_6] : memref<2x128xf32, #tpu.memory_space<vmem>>, vector<1x128xf32>
    %13 = vector.broadcast %6 : vector<64x1xf32> to vector<64x128xf32>
    %14 = vector.broadcast %12 : vector<1x128xf32> to vector<64x128xf32>
    %15 = arith.mulf %13, %14 : vector<64x128xf32>
    %c1 = arith.constant 1 : index
    %c0_7 = arith.constant 0 : index
    %16 = vector.load %arg3[%c1, %c0_7] : memref<2x128xf32, #tpu.memory_space<vmem>>, vector<1x128xf32>
    %17 = vector.broadcast %11 : vector<64x1xf32> to vector<64x128xf32>
    %18 = vector.broadcast %16 : vector<1x128xf32> to vector<64x128xf32>
    %19 = arith.mulf %17, %18 : vector<64x128xf32>
    %20 = arith.addf %15, %19 : vector<64x128xf32>
    %c0_8 = arith.constant 0 : index
    %c0_9 = arith.constant 0 : index
    %21 = vector.load %arg5[%c0_8, %c0_9] : memref<3x128xf32, #tpu.memory_space<vmem>>, vector<1x128xf32>
    %22 = vector.broadcast %21 : vector<1x128xf32> to vector<64x128xf32>
    %23 = arith.addf %20, %22 : vector<64x128xf32>
    %c0_10 = arith.constant 0 : index
    %c0_11 = arith.constant 0 : index
    %24 = vector.load %arg6[%c0_10, %c0_11] : memref<3x128xf32, #tpu.memory_space<vmem>>, vector<1x128xf32>
    %c0_12 = arith.constant 0 : index
    %c0_13 = arith.constant 0 : index
    %25 = vector.load %arg7[%c0_12, %c0_13] : memref<3x128xf32, #tpu.memory_space<vmem>>, vector<1x128xf32>
    %cst_14 = arith.constant dense<0.000000e+00> : vector<64xf32>
    %26 = vector.multi_reduction <add>, %23, %cst_14 [1] : vector<64x128xf32> to vector<64xf32>
    %27 = vector.shape_cast %26 : vector<64xf32> to vector<64x1xf32>
    %cst_15 = arith.constant 3.125000e-02 : f32
    %28 = vector.broadcast %cst_15 : f32 to vector<64x1xf32>
    %29 = arith.mulf %27, %28 : vector<64x1xf32>
    %30 = arith.mulf %23, %23 : vector<64x128xf32>
    %cst_16 = arith.constant dense<0.000000e+00> : vector<64xf32>
    %31 = vector.multi_reduction <add>, %30, %cst_16 [1] : vector<64x128xf32> to vector<64xf32>
    %32 = vector.shape_cast %31 : vector<64xf32> to vector<64x1xf32>
    %cst_17 = arith.constant 3.125000e-02 : f32
    %33 = vector.broadcast %cst_17 : f32 to vector<64x1xf32>
    %34 = arith.mulf %32, %33 : vector<64x1xf32>
    %35 = arith.mulf %29, %29 : vector<64x1xf32>
    %36 = arith.subf %34, %35 : vector<64x1xf32>
    %37 = vector.broadcast %29 : vector<64x1xf32> to vector<64x128xf32>
    %38 = arith.subf %23, %37 : vector<64x128xf32>
    %cst_18 = arith.constant 9.99999974E-6 : f32
    %39 = vector.broadcast %cst_18 : f32 to vector<64x1xf32>
    %40 = arith.addf %36, %39 : vector<64x1xf32>
    %41 = math.rsqrt %40 : vector<64x1xf32>
    %42 = vector.broadcast %41 : vector<64x1xf32> to vector<64x128xf32>
    %43 = arith.mulf %38, %42 : vector<64x128xf32>
    %44 = vector.broadcast %24 : vector<1x128xf32> to vector<64x128xf32>
    %45 = arith.mulf %43, %44 : vector<64x128xf32>
    %46 = vector.broadcast %25 : vector<1x128xf32> to vector<64x128xf32>
    %47 = arith.addf %45, %46 : vector<64x128xf32>
    %cst_19 = arith.constant 0.000000e+00 : f32
    %48 = vector.broadcast %cst_19 : f32 to vector<64x128xf32>
    %49 = arith.cmpf oge, %47, %48 : vector<64x128xf32>
    %cst_20 = arith.constant 0.00999999977 : f32
    %50 = vector.broadcast %cst_20 : f32 to vector<64x128xf32>
    %51 = arith.mulf %50, %47 : vector<64x128xf32>
    %52 = arith.select %49, %47, %51 : vector<64x128xi1>, vector<64x128xf32>
    %c0_21 = arith.constant 0 : index
    %c0_22 = arith.constant 0 : index
    %c0_23 = arith.constant 0 : index
    %53 = vector.load %arg4[%c0_21, %c0_22, %c0_23] : memref<2x128x128xf32, #tpu.memory_space<vmem>>, vector<1x128x128xf32>
    %54 = vector.shape_cast %53 : vector<1x128x128xf32> to vector<128x128xf32>
    %cst_24 = arith.constant dense<0.000000e+00> : vector<64x128xf32>
    %55 = tpu.matmul %52, %54, %cst_24 {dimension_numbers = #tpu.dot_dimension_numbers<[1], [0], [0], [1], [0, 0, 1, 1], [], []>} : vector<64x128xf32>, vector<128x128xf32>, vector<64x128xf32> -> vector<64x128xf32>
    %c1_25 = arith.constant 1 : index
    %c0_26 = arith.constant 0 : index
    %56 = vector.load %arg5[%c1_25, %c0_26] : memref<3x128xf32, #tpu.memory_space<vmem>>, vector<1x128xf32>
    %57 = vector.broadcast %56 : vector<1x128xf32> to vector<64x128xf32>
    %58 = arith.addf %55, %57 : vector<64x128xf32>
    %c1_27 = arith.constant 1 : index
    %c0_28 = arith.constant 0 : index
    %59 = vector.load %arg6[%c1_27, %c0_28] : memref<3x128xf32, #tpu.memory_space<vmem>>, vector<1x128xf32>
    %c1_29 = arith.constant 1 : index
    %c0_30 = arith.constant 0 : index
    %60 = vector.load %arg7[%c1_29, %c0_30] : memref<3x128xf32, #tpu.memory_space<vmem>>, vector<1x128xf32>
    %cst_31 = arith.constant dense<0.000000e+00> : vector<64xf32>
    %61 = vector.multi_reduction <add>, %58, %cst_31 [1] : vector<64x128xf32> to vector<64xf32>
    %62 = vector.shape_cast %61 : vector<64xf32> to vector<64x1xf32>
    %cst_32 = arith.constant 3.125000e-02 : f32
    %63 = vector.broadcast %cst_32 : f32 to vector<64x1xf32>
    %64 = arith.mulf %62, %63 : vector<64x1xf32>
    %65 = arith.mulf %58, %58 : vector<64x128xf32>
    %cst_33 = arith.constant dense<0.000000e+00> : vector<64xf32>
    %66 = vector.multi_reduction <add>, %65, %cst_33 [1] : vector<64x128xf32> to vector<64xf32>
    %67 = vector.shape_cast %66 : vector<64xf32> to vector<64x1xf32>
    %cst_34 = arith.constant 3.125000e-02 : f32
    %68 = vector.broadcast %cst_34 : f32 to vector<64x1xf32>
    %69 = arith.mulf %67, %68 : vector<64x1xf32>
    %70 = arith.mulf %64, %64 : vector<64x1xf32>
    %71 = arith.subf %69, %70 : vector<64x1xf32>
    %72 = vector.broadcast %64 : vector<64x1xf32> to vector<64x128xf32>
    %73 = arith.subf %58, %72 : vector<64x128xf32>
    %cst_35 = arith.constant 9.99999974E-6 : f32
    %74 = vector.broadcast %cst_35 : f32 to vector<64x1xf32>
    %75 = arith.addf %71, %74 : vector<64x1xf32>
    %76 = math.rsqrt %75 : vector<64x1xf32>
    %77 = vector.broadcast %76 : vector<64x1xf32> to vector<64x128xf32>
    %78 = arith.mulf %73, %77 : vector<64x128xf32>
    %79 = vector.broadcast %59 : vector<1x128xf32> to vector<64x128xf32>
    %80 = arith.mulf %78, %79 : vector<64x128xf32>
    %81 = vector.broadcast %60 : vector<1x128xf32> to vector<64x128xf32>
    %82 = arith.addf %80, %81 : vector<64x128xf32>
    %cst_36 = arith.constant 0.000000e+00 : f32
    %83 = vector.broadcast %cst_36 : f32 to vector<64x128xf32>
    %84 = arith.cmpf oge, %82, %83 : vector<64x128xf32>
    %cst_37 = arith.constant 0.00999999977 : f32
    %85 = vector.broadcast %cst_37 : f32 to vector<64x128xf32>
    %86 = arith.mulf %85, %82 : vector<64x128xf32>
    %87 = arith.select %84, %82, %86 : vector<64x128xi1>, vector<64x128xf32>
    %c1_38 = arith.constant 1 : index
    %c0_39 = arith.constant 0 : index
    %c0_40 = arith.constant 0 : index
    %88 = vector.load %arg4[%c1_38, %c0_39, %c0_40] : memref<2x128x128xf32, #tpu.memory_space<vmem>>, vector<1x128x128xf32>
    %89 = vector.shape_cast %88 : vector<1x128x128xf32> to vector<128x128xf32>
    %cst_41 = arith.constant dense<0.000000e+00> : vector<64x128xf32>
    %90 = tpu.matmul %87, %89, %cst_41 {dimension_numbers = #tpu.dot_dimension_numbers<[1], [0], [0], [1], [0, 0, 1, 1], [], []>} : vector<64x128xf32>, vector<128x128xf32>, vector<64x128xf32> -> vector<64x128xf32>
    %c2 = arith.constant 2 : index
    %c0_42 = arith.constant 0 : index
    %91 = vector.load %arg5[%c2, %c0_42] : memref<3x128xf32, #tpu.memory_space<vmem>>, vector<1x128xf32>
    %92 = vector.broadcast %91 : vector<1x128xf32> to vector<64x128xf32>
    %93 = arith.addf %90, %92 : vector<64x128xf32>
    %c2_43 = arith.constant 2 : index
    %c0_44 = arith.constant 0 : index
    %94 = vector.load %arg6[%c2_43, %c0_44] : memref<3x128xf32, #tpu.memory_space<vmem>>, vector<1x128xf32>
    %c2_45 = arith.constant 2 : index
    %c0_46 = arith.constant 0 : index
    %95 = vector.load %arg7[%c2_45, %c0_46] : memref<3x128xf32, #tpu.memory_space<vmem>>, vector<1x128xf32>
    %cst_47 = arith.constant dense<0.000000e+00> : vector<64xf32>
    %96 = vector.multi_reduction <add>, %93, %cst_47 [1] : vector<64x128xf32> to vector<64xf32>
    %97 = vector.shape_cast %96 : vector<64xf32> to vector<64x1xf32>
    %cst_48 = arith.constant 3.125000e-02 : f32
    %98 = vector.broadcast %cst_48 : f32 to vector<64x1xf32>
    %99 = arith.mulf %97, %98 : vector<64x1xf32>
    %100 = arith.mulf %93, %93 : vector<64x128xf32>
    %cst_49 = arith.constant dense<0.000000e+00> : vector<64xf32>
    %101 = vector.multi_reduction <add>, %100, %cst_49 [1] : vector<64x128xf32> to vector<64xf32>
    %102 = vector.shape_cast %101 : vector<64xf32> to vector<64x1xf32>
    %cst_50 = arith.constant 3.125000e-02 : f32
    %103 = vector.broadcast %cst_50 : f32 to vector<64x1xf32>
    %104 = arith.mulf %102, %103 : vector<64x1xf32>
    %105 = arith.mulf %99, %99 : vector<64x1xf32>
    %106 = arith.subf %104, %105 : vector<64x1xf32>
    %107 = vector.broadcast %99 : vector<64x1xf32> to vector<64x128xf32>
    %108 = arith.subf %93, %107 : vector<64x128xf32>
    %cst_51 = arith.constant 9.99999974E-6 : f32
    %109 = vector.broadcast %cst_51 : f32 to vector<64x1xf32>
    %110 = arith.addf %106, %109 : vector<64x1xf32>
    %111 = math.rsqrt %110 : vector<64x1xf32>
    %112 = vector.broadcast %111 : vector<64x1xf32> to vector<64x128xf32>
    %113 = arith.mulf %108, %112 : vector<64x128xf32>
    %114 = vector.broadcast %94 : vector<1x128xf32> to vector<64x128xf32>
    %115 = arith.mulf %113, %114 : vector<64x128xf32>
    %116 = vector.broadcast %95 : vector<1x128xf32> to vector<64x128xf32>
    %117 = arith.addf %115, %116 : vector<64x128xf32>
    %cst_52 = arith.constant 0.000000e+00 : f32
    %118 = vector.broadcast %cst_52 : f32 to vector<64x128xf32>
    %119 = arith.cmpf oge, %117, %118 : vector<64x128xf32>
    %cst_53 = arith.constant 0.00999999977 : f32
    %120 = vector.broadcast %cst_53 : f32 to vector<64x128xf32>
    %121 = arith.mulf %120, %117 : vector<64x128xf32>
    %122 = arith.select %119, %117, %121 : vector<64x128xi1>, vector<64x128xf32>
    %c0_54 = arith.constant 0 : index
    %c0_55 = arith.constant 0 : index
    %123 = vector.load %arg8[%c0_54, %c0_55] : memref<128x384xf32, #tpu.memory_space<vmem>>, vector<128x384xf32>
    %cst_56 = arith.constant dense<0.000000e+00> : vector<64x384xf32>
    %124 = tpu.matmul %122, %123, %cst_56 {dimension_numbers = #tpu.dot_dimension_numbers<[1], [0], [0], [1], [0, 0, 1, 1], [], []>} : vector<64x128xf32>, vector<128x384xf32>, vector<64x384xf32> -> vector<64x384xf32>
    %c0_57 = arith.constant 0 : index
    %c0_58 = arith.constant 0 : index
    %125 = vector.load %arg10[%c0_57, %c0_58] : memref<1x384xf32, #tpu.memory_space<vmem>>, vector<1x384xf32>
    %126 = vector.broadcast %125 : vector<1x384xf32> to vector<64x384xf32>
    %127 = arith.addf %124, %126 : vector<64x384xf32>
    %c0_59 = arith.constant 0 : index
    %c0_60 = arith.constant 0 : index
    %128 = vector.load %arg19[%c0_59, %c0_60] : memref<64x384xf32, #tpu.memory_space<vmem>>, vector<64x384xf32>
    tpu.vector_store %arg19[%c0_59, %c0_60], %127 {strides = array<i32>} : memref<64x384xf32, #tpu.memory_space<vmem>>, vector<64x384xf32>,
    %c0_i32 = arith.constant 0 : i32
    %129 = arith.cmpi eq, %arg1, %c0_i32 : i32
    %130 = arith.extui %129 : i1 to i32
    %c0_i32_61 = arith.constant 0 : i32
    %131 = arith.cmpi ne, %130, %c0_i32_61 : i32
    scf.if %131 {
      %cst_241 = arith.constant 0.000000e+00 : f32
      %565 = vector.broadcast %cst_241 : f32 to vector<8x128xf32>
      %c0_242 = arith.constant 0 : index
      %c0_243 = arith.constant 0 : index
      %566 = vector.load %arg20[%c0_242, %c0_243] : memref<8x128xf32, #tpu.memory_space<vmem>>, vector<8x128xf32>
      tpu.vector_store %arg20[%c0_242, %c0_243], %565 {strides = array<i32>} : memref<8x128xf32, #tpu.memory_space<vmem>>, vector<8x128xf32>,
    } else {
    }
    %c0_62 = arith.constant 0 : index
    %c0_63 = arith.constant 0 : index
    %132 = vector.load %arg20[%c0_62, %c0_63] : memref<8x128xf32, #tpu.memory_space<vmem>>, vector<8x128xf32>
    %c0_i32_64 = arith.constant 0 : i32
    %c0_65 = arith.constant 0 : index
    %c0_66 = arith.constant 0 : index
    %133 = vector.load %arg9[%c0_65, %c0_66] : memref<128x384xf32, #tpu.memory_space<vmem>>, vector<128x384xf32>
    %cst_67 = arith.constant dense<0.000000e+00> : vector<8x384xf32>
    %134 = tpu.matmul %132, %133, %cst_67 {dimension_numbers = #tpu.dot_dimension_numbers<[1], [0], [0], [1], [0, 0, 1, 1], [], []>} : vector<8x128xf32>, vector<128x384xf32>, vector<8x384xf32> -> vector<8x384xf32>
    %c0_68 = arith.constant 0 : index
    %c0_69 = arith.constant 0 : index
    %135 = vector.load %arg11[%c0_68, %c0_69] : memref<1x384xf32, #tpu.memory_space<vmem>>, vector<1x384xf32>
    %136 = vector.broadcast %135 : vector<1x384xf32> to vector<8x384xf32>
    %137 = arith.addf %134, %136 : vector<8x384xf32>
    %c8_i32 = arith.constant 8 : i32
    %138 = arith.muli %c0_i32_64, %c8_i32 : i32
    %139 = tpu.assume_multiple %138, 8 : i32
    %140 = arith.index_cast %139 : i32 to index
    %c0_70 = arith.constant 0 : index
    %141 = vector.load %arg19[%140, %c0_70] : memref<64x384xf32, #tpu.memory_space<vmem>>, vector<8x384xf32>
    %142 = vector.extract_strided_slice %141 {offsets = [0, 0], sizes = [8, 128], strides = [1, 1]} : vector<8x384xf32> to vector<8x128xf32>
    %143 = vector.extract_strided_slice %137 {offsets = [0, 0], sizes = [8, 128], strides = [1, 1]} : vector<8x384xf32> to vector<8x128xf32>
    %144 = arith.addf %142, %143 : vector<8x128xf32>
    %cst_71 = arith.constant 5.000000e-01 : f32
    %145 = vector.broadcast %cst_71 : f32 to vector<8x128xf32>
    %146 = arith.mulf %145, %144 : vector<8x128xf32>
    %147 = math.tanh %146 : vector<8x128xf32>
    %cst_72 = arith.constant 5.000000e-01 : f32
    %148 = vector.broadcast %cst_72 : f32 to vector<8x128xf32>
    %149 = arith.mulf %148, %147 : vector<8x128xf32>
    %cst_73 = arith.constant 5.000000e-01 : f32
    %150 = vector.broadcast %cst_73 : f32 to vector<8x128xf32>
    %151 = arith.addf %149, %150 : vector<8x128xf32>
    %152 = vector.extract_strided_slice %141 {offsets = [0, 128], sizes = [8, 128], strides = [1, 1]} : vector<8x384xf32> to vector<8x128xf32>
    %153 = vector.extract_strided_slice %137 {offsets = [0, 128], sizes = [8, 128], strides = [1, 1]} : vector<8x384xf32> to vector<8x128xf32>
    %154 = arith.addf %152, %153 : vector<8x128xf32>
    %cst_74 = arith.constant 5.000000e-01 : f32
    %155 = vector.broadcast %cst_74 : f32 to vector<8x128xf32>
    %156 = arith.mulf %155, %154 : vector<8x128xf32>
    %157 = math.tanh %156 : vector<8x128xf32>
    %cst_75 = arith.constant 5.000000e-01 : f32
    %158 = vector.broadcast %cst_75 : f32 to vector<8x128xf32>
    %159 = arith.mulf %158, %157 : vector<8x128xf32>
    %cst_76 = arith.constant 5.000000e-01 : f32
    %160 = vector.broadcast %cst_76 : f32 to vector<8x128xf32>
    %161 = arith.addf %159, %160 : vector<8x128xf32>
    %162 = vector.extract_strided_slice %141 {offsets = [0, 256], sizes = [8, 128], strides = [1, 1]} : vector<8x384xf32> to vector<8x128xf32>
    %163 = vector.extract_strided_slice %137 {offsets = [0, 256], sizes = [8, 128], strides = [1, 1]} : vector<8x384xf32> to vector<8x128xf32>
    %164 = arith.mulf %151, %163 : vector<8x128xf32>
    %165 = arith.addf %162, %164 : vector<8x128xf32>
    %166 = math.tanh %165 : vector<8x128xf32>
    %167 = arith.subf %132, %166 : vector<8x128xf32>
    %168 = arith.mulf %161, %167 : vector<8x128xf32>
    %169 = arith.addf %166, %168 : vector<8x128xf32>
    %170 = arith.index_cast %139 : i32 to index
    %c0_77 = arith.constant 0 : index
    %171 = vector.load %arg19[%170, %c0_77] : memref<64x384xf32, #tpu.memory_space<vmem>>, vector<8x128xf32>
    tpu.vector_store %arg19[%170, %c0_77], %169 {strides = array<i32>} : memref<64x384xf32, #tpu.memory_space<vmem>>, vector<8x128xf32>,
    %c1_i32 = arith.constant 1 : i32
    %c0_78 = arith.constant 0 : index
    %c0_79 = arith.constant 0 : index
    %172 = vector.load %arg9[%c0_78, %c0_79] : memref<128x384xf32, #tpu.memory_space<vmem>>, vector<128x384xf32>
    %cst_80 = arith.constant dense<0.000000e+00> : vector<8x384xf32>
    %173 = tpu.matmul %169, %172, %cst_80 {dimension_numbers = #tpu.dot_dimension_numbers<[1], [0], [0], [1], [0, 0, 1, 1], [], []>} : vector<8x128xf32>, vector<128x384xf32>, vector<8x384xf32> -> vector<8x384xf32>
    %c0_81 = arith.constant 0 : index
    %c0_82 = arith.constant 0 : index
    %174 = vector.load %arg11[%c0_81, %c0_82] : memref<1x384xf32, #tpu.memory_space<vmem>>, vector<1x384xf32>
    %175 = vector.broadcast %174 : vector<1x384xf32> to vector<8x384xf32>
    %176 = arith.addf %173, %175 : vector<8x384xf32>
    %c8_i32_83 = arith.constant 8 : i32
    %177 = arith.muli %c1_i32, %c8_i32_83 : i32
    %178 = tpu.assume_multiple %177, 8 : i32
    %179 = arith.index_cast %178 : i32 to index
    %c0_84 = arith.constant 0 : index
    %180 = vector.load %arg19[%179, %c0_84] : memref<64x384xf32, #tpu.memory_space<vmem>>, vector<8x384xf32>
    %181 = vector.extract_strided_slice %180 {offsets = [0, 0], sizes = [8, 128], strides = [1, 1]} : vector<8x384xf32> to vector<8x128xf32>
    %182 = vector.extract_strided_slice %176 {offsets = [0, 0], sizes = [8, 128], strides = [1, 1]} : vector<8x384xf32> to vector<8x128xf32>
    %183 = arith.addf %181, %182 : vector<8x128xf32>
    %cst_85 = arith.constant 5.000000e-01 : f32
    %184 = vector.broadcast %cst_85 : f32 to vector<8x128xf32>
    %185 = arith.mulf %184, %183 : vector<8x128xf32>
    %186 = math.tanh %185 : vector<8x128xf32>
    %cst_86 = arith.constant 5.000000e-01 : f32
    %187 = vector.broadcast %cst_86 : f32 to vector<8x128xf32>
    %188 = arith.mulf %187, %186 : vector<8x128xf32>
    %cst_87 = arith.constant 5.000000e-01 : f32
    %189 = vector.broadcast %cst_87 : f32 to vector<8x128xf32>
    %190 = arith.addf %188, %189 : vector<8x128xf32>
    %191 = vector.extract_strided_slice %180 {offsets = [0, 128], sizes = [8, 128], strides = [1, 1]} : vector<8x384xf32> to vector<8x128xf32>
    %192 = vector.extract_strided_slice %176 {offsets = [0, 128], sizes = [8, 128], strides = [1, 1]} : vector<8x384xf32> to vector<8x128xf32>
    %193 = arith.addf %191, %192 : vector<8x128xf32>
    %cst_88 = arith.constant 5.000000e-01 : f32
    %194 = vector.broadcast %cst_88 : f32 to vector<8x128xf32>
    %195 = arith.mulf %194, %193 : vector<8x128xf32>
    %196 = math.tanh %195 : vector<8x128xf32>
    %cst_89 = arith.constant 5.000000e-01 : f32
    %197 = vector.broadcast %cst_89 : f32 to vector<8x128xf32>
    %198 = arith.mulf %197, %196 : vector<8x128xf32>
    %cst_90 = arith.constant 5.000000e-01 : f32
    %199 = vector.broadcast %cst_90 : f32 to vector<8x128xf32>
    %200 = arith.addf %198, %199 : vector<8x128xf32>
    %201 = vector.extract_strided_slice %180 {offsets = [0, 256], sizes = [8, 128], strides = [1, 1]} : vector<8x384xf32> to vector<8x128xf32>
    %202 = vector.extract_strided_slice %176 {offsets = [0, 256], sizes = [8, 128], strides = [1, 1]} : vector<8x384xf32> to vector<8x128xf32>
    %203 = arith.mulf %190, %202 : vector<8x128xf32>
    %204 = arith.addf %201, %203 : vector<8x128xf32>
    %205 = math.tanh %204 : vector<8x128xf32>
    %206 = arith.subf %169, %205 : vector<8x128xf32>
    %207 = arith.mulf %200, %206 : vector<8x128xf32>
    %208 = arith.addf %205, %207 : vector<8x128xf32>
    %209 = arith.index_cast %178 : i32 to index
    %c0_91 = arith.constant 0 : index
    %210 = vector.load %arg19[%209, %c0_91] : memref<64x384xf32, #tpu.memory_space<vmem>>, vector<8x128xf32>
    tpu.vector_store %arg19[%209, %c0_91], %208 {strides = array<i32>} : memref<64x384xf32, #tpu.memory_space<vmem>>, vector<8x128xf32>,
    %c2_i32 = arith.constant 2 : i32
    %c0_92 = arith.constant 0 : index
    %c0_93 = arith.constant 0 : index
    %211 = vector.load %arg9[%c0_92, %c0_93] : memref<128x384xf32, #tpu.memory_space<vmem>>, vector<128x384xf32>
    %cst_94 = arith.constant dense<0.000000e+00> : vector<8x384xf32>
    %212 = tpu.matmul %208, %211, %cst_94 {dimension_numbers = #tpu.dot_dimension_numbers<[1], [0], [0], [1], [0, 0, 1, 1], [], []>} : vector<8x128xf32>, vector<128x384xf32>, vector<8x384xf32> -> vector<8x384xf32>
    %c0_95 = arith.constant 0 : index
    %c0_96 = arith.constant 0 : index
    %213 = vector.load %arg11[%c0_95, %c0_96] : memref<1x384xf32, #tpu.memory_space<vmem>>, vector<1x384xf32>
    %214 = vector.broadcast %213 : vector<1x384xf32> to vector<8x384xf32>
    %215 = arith.addf %212, %214 : vector<8x384xf32>
    %c8_i32_97 = arith.constant 8 : i32
    %216 = arith.muli %c2_i32, %c8_i32_97 : i32
    %217 = tpu.assume_multiple %216, 8 : i32
    %218 = arith.index_cast %217 : i32 to index
    %c0_98 = arith.constant 0 : index
    %219 = vector.load %arg19[%218, %c0_98] : memref<64x384xf32, #tpu.memory_space<vmem>>, vector<8x384xf32>
    %220 = vector.extract_strided_slice %219 {offsets = [0, 0], sizes = [8, 128], strides = [1, 1]} : vector<8x384xf32> to vector<8x128xf32>
    %221 = vector.extract_strided_slice %215 {offsets = [0, 0], sizes = [8, 128], strides = [1, 1]} : vector<8x384xf32> to vector<8x128xf32>
    %222 = arith.addf %220, %221 : vector<8x128xf32>
    %cst_99 = arith.constant 5.000000e-01 : f32
    %223 = vector.broadcast %cst_99 : f32 to vector<8x128xf32>
    %224 = arith.mulf %223, %222 : vector<8x128xf32>
    %225 = math.tanh %224 : vector<8x128xf32>
    %cst_100 = arith.constant 5.000000e-01 : f32
    %226 = vector.broadcast %cst_100 : f32 to vector<8x128xf32>
    %227 = arith.mulf %226, %225 : vector<8x128xf32>
    %cst_101 = arith.constant 5.000000e-01 : f32
    %228 = vector.broadcast %cst_101 : f32 to vector<8x128xf32>
    %229 = arith.addf %227, %228 : vector<8x128xf32>
    %230 = vector.extract_strided_slice %219 {offsets = [0, 128], sizes = [8, 128], strides = [1, 1]} : vector<8x384xf32> to vector<8x128xf32>
    %231 = vector.extract_strided_slice %215 {offsets = [0, 128], sizes = [8, 128], strides = [1, 1]} : vector<8x384xf32> to vector<8x128xf32>
    %232 = arith.addf %230, %231 : vector<8x128xf32>
    %cst_102 = arith.constant 5.000000e-01 : f32
    %233 = vector.broadcast %cst_102 : f32 to vector<8x128xf32>
    %234 = arith.mulf %233, %232 : vector<8x128xf32>
    %235 = math.tanh %234 : vector<8x128xf32>
    %cst_103 = arith.constant 5.000000e-01 : f32
    %236 = vector.broadcast %cst_103 : f32 to vector<8x128xf32>
    %237 = arith.mulf %236, %235 : vector<8x128xf32>
    %cst_104 = arith.constant 5.000000e-01 : f32
    %238 = vector.broadcast %cst_104 : f32 to vector<8x128xf32>
    %239 = arith.addf %237, %238 : vector<8x128xf32>
    %240 = vector.extract_strided_slice %219 {offsets = [0, 256], sizes = [8, 128], strides = [1, 1]} : vector<8x384xf32> to vector<8x128xf32>
    %241 = vector.extract_strided_slice %215 {offsets = [0, 256], sizes = [8, 128], strides = [1, 1]} : vector<8x384xf32> to vector<8x128xf32>
    %242 = arith.mulf %229, %241 : vector<8x128xf32>
    %243 = arith.addf %240, %242 : vector<8x128xf32>
    %244 = math.tanh %243 : vector<8x128xf32>
    %245 = arith.subf %208, %244 : vector<8x128xf32>
    %246 = arith.mulf %239, %245 : vector<8x128xf32>
    %247 = arith.addf %244, %246 : vector<8x128xf32>
    %248 = arith.index_cast %217 : i32 to index
    %c0_105 = arith.constant 0 : index
    %249 = vector.load %arg19[%248, %c0_105] : memref<64x384xf32, #tpu.memory_space<vmem>>, vector<8x128xf32>
    tpu.vector_store %arg19[%248, %c0_105], %247 {strides = array<i32>} : memref<64x384xf32, #tpu.memory_space<vmem>>, vector<8x128xf32>,
    %c3_i32 = arith.constant 3 : i32
    %c0_106 = arith.constant 0 : index
    %c0_107 = arith.constant 0 : index
    %250 = vector.load %arg9[%c0_106, %c0_107] : memref<128x384xf32, #tpu.memory_space<vmem>>, vector<128x384xf32>
    %cst_108 = arith.constant dense<0.000000e+00> : vector<8x384xf32>
    %251 = tpu.matmul %247, %250, %cst_108 {dimension_numbers = #tpu.dot_dimension_numbers<[1], [0], [0], [1], [0, 0, 1, 1], [], []>} : vector<8x128xf32>, vector<128x384xf32>, vector<8x384xf32> -> vector<8x384xf32>
    %c0_109 = arith.constant 0 : index
    %c0_110 = arith.constant 0 : index
    %252 = vector.load %arg11[%c0_109, %c0_110] : memref<1x384xf32, #tpu.memory_space<vmem>>, vector<1x384xf32>
    %253 = vector.broadcast %252 : vector<1x384xf32> to vector<8x384xf32>
    %254 = arith.addf %251, %253 : vector<8x384xf32>
    %c8_i32_111 = arith.constant 8 : i32
    %255 = arith.muli %c3_i32, %c8_i32_111 : i32
    %256 = tpu.assume_multiple %255, 8 : i32
    %257 = arith.index_cast %256 : i32 to index
    %c0_112 = arith.constant 0 : index
    %258 = vector.load %arg19[%257, %c0_112] : memref<64x384xf32, #tpu.memory_space<vmem>>, vector<8x384xf32>
    %259 = vector.extract_strided_slice %258 {offsets = [0, 0], sizes = [8, 128], strides = [1, 1]} : vector<8x384xf32> to vector<8x128xf32>
    %260 = vector.extract_strided_slice %254 {offsets = [0, 0], sizes = [8, 128], strides = [1, 1]} : vector<8x384xf32> to vector<8x128xf32>
    %261 = arith.addf %259, %260 : vector<8x128xf32>
    %cst_113 = arith.constant 5.000000e-01 : f32
    %262 = vector.broadcast %cst_113 : f32 to vector<8x128xf32>
    %263 = arith.mulf %262, %261 : vector<8x128xf32>
    %264 = math.tanh %263 : vector<8x128xf32>
    %cst_114 = arith.constant 5.000000e-01 : f32
    %265 = vector.broadcast %cst_114 : f32 to vector<8x128xf32>
    %266 = arith.mulf %265, %264 : vector<8x128xf32>
    %cst_115 = arith.constant 5.000000e-01 : f32
    %267 = vector.broadcast %cst_115 : f32 to vector<8x128xf32>
    %268 = arith.addf %266, %267 : vector<8x128xf32>
    %269 = vector.extract_strided_slice %258 {offsets = [0, 128], sizes = [8, 128], strides = [1, 1]} : vector<8x384xf32> to vector<8x128xf32>
    %270 = vector.extract_strided_slice %254 {offsets = [0, 128], sizes = [8, 128], strides = [1, 1]} : vector<8x384xf32> to vector<8x128xf32>
    %271 = arith.addf %269, %270 : vector<8x128xf32>
    %cst_116 = arith.constant 5.000000e-01 : f32
    %272 = vector.broadcast %cst_116 : f32 to vector<8x128xf32>
    %273 = arith.mulf %272, %271 : vector<8x128xf32>
    %274 = math.tanh %273 : vector<8x128xf32>
    %cst_117 = arith.constant 5.000000e-01 : f32
    %275 = vector.broadcast %cst_117 : f32 to vector<8x128xf32>
    %276 = arith.mulf %275, %274 : vector<8x128xf32>
    %cst_118 = arith.constant 5.000000e-01 : f32
    %277 = vector.broadcast %cst_118 : f32 to vector<8x128xf32>
    %278 = arith.addf %276, %277 : vector<8x128xf32>
    %279 = vector.extract_strided_slice %258 {offsets = [0, 256], sizes = [8, 128], strides = [1, 1]} : vector<8x384xf32> to vector<8x128xf32>
    %280 = vector.extract_strided_slice %254 {offsets = [0, 256], sizes = [8, 128], strides = [1, 1]} : vector<8x384xf32> to vector<8x128xf32>
    %281 = arith.mulf %268, %280 : vector<8x128xf32>
    %282 = arith.addf %279, %281 : vector<8x128xf32>
    %283 = math.tanh %282 : vector<8x128xf32>
    %284 = arith.subf %247, %283 : vector<8x128xf32>
    %285 = arith.mulf %278, %284 : vector<8x128xf32>
    %286 = arith.addf %283, %285 : vector<8x128xf32>
    %287 = arith.index_cast %256 : i32 to index
    %c0_119 = arith.constant 0 : index
    %288 = vector.load %arg19[%287, %c0_119] : memref<64x384xf32, #tpu.memory_space<vmem>>, vector<8x128xf32>
    tpu.vector_store %arg19[%287, %c0_119], %286 {strides = array<i32>} : memref<64x384xf32, #tpu.memory_space<vmem>>, vector<8x128xf32>,
    %c4_i32 = arith.constant 4 : i32
    %c0_120 = arith.constant 0 : index
    %c0_121 = arith.constant 0 : index
    %289 = vector.load %arg9[%c0_120, %c0_121] : memref<128x384xf32, #tpu.memory_space<vmem>>, vector<128x384xf32>
    %cst_122 = arith.constant dense<0.000000e+00> : vector<8x384xf32>
    %290 = tpu.matmul %286, %289, %cst_122 {dimension_numbers = #tpu.dot_dimension_numbers<[1], [0], [0], [1], [0, 0, 1, 1], [], []>} : vector<8x128xf32>, vector<128x384xf32>, vector<8x384xf32> -> vector<8x384xf32>
    %c0_123 = arith.constant 0 : index
    %c0_124 = arith.constant 0 : index
    %291 = vector.load %arg11[%c0_123, %c0_124] : memref<1x384xf32, #tpu.memory_space<vmem>>, vector<1x384xf32>
    %292 = vector.broadcast %291 : vector<1x384xf32> to vector<8x384xf32>
    %293 = arith.addf %290, %292 : vector<8x384xf32>
    %c8_i32_125 = arith.constant 8 : i32
    %294 = arith.muli %c4_i32, %c8_i32_125 : i32
    %295 = tpu.assume_multiple %294, 8 : i32
    %296 = arith.index_cast %295 : i32 to index
    %c0_126 = arith.constant 0 : index
    %297 = vector.load %arg19[%296, %c0_126] : memref<64x384xf32, #tpu.memory_space<vmem>>, vector<8x384xf32>
    %298 = vector.extract_strided_slice %297 {offsets = [0, 0], sizes = [8, 128], strides = [1, 1]} : vector<8x384xf32> to vector<8x128xf32>
    %299 = vector.extract_strided_slice %293 {offsets = [0, 0], sizes = [8, 128], strides = [1, 1]} : vector<8x384xf32> to vector<8x128xf32>
    %300 = arith.addf %298, %299 : vector<8x128xf32>
    %cst_127 = arith.constant 5.000000e-01 : f32
    %301 = vector.broadcast %cst_127 : f32 to vector<8x128xf32>
    %302 = arith.mulf %301, %300 : vector<8x128xf32>
    %303 = math.tanh %302 : vector<8x128xf32>
    %cst_128 = arith.constant 5.000000e-01 : f32
    %304 = vector.broadcast %cst_128 : f32 to vector<8x128xf32>
    %305 = arith.mulf %304, %303 : vector<8x128xf32>
    %cst_129 = arith.constant 5.000000e-01 : f32
    %306 = vector.broadcast %cst_129 : f32 to vector<8x128xf32>
    %307 = arith.addf %305, %306 : vector<8x128xf32>
    %308 = vector.extract_strided_slice %297 {offsets = [0, 128], sizes = [8, 128], strides = [1, 1]} : vector<8x384xf32> to vector<8x128xf32>
    %309 = vector.extract_strided_slice %293 {offsets = [0, 128], sizes = [8, 128], strides = [1, 1]} : vector<8x384xf32> to vector<8x128xf32>
    %310 = arith.addf %308, %309 : vector<8x128xf32>
    %cst_130 = arith.constant 5.000000e-01 : f32
    %311 = vector.broadcast %cst_130 : f32 to vector<8x128xf32>
    %312 = arith.mulf %311, %310 : vector<8x128xf32>
    %313 = math.tanh %312 : vector<8x128xf32>
    %cst_131 = arith.constant 5.000000e-01 : f32
    %314 = vector.broadcast %cst_131 : f32 to vector<8x128xf32>
    %315 = arith.mulf %314, %313 : vector<8x128xf32>
    %cst_132 = arith.constant 5.000000e-01 : f32
    %316 = vector.broadcast %cst_132 : f32 to vector<8x128xf32>
    %317 = arith.addf %315, %316 : vector<8x128xf32>
    %318 = vector.extract_strided_slice %297 {offsets = [0, 256], sizes = [8, 128], strides = [1, 1]} : vector<8x384xf32> to vector<8x128xf32>
    %319 = vector.extract_strided_slice %293 {offsets = [0, 256], sizes = [8, 128], strides = [1, 1]} : vector<8x384xf32> to vector<8x128xf32>
    %320 = arith.mulf %307, %319 : vector<8x128xf32>
    %321 = arith.addf %318, %320 : vector<8x128xf32>
    %322 = math.tanh %321 : vector<8x128xf32>
    %323 = arith.subf %286, %322 : vector<8x128xf32>
    %324 = arith.mulf %317, %323 : vector<8x128xf32>
    %325 = arith.addf %322, %324 : vector<8x128xf32>
    %326 = arith.index_cast %295 : i32 to index
    %c0_133 = arith.constant 0 : index
    %327 = vector.load %arg19[%326, %c0_133] : memref<64x384xf32, #tpu.memory_space<vmem>>, vector<8x128xf32>
    tpu.vector_store %arg19[%326, %c0_133], %325 {strides = array<i32>} : memref<64x384xf32, #tpu.memory_space<vmem>>, vector<8x128xf32>,
    %c5_i32 = arith.constant 5 : i32
    %c0_134 = arith.constant 0 : index
    %c0_135 = arith.constant 0 : index
    %328 = vector.load %arg9[%c0_134, %c0_135] : memref<128x384xf32, #tpu.memory_space<vmem>>, vector<128x384xf32>
    %cst_136 = arith.constant dense<0.000000e+00> : vector<8x384xf32>
    %329 = tpu.matmul %325, %328, %cst_136 {dimension_numbers = #tpu.dot_dimension_numbers<[1], [0], [0], [1], [0, 0, 1, 1], [], []>} : vector<8x128xf32>, vector<128x384xf32>, vector<8x384xf32> -> vector<8x384xf32>
    %c0_137 = arith.constant 0 : index
    %c0_138 = arith.constant 0 : index
    %330 = vector.load %arg11[%c0_137, %c0_138] : memref<1x384xf32, #tpu.memory_space<vmem>>, vector<1x384xf32>
    %331 = vector.broadcast %330 : vector<1x384xf32> to vector<8x384xf32>
    %332 = arith.addf %329, %331 : vector<8x384xf32>
    %c8_i32_139 = arith.constant 8 : i32
    %333 = arith.muli %c5_i32, %c8_i32_139 : i32
    %334 = tpu.assume_multiple %333, 8 : i32
    %335 = arith.index_cast %334 : i32 to index
    %c0_140 = arith.constant 0 : index
    %336 = vector.load %arg19[%335, %c0_140] : memref<64x384xf32, #tpu.memory_space<vmem>>, vector<8x384xf32>
    %337 = vector.extract_strided_slice %336 {offsets = [0, 0], sizes = [8, 128], strides = [1, 1]} : vector<8x384xf32> to vector<8x128xf32>
    %338 = vector.extract_strided_slice %332 {offsets = [0, 0], sizes = [8, 128], strides = [1, 1]} : vector<8x384xf32> to vector<8x128xf32>
    %339 = arith.addf %337, %338 : vector<8x128xf32>
    %cst_141 = arith.constant 5.000000e-01 : f32
    %340 = vector.broadcast %cst_141 : f32 to vector<8x128xf32>
    %341 = arith.mulf %340, %339 : vector<8x128xf32>
    %342 = math.tanh %341 : vector<8x128xf32>
    %cst_142 = arith.constant 5.000000e-01 : f32
    %343 = vector.broadcast %cst_142 : f32 to vector<8x128xf32>
    %344 = arith.mulf %343, %342 : vector<8x128xf32>
    %cst_143 = arith.constant 5.000000e-01 : f32
    %345 = vector.broadcast %cst_143 : f32 to vector<8x128xf32>
    %346 = arith.addf %344, %345 : vector<8x128xf32>
    %347 = vector.extract_strided_slice %336 {offsets = [0, 128], sizes = [8, 128], strides = [1, 1]} : vector<8x384xf32> to vector<8x128xf32>
    %348 = vector.extract_strided_slice %332 {offsets = [0, 128], sizes = [8, 128], strides = [1, 1]} : vector<8x384xf32> to vector<8x128xf32>
    %349 = arith.addf %347, %348 : vector<8x128xf32>
    %cst_144 = arith.constant 5.000000e-01 : f32
    %350 = vector.broadcast %cst_144 : f32 to vector<8x128xf32>
    %351 = arith.mulf %350, %349 : vector<8x128xf32>
    %352 = math.tanh %351 : vector<8x128xf32>
    %cst_145 = arith.constant 5.000000e-01 : f32
    %353 = vector.broadcast %cst_145 : f32 to vector<8x128xf32>
    %354 = arith.mulf %353, %352 : vector<8x128xf32>
    %cst_146 = arith.constant 5.000000e-01 : f32
    %355 = vector.broadcast %cst_146 : f32 to vector<8x128xf32>
    %356 = arith.addf %354, %355 : vector<8x128xf32>
    %357 = vector.extract_strided_slice %336 {offsets = [0, 256], sizes = [8, 128], strides = [1, 1]} : vector<8x384xf32> to vector<8x128xf32>
    %358 = vector.extract_strided_slice %332 {offsets = [0, 256], sizes = [8, 128], strides = [1, 1]} : vector<8x384xf32> to vector<8x128xf32>
    %359 = arith.mulf %346, %358 : vector<8x128xf32>
    %360 = arith.addf %357, %359 : vector<8x128xf32>
    %361 = math.tanh %360 : vector<8x128xf32>
    %362 = arith.subf %325, %361 : vector<8x128xf32>
    %363 = arith.mulf %356, %362 : vector<8x128xf32>
    %364 = arith.addf %361, %363 : vector<8x128xf32>
    %365 = arith.index_cast %334 : i32 to index
    %c0_147 = arith.constant 0 : index
    %366 = vector.load %arg19[%365, %c0_147] : memref<64x384xf32, #tpu.memory_space<vmem>>, vector<8x128xf32>
    tpu.vector_store %arg19[%365, %c0_147], %364 {strides = array<i32>} : memref<64x384xf32, #tpu.memory_space<vmem>>, vector<8x128xf32>,
    %c6_i32 = arith.constant 6 : i32
    %c0_148 = arith.constant 0 : index
    %c0_149 = arith.constant 0 : index
    %367 = vector.load %arg9[%c0_148, %c0_149] : memref<128x384xf32, #tpu.memory_space<vmem>>, vector<128x384xf32>
    %cst_150 = arith.constant dense<0.000000e+00> : vector<8x384xf32>
    %368 = tpu.matmul %364, %367, %cst_150 {dimension_numbers = #tpu.dot_dimension_numbers<[1], [0], [0], [1], [0, 0, 1, 1], [], []>} : vector<8x128xf32>, vector<128x384xf32>, vector<8x384xf32> -> vector<8x384xf32>
    %c0_151 = arith.constant 0 : index
    %c0_152 = arith.constant 0 : index
    %369 = vector.load %arg11[%c0_151, %c0_152] : memref<1x384xf32, #tpu.memory_space<vmem>>, vector<1x384xf32>
    %370 = vector.broadcast %369 : vector<1x384xf32> to vector<8x384xf32>
    %371 = arith.addf %368, %370 : vector<8x384xf32>
    %c8_i32_153 = arith.constant 8 : i32
    %372 = arith.muli %c6_i32, %c8_i32_153 : i32
    %373 = tpu.assume_multiple %372, 8 : i32
    %374 = arith.index_cast %373 : i32 to index
    %c0_154 = arith.constant 0 : index
    %375 = vector.load %arg19[%374, %c0_154] : memref<64x384xf32, #tpu.memory_space<vmem>>, vector<8x384xf32>
    %376 = vector.extract_strided_slice %375 {offsets = [0, 0], sizes = [8, 128], strides = [1, 1]} : vector<8x384xf32> to vector<8x128xf32>
    %377 = vector.extract_strided_slice %371 {offsets = [0, 0], sizes = [8, 128], strides = [1, 1]} : vector<8x384xf32> to vector<8x128xf32>
    %378 = arith.addf %376, %377 : vector<8x128xf32>
    %cst_155 = arith.constant 5.000000e-01 : f32
    %379 = vector.broadcast %cst_155 : f32 to vector<8x128xf32>
    %380 = arith.mulf %379, %378 : vector<8x128xf32>
    %381 = math.tanh %380 : vector<8x128xf32>
    %cst_156 = arith.constant 5.000000e-01 : f32
    %382 = vector.broadcast %cst_156 : f32 to vector<8x128xf32>
    %383 = arith.mulf %382, %381 : vector<8x128xf32>
    %cst_157 = arith.constant 5.000000e-01 : f32
    %384 = vector.broadcast %cst_157 : f32 to vector<8x128xf32>
    %385 = arith.addf %383, %384 : vector<8x128xf32>
    %386 = vector.extract_strided_slice %375 {offsets = [0, 128], sizes = [8, 128], strides = [1, 1]} : vector<8x384xf32> to vector<8x128xf32>
    %387 = vector.extract_strided_slice %371 {offsets = [0, 128], sizes = [8, 128], strides = [1, 1]} : vector<8x384xf32> to vector<8x128xf32>
    %388 = arith.addf %386, %387 : vector<8x128xf32>
    %cst_158 = arith.constant 5.000000e-01 : f32
    %389 = vector.broadcast %cst_158 : f32 to vector<8x128xf32>
    %390 = arith.mulf %389, %388 : vector<8x128xf32>
    %391 = math.tanh %390 : vector<8x128xf32>
    %cst_159 = arith.constant 5.000000e-01 : f32
    %392 = vector.broadcast %cst_159 : f32 to vector<8x128xf32>
    %393 = arith.mulf %392, %391 : vector<8x128xf32>
    %cst_160 = arith.constant 5.000000e-01 : f32
    %394 = vector.broadcast %cst_160 : f32 to vector<8x128xf32>
    %395 = arith.addf %393, %394 : vector<8x128xf32>
    %396 = vector.extract_strided_slice %375 {offsets = [0, 256], sizes = [8, 128], strides = [1, 1]} : vector<8x384xf32> to vector<8x128xf32>
    %397 = vector.extract_strided_slice %371 {offsets = [0, 256], sizes = [8, 128], strides = [1, 1]} : vector<8x384xf32> to vector<8x128xf32>
    %398 = arith.mulf %385, %397 : vector<8x128xf32>
    %399 = arith.addf %396, %398 : vector<8x128xf32>
    %400 = math.tanh %399 : vector<8x128xf32>
    %401 = arith.subf %364, %400 : vector<8x128xf32>
    %402 = arith.mulf %395, %401 : vector<8x128xf32>
    %403 = arith.addf %400, %402 : vector<8x128xf32>
    %404 = arith.index_cast %373 : i32 to index
    %c0_161 = arith.constant 0 : index
    %405 = vector.load %arg19[%404, %c0_161] : memref<64x384xf32, #tpu.memory_space<vmem>>, vector<8x128xf32>
    tpu.vector_store %arg19[%404, %c0_161], %403 {strides = array<i32>} : memref<64x384xf32, #tpu.memory_space<vmem>>, vector<8x128xf32>,
    %c7_i32 = arith.constant 7 : i32
    %c0_162 = arith.constant 0 : index
    %c0_163 = arith.constant 0 : index
    %406 = vector.load %arg9[%c0_162, %c0_163] : memref<128x384xf32, #tpu.memory_space<vmem>>, vector<128x384xf32>
    %cst_164 = arith.constant dense<0.000000e+00> : vector<8x384xf32>
    %407 = tpu.matmul %403, %406, %cst_164 {dimension_numbers = #tpu.dot_dimension_numbers<[1], [0], [0], [1], [0, 0, 1, 1], [], []>} : vector<8x128xf32>, vector<128x384xf32>, vector<8x384xf32> -> vector<8x384xf32>
    %c0_165 = arith.constant 0 : index
    %c0_166 = arith.constant 0 : index
    %408 = vector.load %arg11[%c0_165, %c0_166] : memref<1x384xf32, #tpu.memory_space<vmem>>, vector<1x384xf32>
    %409 = vector.broadcast %408 : vector<1x384xf32> to vector<8x384xf32>
    %410 = arith.addf %407, %409 : vector<8x384xf32>
    %c8_i32_167 = arith.constant 8 : i32
    %411 = arith.muli %c7_i32, %c8_i32_167 : i32
    %412 = tpu.assume_multiple %411, 8 : i32
    %413 = arith.index_cast %412 : i32 to index
    %c0_168 = arith.constant 0 : index
    %414 = vector.load %arg19[%413, %c0_168] : memref<64x384xf32, #tpu.memory_space<vmem>>, vector<8x384xf32>
    %415 = vector.extract_strided_slice %414 {offsets = [0, 0], sizes = [8, 128], strides = [1, 1]} : vector<8x384xf32> to vector<8x128xf32>
    %416 = vector.extract_strided_slice %410 {offsets = [0, 0], sizes = [8, 128], strides = [1, 1]} : vector<8x384xf32> to vector<8x128xf32>
    %417 = arith.addf %415, %416 : vector<8x128xf32>
    %cst_169 = arith.constant 5.000000e-01 : f32
    %418 = vector.broadcast %cst_169 : f32 to vector<8x128xf32>
    %419 = arith.mulf %418, %417 : vector<8x128xf32>
    %420 = math.tanh %419 : vector<8x128xf32>
    %cst_170 = arith.constant 5.000000e-01 : f32
    %421 = vector.broadcast %cst_170 : f32 to vector<8x128xf32>
    %422 = arith.mulf %421, %420 : vector<8x128xf32>
    %cst_171 = arith.constant 5.000000e-01 : f32
    %423 = vector.broadcast %cst_171 : f32 to vector<8x128xf32>
    %424 = arith.addf %422, %423 : vector<8x128xf32>
    %425 = vector.extract_strided_slice %414 {offsets = [0, 128], sizes = [8, 128], strides = [1, 1]} : vector<8x384xf32> to vector<8x128xf32>
    %426 = vector.extract_strided_slice %410 {offsets = [0, 128], sizes = [8, 128], strides = [1, 1]} : vector<8x384xf32> to vector<8x128xf32>
    %427 = arith.addf %425, %426 : vector<8x128xf32>
    %cst_172 = arith.constant 5.000000e-01 : f32
    %428 = vector.broadcast %cst_172 : f32 to vector<8x128xf32>
    %429 = arith.mulf %428, %427 : vector<8x128xf32>
    %430 = math.tanh %429 : vector<8x128xf32>
    %cst_173 = arith.constant 5.000000e-01 : f32
    %431 = vector.broadcast %cst_173 : f32 to vector<8x128xf32>
    %432 = arith.mulf %431, %430 : vector<8x128xf32>
    %cst_174 = arith.constant 5.000000e-01 : f32
    %433 = vector.broadcast %cst_174 : f32 to vector<8x128xf32>
    %434 = arith.addf %432, %433 : vector<8x128xf32>
    %435 = vector.extract_strided_slice %414 {offsets = [0, 256], sizes = [8, 128], strides = [1, 1]} : vector<8x384xf32> to vector<8x128xf32>
    %436 = vector.extract_strided_slice %410 {offsets = [0, 256], sizes = [8, 128], strides = [1, 1]} : vector<8x384xf32> to vector<8x128xf32>
    %437 = arith.mulf %424, %436 : vector<8x128xf32>
    %438 = arith.addf %435, %437 : vector<8x128xf32>
    %439 = math.tanh %438 : vector<8x128xf32>
    %440 = arith.subf %403, %439 : vector<8x128xf32>
    %441 = arith.mulf %434, %440 : vector<8x128xf32>
    %442 = arith.addf %439, %441 : vector<8x128xf32>
    %443 = arith.index_cast %412 : i32 to index
    %c0_175 = arith.constant 0 : index
    %444 = vector.load %arg19[%443, %c0_175] : memref<64x384xf32, #tpu.memory_space<vmem>>, vector<8x128xf32>
    tpu.vector_store %arg19[%443, %c0_175], %442 {strides = array<i32>} : memref<64x384xf32, #tpu.memory_space<vmem>>, vector<8x128xf32>,
    %c8_i32_176 = arith.constant 8 : i32
    %c0_177 = arith.constant 0 : index
    %c0_178 = arith.constant 0 : index
    %445 = vector.load %arg20[%c0_177, %c0_178] : memref<8x128xf32, #tpu.memory_space<vmem>>, vector<8x128xf32>
    tpu.vector_store %arg20[%c0_177, %c0_178], %442 {strides = array<i32>} : memref<8x128xf32, #tpu.memory_space<vmem>>, vector<8x128xf32>,
    %c0_179 = arith.constant 0 : index
    %c0_180 = arith.constant 0 : index
    %446 = vector.load %arg19[%c0_179, %c0_180] : memref<64x384xf32, #tpu.memory_space<vmem>>, vector<64x128xf32>
    %c0_181 = arith.constant 0 : index
    %c0_182 = arith.constant 0 : index
    %c0_183 = arith.constant 0 : index
    %447 = vector.load %arg12[%c0_181, %c0_182, %c0_183] : memref<3x128x128xf32, #tpu.memory_space<vmem>>, vector<1x128x128xf32>
    %448 = vector.shape_cast %447 : vector<1x128x128xf32> to vector<128x128xf32>
    %cst_184 = arith.constant dense<0.000000e+00> : vector<64x128xf32>
    %449 = tpu.matmul %446, %448, %cst_184 {dimension_numbers = #tpu.dot_dimension_numbers<[1], [0], [0], [1], [0, 0, 1, 1], [], []>} : vector<64x128xf32>, vector<128x128xf32>, vector<64x128xf32> -> vector<64x128xf32>
    %c0_185 = arith.constant 0 : index
    %c0_186 = arith.constant 0 : index
    %450 = vector.load %arg13[%c0_185, %c0_186] : memref<3x128xf32, #tpu.memory_space<vmem>>, vector<1x128xf32>
    %451 = vector.broadcast %450 : vector<1x128xf32> to vector<64x128xf32>
    %452 = arith.addf %449, %451 : vector<64x128xf32>
    %c0_187 = arith.constant 0 : index
    %c0_188 = arith.constant 0 : index
    %453 = vector.load %arg14[%c0_187, %c0_188] : memref<3x128xf32, #tpu.memory_space<vmem>>, vector<1x128xf32>
    %c0_189 = arith.constant 0 : index
    %c0_190 = arith.constant 0 : index
    %454 = vector.load %arg15[%c0_189, %c0_190] : memref<3x128xf32, #tpu.memory_space<vmem>>, vector<1x128xf32>
    %cst_191 = arith.constant dense<0.000000e+00> : vector<64xf32>
    %455 = vector.multi_reduction <add>, %452, %cst_191 [1] : vector<64x128xf32> to vector<64xf32>
    %456 = vector.shape_cast %455 : vector<64xf32> to vector<64x1xf32>
    %cst_192 = arith.constant 3.125000e-02 : f32
    %457 = vector.broadcast %cst_192 : f32 to vector<64x1xf32>
    %458 = arith.mulf %456, %457 : vector<64x1xf32>
    %459 = arith.mulf %452, %452 : vector<64x128xf32>
    %cst_193 = arith.constant dense<0.000000e+00> : vector<64xf32>
    %460 = vector.multi_reduction <add>, %459, %cst_193 [1] : vector<64x128xf32> to vector<64xf32>
    %461 = vector.shape_cast %460 : vector<64xf32> to vector<64x1xf32>
    %cst_194 = arith.constant 3.125000e-02 : f32
    %462 = vector.broadcast %cst_194 : f32 to vector<64x1xf32>
    %463 = arith.mulf %461, %462 : vector<64x1xf32>
    %464 = arith.mulf %458, %458 : vector<64x1xf32>
    %465 = arith.subf %463, %464 : vector<64x1xf32>
    %466 = vector.broadcast %458 : vector<64x1xf32> to vector<64x128xf32>
    %467 = arith.subf %452, %466 : vector<64x128xf32>
    %cst_195 = arith.constant 9.99999974E-6 : f32
    %468 = vector.broadcast %cst_195 : f32 to vector<64x1xf32>
    %469 = arith.addf %465, %468 : vector<64x1xf32>
    %470 = math.rsqrt %469 : vector<64x1xf32>
    %471 = vector.broadcast %470 : vector<64x1xf32> to vector<64x128xf32>
    %472 = arith.mulf %467, %471 : vector<64x128xf32>
    %473 = vector.broadcast %453 : vector<1x128xf32> to vector<64x128xf32>
    %474 = arith.mulf %472, %473 : vector<64x128xf32>
    %475 = vector.broadcast %454 : vector<1x128xf32> to vector<64x128xf32>
    %476 = arith.addf %474, %475 : vector<64x128xf32>
    %cst_196 = arith.constant 0.000000e+00 : f32
    %477 = vector.broadcast %cst_196 : f32 to vector<64x128xf32>
    %478 = arith.cmpf oge, %476, %477 : vector<64x128xf32>
    %cst_197 = arith.constant 0.00999999977 : f32
    %479 = vector.broadcast %cst_197 : f32 to vector<64x128xf32>
    %480 = arith.mulf %479, %476 : vector<64x128xf32>
    %481 = arith.select %478, %476, %480 : vector<64x128xi1>, vector<64x128xf32>
    %c1_198 = arith.constant 1 : index
    %c0_199 = arith.constant 0 : index
    %c0_200 = arith.constant 0 : index
    %482 = vector.load %arg12[%c1_198, %c0_199, %c0_200] : memref<3x128x128xf32, #tpu.memory_space<vmem>>, vector<1x128x128xf32>
    %483 = vector.shape_cast %482 : vector<1x128x128xf32> to vector<128x128xf32>
    %cst_201 = arith.constant dense<0.000000e+00> : vector<64x128xf32>
    %484 = tpu.matmul %481, %483, %cst_201 {dimension_numbers = #tpu.dot_dimension_numbers<[1], [0], [0], [1], [0, 0, 1, 1], [], []>} : vector<64x128xf32>, vector<128x128xf32>, vector<64x128xf32> -> vector<64x128xf32>
    %c1_202 = arith.constant 1 : index
    %c0_203 = arith.constant 0 : index
    %485 = vector.load %arg13[%c1_202, %c0_203] : memref<3x128xf32, #tpu.memory_space<vmem>>, vector<1x128xf32>
    %486 = vector.broadcast %485 : vector<1x128xf32> to vector<64x128xf32>
    %487 = arith.addf %484, %486 : vector<64x128xf32>
    %c1_204 = arith.constant 1 : index
    %c0_205 = arith.constant 0 : index
    %488 = vector.load %arg14[%c1_204, %c0_205] : memref<3x128xf32, #tpu.memory_space<vmem>>, vector<1x128xf32>
    %c1_206 = arith.constant 1 : index
    %c0_207 = arith.constant 0 : index
    %489 = vector.load %arg15[%c1_206, %c0_207] : memref<3x128xf32, #tpu.memory_space<vmem>>, vector<1x128xf32>
    %cst_208 = arith.constant dense<0.000000e+00> : vector<64xf32>
    %490 = vector.multi_reduction <add>, %487, %cst_208 [1] : vector<64x128xf32> to vector<64xf32>
    %491 = vector.shape_cast %490 : vector<64xf32> to vector<64x1xf32>
    %cst_209 = arith.constant 3.125000e-02 : f32
    %492 = vector.broadcast %cst_209 : f32 to vector<64x1xf32>
    %493 = arith.mulf %491, %492 : vector<64x1xf32>
    %494 = arith.mulf %487, %487 : vector<64x128xf32>
    %cst_210 = arith.constant dense<0.000000e+00> : vector<64xf32>
    %495 = vector.multi_reduction <add>, %494, %cst_210 [1] : vector<64x128xf32> to vector<64xf32>
    %496 = vector.shape_cast %495 : vector<64xf32> to vector<64x1xf32>
    %cst_211 = arith.constant 3.125000e-02 : f32
    %497 = vector.broadcast %cst_211 : f32 to vector<64x1xf32>
    %498 = arith.mulf %496, %497 : vector<64x1xf32>
    %499 = arith.mulf %493, %493 : vector<64x1xf32>
    %500 = arith.subf %498, %499 : vector<64x1xf32>
    %501 = vector.broadcast %493 : vector<64x1xf32> to vector<64x128xf32>
    %502 = arith.subf %487, %501 : vector<64x128xf32>
    %cst_212 = arith.constant 9.99999974E-6 : f32
    %503 = vector.broadcast %cst_212 : f32 to vector<64x1xf32>
    %504 = arith.addf %500, %503 : vector<64x1xf32>
    %505 = math.rsqrt %504 : vector<64x1xf32>
    %506 = vector.broadcast %505 : vector<64x1xf32> to vector<64x128xf32>
    %507 = arith.mulf %502, %506 : vector<64x128xf32>
    %508 = vector.broadcast %488 : vector<1x128xf32> to vector<64x128xf32>
    %509 = arith.mulf %507, %508 : vector<64x128xf32>
    %510 = vector.broadcast %489 : vector<1x128xf32> to vector<64x128xf32>
    %511 = arith.addf %509, %510 : vector<64x128xf32>
    %cst_213 = arith.constant 0.000000e+00 : f32
    %512 = vector.broadcast %cst_213 : f32 to vector<64x128xf32>
    %513 = arith.cmpf oge, %511, %512 : vector<64x128xf32>
    %cst_214 = arith.constant 0.00999999977 : f32
    %514 = vector.broadcast %cst_214 : f32 to vector<64x128xf32>
    %515 = arith.mulf %514, %511 : vector<64x128xf32>
    %516 = arith.select %513, %511, %515 : vector<64x128xi1>, vector<64x128xf32>
    %c2_215 = arith.constant 2 : index
    %c0_216 = arith.constant 0 : index
    %c0_217 = arith.constant 0 : index
    %517 = vector.load %arg12[%c2_215, %c0_216, %c0_217] : memref<3x128x128xf32, #tpu.memory_space<vmem>>, vector<1x128x128xf32>
    %518 = vector.shape_cast %517 : vector<1x128x128xf32> to vector<128x128xf32>
    %cst_218 = arith.constant dense<0.000000e+00> : vector<64x128xf32>
    %519 = tpu.matmul %516, %518, %cst_218 {dimension_numbers = #tpu.dot_dimension_numbers<[1], [0], [0], [1], [0, 0, 1, 1], [], []>} : vector<64x128xf32>, vector<128x128xf32>, vector<64x128xf32> -> vector<64x128xf32>
    %c2_219 = arith.constant 2 : index
    %c0_220 = arith.constant 0 : index
    %520 = vector.load %arg13[%c2_219, %c0_220] : memref<3x128xf32, #tpu.memory_space<vmem>>, vector<1x128xf32>
    %521 = vector.broadcast %520 : vector<1x128xf32> to vector<64x128xf32>
    %522 = arith.addf %519, %521 : vector<64x128xf32>
    %c2_221 = arith.constant 2 : index
    %c0_222 = arith.constant 0 : index
    %523 = vector.load %arg14[%c2_221, %c0_222] : memref<3x128xf32, #tpu.memory_space<vmem>>, vector<1x128xf32>
    %c2_223 = arith.constant 2 : index
    %c0_224 = arith.constant 0 : index
    %524 = vector.load %arg15[%c2_223, %c0_224] : memref<3x128xf32, #tpu.memory_space<vmem>>, vector<1x128xf32>
    %cst_225 = arith.constant dense<0.000000e+00> : vector<64xf32>
    %525 = vector.multi_reduction <add>, %522, %cst_225 [1] : vector<64x128xf32> to vector<64xf32>
    %526 = vector.shape_cast %525 : vector<64xf32> to vector<64x1xf32>
    %cst_226 = arith.constant 3.125000e-02 : f32
    %527 = vector.broadcast %cst_226 : f32 to vector<64x1xf32>
    %528 = arith.mulf %526, %527 : vector<64x1xf32>
    %529 = arith.mulf %522, %522 : vector<64x128xf32>
    %cst_227 = arith.constant dense<0.000000e+00> : vector<64xf32>
    %530 = vector.multi_reduction <add>, %529, %cst_227 [1] : vector<64x128xf32> to vector<64xf32>
    %531 = vector.shape_cast %530 : vector<64xf32> to vector<64x1xf32>
    %cst_228 = arith.constant 3.125000e-02 : f32
    %532 = vector.broadcast %cst_228 : f32 to vector<64x1xf32>
    %533 = arith.mulf %531, %532 : vector<64x1xf32>
    %534 = arith.mulf %528, %528 : vector<64x1xf32>
    %535 = arith.subf %533, %534 : vector<64x1xf32>
    %536 = vector.broadcast %528 : vector<64x1xf32> to vector<64x128xf32>
    %537 = arith.subf %522, %536 : vector<64x128xf32>
    %cst_229 = arith.constant 9.99999974E-6 : f32
    %538 = vector.broadcast %cst_229 : f32 to vector<64x1xf32>
    %539 = arith.addf %535, %538 : vector<64x1xf32>
    %540 = math.rsqrt %539 : vector<64x1xf32>
    %541 = vector.broadcast %540 : vector<64x1xf32> to vector<64x128xf32>
    %542 = arith.mulf %537, %541 : vector<64x128xf32>
    %543 = vector.broadcast %523 : vector<1x128xf32> to vector<64x128xf32>
    %544 = arith.mulf %542, %543 : vector<64x128xf32>
    %545 = vector.broadcast %524 : vector<1x128xf32> to vector<64x128xf32>
    %546 = arith.addf %544, %545 : vector<64x128xf32>
    %cst_230 = arith.constant 0.000000e+00 : f32
    %547 = vector.broadcast %cst_230 : f32 to vector<64x128xf32>
    %548 = arith.cmpf oge, %546, %547 : vector<64x128xf32>
    %cst_231 = arith.constant 0.00999999977 : f32
    %549 = vector.broadcast %cst_231 : f32 to vector<64x128xf32>
    %550 = arith.mulf %549, %546 : vector<64x128xf32>
    %551 = arith.select %548, %546, %550 : vector<64x128xi1>, vector<64x128xf32>
    %c0_232 = arith.constant 0 : index
    %c0_233 = arith.constant 0 : index
    %552 = vector.load %arg16[%c0_232, %c0_233] : memref<128x128xf32, #tpu.memory_space<vmem>>, vector<128x128xf32>
    %cst_234 = arith.constant dense<0.000000e+00> : vector<64x128xf32>
    %553 = tpu.matmul %551, %552, %cst_234 {dimension_numbers = #tpu.dot_dimension_numbers<[1], [0], [0], [1], [0, 0, 1, 1], [], []>} : vector<64x128xf32>, vector<128x128xf32>, vector<64x128xf32> -> vector<64x128xf32>
    %c0_235 = arith.constant 0 : index
    %c0_236 = arith.constant 0 : index
    %554 = vector.load %arg17[%c0_235, %c0_236] : memref<1x128xf32, #tpu.memory_space<vmem>>, vector<1x128xf32>
    %555 = vector.broadcast %554 : vector<1x128xf32> to vector<64x128xf32>
    %556 = arith.addf %553, %555 : vector<64x128xf32>
    %557 = arith.negf %556 : vector<64x128xf32>
    %558 = math.exp %557 : vector<64x128xf32>
    %cst_237 = arith.constant 1.000000e+00 : f32
    %559 = vector.broadcast %cst_237 : f32 to vector<64x128xf32>
    %560 = arith.addf %559, %558 : vector<64x128xf32>
    %561 = arith.divf %559, %560 : vector<64x128xf32>
    %c0_238 = arith.constant 0 : index
    %c0_239 = arith.constant 0 : index
    %c0_240 = arith.constant 0 : index
    %562 = vector.load %arg18[%c0_238, %c0_239, %c0_240] : memref<1x64x128xf32, #tpu.memory_space<vmem>>, vector<1x64x128xf32>
    %563 = vector.shape_cast %562 : vector<1x64x128xf32> to vector<64x128xf32>
    %564 = vector.shape_cast %561 : vector<64x128xf32> to vector<1x64x128xf32>
    tpu.vector_store %arg18[%c0_238, %c0_239, %c0_240], %564 {strides = array<i32>} : memref<1x64x128xf32, #tpu.memory_space<vmem>>, vector<1x64x128xf32>,
    return
  }
  func.func @transform_0(%arg0: i32, %arg1: i32) -> (i32, i32, i32) {
    %c0_i32 = arith.constant 0 : i32
    %c0_i32_0 = arith.constant 0 : i32
    return %arg0, %arg1, %c0_i32 : i32, i32, i32
  }
  func.func @transform_1(%arg0: i32, %arg1: i32) -> (i32, i32) {
    %c0_i32 = arith.constant 0 : i32
    %c0_i32_0 = arith.constant 0 : i32
    %c0_i32_1 = arith.constant 0 : i32
    return %c0_i32, %c0_i32_0 : i32, i32
  }
  func.func @transform_2(%arg0: i32, %arg1: i32) -> (i32, i32, i32) {
    %c0_i32 = arith.constant 0 : i32
    %c0_i32_0 = arith.constant 0 : i32
    %c0_i32_1 = arith.constant 0 : i32
    %c0_i32_2 = arith.constant 0 : i32
    return %c0_i32, %c0_i32_0, %c0_i32_1 : i32, i32, i32
  }
  func.func @transform_3(%arg0: i32, %arg1: i32) -> (i32, i32) {
    %c0_i32 = arith.constant 0 : i32
    %c0_i32_0 = arith.constant 0 : i32
    %c0_i32_1 = arith.constant 0 : i32
    return %c0_i32, %c0_i32_0 : i32, i32
  }
  func.func @transform_4(%arg0: i32, %arg1: i32) -> (i32, i32) {
    %c0_i32 = arith.constant 0 : i32
    %c0_i32_0 = arith.constant 0 : i32
    %c0_i32_1 = arith.constant 0 : i32
    return %c0_i32, %c0_i32_0 : i32, i32
  }
  func.func @transform_5(%arg0: i32, %arg1: i32) -> (i32, i32) {
    %c0_i32 = arith.constant 0 : i32
    %c0_i32_0 = arith.constant 0 : i32
    %c0_i32_1 = arith.constant 0 : i32
    return %c0_i32, %c0_i32_0 : i32, i32
  }
  func.func @transform_6(%arg0: i32, %arg1: i32) -> (i32, i32) {
    %c0_i32 = arith.constant 0 : i32
    %c0_i32_0 = arith.constant 0 : i32
    %c0_i32_1 = arith.constant 0 : i32
    return %c0_i32, %c0_i32_0 : i32, i32
  }
  func.func @transform_7(%arg0: i32, %arg1: i32) -> (i32, i32) {
    %c0_i32 = arith.constant 0 : i32
    %c0_i32_0 = arith.constant 0 : i32
    %c0_i32_1 = arith.constant 0 : i32
    return %c0_i32, %c0_i32_0 : i32, i32
  }
  func.func @transform_8(%arg0: i32, %arg1: i32) -> (i32, i32) {
    %c0_i32 = arith.constant 0 : i32
    %c0_i32_0 = arith.constant 0 : i32
    %c0_i32_1 = arith.constant 0 : i32
    return %c0_i32, %c0_i32_0 : i32, i32
  }
  func.func @transform_9(%arg0: i32, %arg1: i32) -> (i32, i32) {
    %c0_i32 = arith.constant 0 : i32
    %c0_i32_0 = arith.constant 0 : i32
    %c0_i32_1 = arith.constant 0 : i32
    return %c0_i32, %c0_i32_0 : i32, i32
  }
  func.func @transform_10(%arg0: i32, %arg1: i32) -> (i32, i32, i32) {
    %c0_i32 = arith.constant 0 : i32
    %c0_i32_0 = arith.constant 0 : i32
    %c0_i32_1 = arith.constant 0 : i32
    %c0_i32_2 = arith.constant 0 : i32
    return %c0_i32, %c0_i32_0, %c0_i32_1 : i32, i32, i32
  }
  func.func @transform_11(%arg0: i32, %arg1: i32) -> (i32, i32) {
    %c0_i32 = arith.constant 0 : i32
    %c0_i32_0 = arith.constant 0 : i32
    %c0_i32_1 = arith.constant 0 : i32
    return %c0_i32, %c0_i32_0 : i32, i32
  }
  func.func @transform_12(%arg0: i32, %arg1: i32) -> (i32, i32) {
    %c0_i32 = arith.constant 0 : i32
    %c0_i32_0 = arith.constant 0 : i32
    %c0_i32_1 = arith.constant 0 : i32
    return %c0_i32, %c0_i32_0 : i32, i32
  }
  func.func @transform_13(%arg0: i32, %arg1: i32) -> (i32, i32) {
    %c0_i32 = arith.constant 0 : i32
    %c0_i32_0 = arith.constant 0 : i32
    %c0_i32_1 = arith.constant 0 : i32
    return %c0_i32, %c0_i32_0 : i32, i32
  }
  func.func @transform_14(%arg0: i32, %arg1: i32) -> (i32, i32) {
    %c0_i32 = arith.constant 0 : i32
    %c0_i32_0 = arith.constant 0 : i32
    %c0_i32_1 = arith.constant 0 : i32
    return %c0_i32, %c0_i32_0 : i32, i32
  }
  func.func @transform_15(%arg0: i32, %arg1: i32) -> (i32, i32) {
    %c0_i32 = arith.constant 0 : i32
    %c0_i32_0 = arith.constant 0 : i32
    %c0_i32_1 = arith.constant 0 : i32
    return %c0_i32, %c0_i32_0 : i32, i32
  }
  func.func @transform_16(%arg0: i32, %arg1: i32) -> (i32, i32, i32) {
    %c0_i32 = arith.constant 0 : i32
    %c0_i32_0 = arith.constant 0 : i32
    return %arg0, %arg1, %c0_i32 : i32, i32, i32
  }
}

</mosaic_0001>

<bundles_post_ra>
// kernel: tpu_custom_call.1
= control target key start
LH: loop header
LB: loop body
LE: loop exit
PB: predicated region body
PF: predicated region fallthrough
CT: control target
= control target key end

     0   :  { %s6931_s0 = inlined_call_operand.vmem [shape: f32[2,64,2], index: 0, kind: input, shape index: {}]   ;;  %s6932_s1 = inlined_call_operand.hbm [shape: f32[2,128], index: 1, kind: input, shape index: {}]   ;;  %s6933_s2 = inlined_call_operand.hbm [shape: f32[2,128,128], index: 2, kind: input, shape index: {}]   ;;  %s6934_s3 = inlined_call_operand.vmem [shape: f32[3,128], index: 3, kind: input, shape index: {}]   ;;  %s6935_s4 = inlined_call_operand.vmem [shape: f32[3,128], index: 4, kind: input, shape index: {}]   ;;  %s6936_s5 = inlined_call_operand.vmem [shape: f32[3,128], index: 5, kind: input, shape index: {}]   ;;  %s6937_s6 = inlined_call_operand.hbm [shape: f32[128,384], index: 6, kind: input, shape index: {}]   ;;  %s6938_s7 = inlined_call_operand.hbm [shape: f32[128,384], index: 7, kind: input, shape index: {}]   ;;  %s6939_s8 = inlined_call_operand.hbm [shape: f32[1,384], index: 8, kind: input, shape index: {}]   ;;  %s6940_s9 = inlined_call_operand.hbm [shape: f32[1,384], index: 9, kind: input, shape index: {}]   ;;  %s6941_s10 = inlined_call_operand.hbm [shape: f32[3,128,128], index: 10, kind: input, shape index: {}]   ;;  %s6942_s11 = inlined_call_operand.vmem [shape: f32[3,128], index: 11, kind: input, shape index: {}]   ;;  %s6943_s12 = inlined_call_operand.hbm [shape: f32[3,128], index: 12, kind: input, shape index: {}]   ;;  %s6944_s13 = inlined_call_operand.hbm [shape: f32[3,128], index: 13, kind: input, shape index: {}]   ;;  %s6945_s14 = inlined_call_operand.vmem [shape: f32[128,128], index: 14, kind: input, shape index: {}]   ;;  %s6946_s15 = inlined_call_operand.vmem [shape: f32[1,128], index: 15, kind: input, shape index: {}]   ;;  %s6947_s16 = inlined_call_operand.hbm [shape: f32[2,64,128], index: 16, kind: output, shape index: {}]  }
   0x1   :  { %6963 = sst [smem:[#allocation46_spill]] %s6931_s0 }
   0x2   :  { %6964 = sst [smem:[#allocation47_spill]] %s6932_s1 }
   0x3   :  { %6965 = sst [smem:[#allocation48_spill]] %s6933_s2 }
   0x4   :  { %6966 = sst [smem:[#allocation49_spill]] %s6946_s15 }
   0x5   :  { %6967 = sst [smem:[#allocation50_spill]] %s6947_s16 }
   0x6   :  { %21 = vsyncpa [#allocation5], 0 }
   0x7   :  { %22 = vsyncpa [#allocation8], 0 }
   0x8   :  { %23 = vsyncpa [#allocation11], 0 }
   0x9   :  { %24 = vsyncpa [#allocation14], 0 }
   0xa   :  { %25 = vsyncpa [#allocation17], 0 }
   0xb   :  { %26 = vsyncpa [#allocation6], 0 }
   0xc   :  { %28 = vsyncpa [#allocation6 + $0x1], 0  ;;  %s5126_s21 = smov 0   ;;  %s5128_s22 = smov 0  }
   0xd   :  { %s5130_s23 = smov 0   ;;  %s5132_s24 = smov 0  }
   0xe   :  { %s5134_s25 = smov 0   ;;  %s5136_s26 = smov 0  }
   0xf LB: > { %6968 = sst [smem:[#allocation26_spill]] %s5001_s21  ;;  %s4209_s27 = sadd.s32 4294967295, %s5021_s26   ;;  %s5021_s26 = sphi %s5136_s26, %s34_s26   ;;  %s5017_s25 = sphi %s5134_s25, %s7025_s25   ;;  %s5013_s24 = sphi %s5132_s24, %s7024_s24   ;;  %s5009_s23 = sphi %s5130_s23, %s7023_s23   ;;  %s5005_s22 = sphi %s5128_s22, %s7022_s22   ;;  %s5001_s21 = sphi %s5126_s21, %s7021_s21  }
  0x10   : > { %6969 = sst [smem:[#allocation27_spill]] %s5005_s22  ;;  %s4210_s28 = sadd.s32 4294967294, %s5021_s26  }
  0x11   : > { %6970 = sst [smem:[#allocation28_spill]] %s5009_s23  ;;  %s46_s29 = sadd.s32 1, %s5017_s25 }
  0x12   : > { %6971 = sst [smem:[#allocation29_spill]] %s5017_s25  ;;  %s398_s30 = sadd.s32 1, %s5009_s23 }
  0x13   : > { %6972 = sst [smem:[#allocation30_spill]] %s5021_s26  ;;  %p48_p0 = scmp.ge.s32.totalorder %s46_s29, 2 }
  0x14   : > { %p408_p1 = scmp.ne.s32.totalorder %s5009_s23, %s5005_s22  ;;  %p409_p2 = scmp.eq.s32.totalorder %s4209_s27, 1 }
  0x15   : > { %p414_p3 = scmp.ne.s32.totalorder %s5005_s22, %s5001_s21  ;;  %s7027_s29 = smov (%p48_p0, %s46_s29), 0 }
  0x16   : > { %6973 = sst [smem:[#allocation31_spill]] %s7027_s29  ;;  %p5166_p4 = por %p409_p2, %p408_p1 }
  0x17   : > { %p415_p5 = scmp.eq.s32.totalorder %s4210_s28, 1  ;;  %s393_s17 = ssub.s32 %s5017_s25, %s7027_s29 }
  0x18   : > { %s6974_s0 = scalar_select %p5166_p4, 1, 0 }
  0x19   : > { %p4211_p6 = scmp.ge.s32.totalorder %s5021_s26, 1  ;;  %p396_p7 = scmp.eq.s32.totalorder %s393_s17, 0 }
  0x1a   : > { %6975 = sst [smem:[#allocation32_spill]] %s6974_s0  ;;  %p5173_p8 = por %p415_p5, %p414_p3 }
  0x1b   : > { %p422_p9 = scmp.lt.s32.totalorder %s5021_s26, 3  ;;  %p5185_p11 = scmp.eq.s32.totalorder %s4209_s27, 0 }
  0x1c   : > { %s6976_s18 = scalar_select %p5173_p8, 1, 0 }
  0x1d   : > { %s5179_s19 = scalar_select %p396_p7, %s5009_s23, %s398_s30  }
  0x1e   : > { %6977 = sst [smem:[#allocation33_spill]] %s6976_s18  ;;  %p5181_p10 = pnand %p4211_p6, %p422_p9 }
  0x1f   : > { %6978 = sst [smem:[#allocation34_spill]] %s5179_s19  ;;  %s5023_s25 = smov [#allocation7]  }
  0x20   : > { %s6981_s2 = sld [smem:[#allocation48_spill]]  ;;  %p4328_p12 = pneg %p5181_p10 }
  0x21   : > { %s447_s30 = sshll.u32 %s5023_s25, 4  ;;  %s6960_s27 = smov 128   ;;  %s448_s30 = int_to_ptr.vmem [resolvable:$true] %s447_s30 }
  0x22   : > { %p5196_p13 = pnand %p5185_p11, %p4328_p12  ;;  %s6961_s23 = smov 8  }
  0x23   : > { %s482_s25 = sshll.u32 %s6938_s7, 4  ;;  %s509_s16 = sshll.u32 %s6940_s9, 4  ;;  %s483_s25 = int_to_ptr.hbm [resolvable:$true] %s482_s25  ;;  %s510_s16 = int_to_ptr.hbm [resolvable:$true] %s509_s16 }
  0x24   : > { %s6962_s22 = smov 384   ;;  %s5028_s15 = smov 24  }
  0x25   : > { %s5030_s26 = smov [#allocation16]   ;;  %s6983_s1 = sld [smem:[#allocation47_spill]] }
  0x26   : > { %s445_s17 = sshll.u32 %s6981_s2, 4  ;;  %s5026_s2 = smov [#allocation10]   ;;  %s446_s17 = int_to_ptr.hbm [resolvable:$true] %s445_s17 }
  0x27   : > { %4334 = dma.hbm_to_vmem [thread:$0]  (!%p5196_p13), %s446_s17, 4096, %s448_s30, [#allocation8], %s6960_s27, %s6960_s27, %s6961_s23  }
  0x28   : > { %s484_s18 = sshll.u32 %s5026_s2, 4  ;;  %s5029_s17 = smov [#allocation13]   ;;  %s485_s18 = int_to_ptr.vmem [resolvable:$true] %s484_s18 }
  0x29   : > { %4340 = dma.hbm_to_vmem [thread:$0]  (!%p5196_p13), %s483_s25, 6144, %s485_s18, [#allocation11], %s6962_s22, %s6962_s22, %s5028_s15  }
  0x2a   : > { %s511_s30 = sshll.u32 %s5029_s17, 4  ;;  %s538_s2 = sshll.u32 %s6943_s12, 4  ;;  %s512_s30 = int_to_ptr.vmem [resolvable:$true] %s511_s30  ;;  %s539_s2 = int_to_ptr.hbm [resolvable:$true] %s538_s2 }
  0x2b   : > { %4346 = dma.hbm_to_vmem [thread:$0]  (!%p5196_p13), %s510_s16, 48, %s512_s30, [#allocation14]  }
  0x2c   : > { %s540_s0 = sshll.u32 %s5030_s26, 4  ;;  %s434_s18 = sshll.u32 %s6983_s1, 4  ;;  %s541_s0 = int_to_ptr.vmem [resolvable:$true] %s540_s0  ;;  %s435_s18 = int_to_ptr.hbm [resolvable:$true] %s434_s18 }
  0x2d   : > { %4352 = dma.hbm_to_vmem [thread:$0]  (!%p5196_p13), %s539_s2, 64, %s541_s0, [#allocation17]  }
  0x2e   : > { %s5031_s25 = smov [#allocation4]   ;;  %s468_s22 = sshll.u32 %s6937_s6, 4  ;;  %s469_s22 = int_to_ptr.hbm [resolvable:$true] %s468_s22 }
  0x2f   : > { %s436_s17 = sshll.u32 %s5031_s25, 4  ;;  %s497_s26 = sshll.u32 %s6939_s8, 4  ;;  %s437_s17 = int_to_ptr.vmem [resolvable:$true] %s436_s17  ;;  %s498_s26 = int_to_ptr.hbm [resolvable:$true] %s497_s26 }
  0x30   : > { %4331 = dma.hbm_to_vmem [thread:$0]  (!%p5196_p13), %s435_s18, 32, %s437_s17, [#allocation5]  }
  0x31   : > { %s5032_s23 = smov [#allocation9]   ;;  %s6984_s2 = smov 384  }
  0x32   : > { %s470_s27 = sshll.u32 %s5032_s23, 4  ;;  %s5033_s0 = smov [#allocation12]   ;;  %s471_s27 = int_to_ptr.vmem [resolvable:$true] %s470_s27 }
  0x33   : > { %4337 = dma.hbm_to_vmem [thread:$0]  (!%p5196_p13), %s469_s22, 6144, %s471_s27, [#allocation8], %s6984_s2, %s6984_s2, %s5028_s15  }
  0x34   : > { %s499_s25 = sshll.u32 %s5033_s0, 4  ;;  %s520_s18 = sshll.u32 %s6941_s10, 4  ;;  %s500_s25 = int_to_ptr.vmem [resolvable:$true] %s499_s25  ;;  %s521_s18 = int_to_ptr.hbm [resolvable:$true] %s520_s18 }
  0x35   : > { %4343 = dma.hbm_to_vmem [thread:$0]  (!%p5196_p13), %s498_s26, 48, %s500_s25, [#allocation11]  }
  0x36   : > { %s550_s30 = sshll.u32 %s6944_s13, 4  ;;  %s5034_s23 = smov [#allocation15]   ;;  %s551_s30 = int_to_ptr.hbm [resolvable:$true] %s550_s30 }
  0x37   : > { %s522_s1 = sshll.u32 %s5034_s23, 4  ;;  %s6985_s15 = smov 8   ;;  %s523_s1 = int_to_ptr.vmem [resolvable:$true] %s522_s1 }
  0x38   : > { %s6986_s22 = smov 128   ;;  %s5035_s27 = smov [#allocation18]  }
  0x39   : > { %4349 = dma.hbm_to_vmem [thread:$0]  (!%p5196_p13), %s521_s18, 6144, %s523_s1, [#allocation14], %s6986_s22, %s6986_s22, %s6985_s15  }
  0x3a   : > { %s552_s2 = sshll.u32 %s5035_s27, 4  ;;  %584 = sbr.rel (%p5181_p10) target bundleno = 3400 (0xd48), region = 84  ;;  %s553_s2 = int_to_ptr.vmem [resolvable:$true] %s552_s2 }
  0x3b   : > { %4355 = dma.hbm_to_vmem [thread:$0]  (!%p5196_p13), %s551_s30, 64, %s553_s2, [#allocation17]  }
  0x3f   : > { %4976 = dma.done.wait (%p5185_p11), [#allocation5], 32  }
  0x40   : > { %4978 = vsyncadd (%p5185_p11), [#allocation5], 4294967264 }
  0x41   : > { %4980 = dma.done.wait (%p5185_p11), [#allocation8], 10240  }
  0x42   : > { %4982 = vsyncadd (%p5185_p11), [#allocation8], 4294957056 }
  0x43   : > { %4984 = dma.done.wait (%p5185_p11), [#allocation11], 6192  }
  0x44   : > { %4986 = vsyncadd (%p5185_p11), [#allocation11], 4294961104 }
  0x45   : > { %4988 = dma.done.wait (%p5185_p11), [#allocation14], 6192  }
  0x46   : > { %4990 = vsyncadd (%p5185_p11), [#allocation14], 4294961104 }
  0x47   : > { %4992 = dma.done.wait (%p5185_p11), [#allocation17], 128  }
  0x48   : > { %4994 = vsyncadd (%p5185_p11), [#allocation17], 4294967168  ;;  %p680_p0 = scmp.lt.s32.totalorder %s5013_s24, 1  ;;  %v5036_v0 = vmov 0   ;;  %s6987_s0 = sld [smem:[#allocation46_spill]]  ;;  %v5037_v19 = vmov 1  }
  0x49   : > { %4446 = vset.pattern.permute.xlu1 %v5036_v0  ;;  %4445 = vset.pattern.permute.xlu0 %v5036_v0  ;;  %v5290_v40 = vld [vmem:[#allocation4] ss:$0 sm:$0xff]  ;;  %v5292_v41 = vld [vmem:[#allocation4 + $0x1] ss:$0 sm:$0xff]  ;;  %s7014_s17 = sld [smem:[#allocation49_spill]]  ;;  %s4257_s22 = sshll.u32 %s5013_s24, 6 }
  0x4a   : > { %s681_s1 = scalar_select %p680_p0, %s5013_s24, 1  ;;  %4448 = vset.pattern.permute.xlu2 %v5036_v0  ;;  %v5299_v47 = vld [vmem:[%s6934_s3] ss:$0 sm:$0xff] }
  0x4b   : > { %s7015_s16 = sld [smem:[#allocation27_spill]] }
  0x4c   : > { %s4256_s19 = sshll.u32 %s681_s1, 6  ;;  %s7016_s1 = sld [smem:[#allocation50_spill]] }
  0x4e   : > { %s5281_s25 = scalar_lea.vmem %s6987_s0, %s4256_s19 }
  0x4f   : > { %v691_v1 = vld [vmem:[%s5281_s25 + $0x8] sm:$0xff]  ;;  %v690_v2 = vld [vmem:[%s5281_s25] sm:$0xff]  ;;  %v692_v6 = vld [vmem:[%s5281_s25 + $0x10] sm:$0xff] }
  0x50   : > { %v4236_v3 = vadd.f32 -32.7, %v691_v1  ;;  %v4235_v4 = vadd.f32 -32.7, %v690_v2  ;;  %v694_v5 = vld [vmem:[%s5281_s25 + $0x20] sm:$0xff]  ;;  %v693_v17 = vld [vmem:[%s5281_s25 + $0x18] sm:$0xff] }
  0x51   : > { %v4239_v9 = vadd.f32 -32.7, %v694_v5  ;;  %v4237_v10 = vadd.f32 -32.7, %v692_v6  ;;  %v715_v11 = vmul.f32 0.0125, %v691_v1 }
  0x52   : > { %v707_v7 = vmul.f32 0.00050831086, %v4236_v3  ;;  %v706_v8 = vmul.f32 0.00050831086, %v4235_v4  ;;  %v716_v12 = vmul.f32 0.0125, %v692_v6  ;;  %s4031_s19 = scalar_lea.hbm %s7016_s1, %s4257_s22 }
  0x53   : > { %v708_v13 = vmul.f32 0.00050831086, %v4237_v10  ;;  %v714_v14 = vmul.f32 0.0125, %v690_v2  ;;  %v710_v15 = vmul.f32 0.00050831086, %v4239_v9 }
  0x54   : > { %738 = vperm.xlu1 %4446, %v707_v7   ;;  %733 = vperm.xlu0 %4445, %v706_v8   ;;  %v723_v16 = vadd.f32 1.0, %v715_v11  ;;  %v724_v18 = vadd.f32 1.0, %v716_v12  ;;  %v4238_v20 = vadd.f32 -32.7, %v693_v17  ;;  %v717_v22 = vmul.f32 0.0125, %v693_v17 }
  0x55   : > { %743 = vperm.xlu2 %4448, %v708_v13   ;;  %v722_v21 = vadd.f32 1.0, %v714_v14  ;;  %v718_v25 = vmul.f32 0.0125, %v694_v5  ;;  %v695_v26 = vld [vmem:[%s5281_s25 + $0x28] sm:$0xff]  ;;  %v696_v32 = vld [vmem:[%s5281_s25 + $0x30] sm:$0xff]  ;;  %v697_v6 = vld [vmem:[%s5281_s25 + $0x38] sm:$0xff] }
  0x56   : > { %v709_v23 = vmul.f32 0.00050831086, %v4238_v20  ;;  %v725_v24 = vadd.f32 1.0, %v717_v22  ;;  %v4240_v27 = vadd.f32 -32.7, %v695_v26  ;;  %s676_s30 = sand.u32 1, %s7015_s16  }
  0x57   : > { %v726_v28 = vadd.f32 1.0, %v718_v25  ;;  %v719_v30 = vmul.f32 0.0125, %v695_v26  ;;  %v4241_v33 = vadd.f32 -32.7, %v696_v32  ;;  %s4232_s23 = sshll.u32 %s676_s30, 6 }
  0x58   : > { %v711_v29 = vmul.f32 0.00050831086, %v4240_v27  ;;  %v720_v35 = vmul.f32 0.0125, %v696_v32  ;;  %v721_v9 = vmul.f32 0.0125, %v697_v6 }
  0x59   : > { %v727_v31 = vadd.f32 1.0, %v719_v30  ;;  %v712_v34 = vmul.f32 0.00050831086, %v4241_v33  ;;  %v4242_v11 = vadd.f32 -32.7, %v697_v6  ;;  %v1083_v30 = vld [vmem:[#allocation7 + $0x78] sm:$0xff] }
  0x5a   : > { %v728_v36 = vadd.f32 1.0, %v720_v35  ;;  %v729_v12 = vadd.f32 1.0, %v721_v9  ;;  %1086 = vmatpush.msra.mxu0 %v1083_v30  ;;  %v1081_v32 = vld [vmem:[#allocation7 + $0x68] sm:$0xff]  ;;  %v1080_v33 = vld [vmem:[#allocation7 + $0x60] sm:$0xff]  ;;  %v1078_v35 = vld [vmem:[#allocation7 + $0x50] sm:$0xff]  ;;  %s6846_s15 = scalar_lea.vmem [#allocation19], %s4232_s23 }
  0x5b   : > { %v713_v14 = vmul.f32 0.00050831086, %v4242_v11  ;;  %s4032_s24 = sshll.u32 %s6846_s15, 4  ;;  %s4034_s20 = sshll.u32 %s4031_s19, 4  ;;  %s4033_s24 = int_to_ptr.vmem [resolvable:$true] %s4032_s24  ;;  %s4035_s20 = int_to_ptr.hbm [resolvable:$true] %s4034_s20 }
  0x5c   : > { %4447 = vset.pattern.permute.xlu1 %v5037_v19  ;;  %753 = vperm.xlu0 %4445, %v710_v15   ;;  %s4018_s0 = scalar_lea.sflag [#allocation6], %s676_s30  ;;  %s4937_s25 = sshra.s32 %s4035_s20, 4  ;;  %s4938_s25 = int_to_ptr.hbm [resolvable:$true] %s4937_s25 }
  0x5d   : > { %788 = vperm.xlu1 %4447, %v723_v16   ;;  %4449 = vset.pattern.permute.xlu2 %v5037_v19  ;;  %s4939_s21 = scalar_lea.hbm %s4938_s25, 64  ;;  %s4943_s18 = scalar_lea.hbm %s7016_s1, 128 }
  0x5e   : > { %793 = vperm.xlu2 %4449, %v724_v18   ;;  %p4940_p1 = scmp.ne.s32.totalorder %s4938_s25, %s4939_s21  ;;  %p4944_p5 = scmp.lt.s32.totalorder %s4938_s25, %s7016_s1 }
  0x5f   : > { %p4945_p6 = scmp.lt.s32.totalorder %s4943_s18, %s4939_s21 }
  0x60   : > { %p4941_p2 = pnand %p4940_p1, %p5166_p4 }
  0x61   : > { %p4946_p7 = por %p4945_p6, %p4944_p5 }
  0x62   : > { %p4942_p3 = pneg %p4941_p2 }
  0x64   : > { %4451 = vset.pattern.permute.xlu0 %v5037_v19  ;;  %p4947_p9 = pnand %p4946_p7, %p4942_p3 }
  0x65   : > { %4450 = vset.pattern.permute.xlu1 %v5036_v0  ;;  %783 = vperm.xlu0 %4451, %v722_v21  }
  0x66   : > { %748 = vperm.xlu1 %4450, %v709_v23   ;;  %798 = vperm.xlu2 %4449, %v725_v24  }
  0x6e   : > { %4452 = vset.pattern.permute.xlu1 %v5037_v19  ;;  %4453 = vset.pattern.permute.xlu2 %v5036_v0 }
  0x6f   : > { %803 = vperm.xlu1 %4452, %v726_v28   ;;  %758 = vperm.xlu2 %4453, %v711_v29  }
  0x77   : > { %808 = vperm.xlu1 %4452, %v727_v31   ;;  %v1082_v31 = vld [vmem:[#allocation7 + $0x70] sm:$0xff] }
  0x78   : > { %1087 = vmatpush.msra.mxu0 %v1082_v31 }
  0x7a   : > { %1088 = vmatpush.msra.mxu0 %v1081_v32 }
  0x7c   : > { %1089 = vmatpush.msra.mxu0 %v1080_v33 }
  0x7f   : > { %4454 = vset.pattern.permute.xlu1 %v5036_v0 }
  0x80   : > { %763 = vperm.xlu1 %4454, %v712_v34   ;;  %v1079_v34 = vld [vmem:[#allocation7 + $0x58] sm:$0xff] }
  0x81   : > { %1090 = vmatpush.msra.mxu0 %v1079_v34 }
  0x83   : > { %1091 = vmatpush.msra.mxu0 %v1078_v35 }
  0x88   : > { %4455 = vset.pattern.permute.xlu1 %v5037_v19 }
  0x89   : > { %813 = vperm.xlu1 %4455, %v728_v36   ;;  %v1077_v36 = vld [vmem:[#allocation7 + $0x48] sm:$0xff] }
  0x8a   : > { %1092 = vmatpush.msra.mxu0 %v1077_v36 }
  0xaf   : > { %v744_v37 = vpop.permute.xlu2 %743 }
  0xb0   : > { %v774_v48 = vmul.f32 %v5290_v40, %v744_v37  ;;  %v1076_v37 = vld [vmem:[#allocation7 + $0x40] sm:$0xff] }
  0xb1   : > { %1093 = vmatpush.msra.mxu0 %v1076_v37 }
  0xb8   : > { %v794_v42 = vpop.permute.xlu2 %793 }
  0xb9   : > { %v824_v50 = vmul.f32 %v5292_v41, %v794_v42  ;;  %v1073_v42 = vld [vmem:[#allocation7 + $0x28] sm:$0xff] }
  0xbb   : > { %v832_v52 = vadd.f32 %v824_v50, %v774_v48 }
  0xbd   : > { %v5311_v60 = vadd.f32 %v5299_v47, %v832_v52 }
  0xbf   : > { %v876_v28 = vmul.f32 %v5311_v60, %v5311_v60 }
  0xc0   : > { %v799_v54 = vpop.permute.xlu2 %798 }
  0xc1   : > { %v825_v61 = vmul.f32 %v5292_v41, %v799_v54 }
  0xc6   : > { %v734_v38 = vpop.permute.xlu0 %733  ;;  %v739_v39 = vpop.permute.xlu1 %738 }
  0xc7   : > { %v773_v43 = vmul.f32 %v5290_v40, %v739_v39  ;;  %v772_v55 = vmul.f32 %v5290_v40, %v734_v38  ;;  %v1075_v38 = vld [vmem:[#allocation7 + $0x38] sm:$0xff]  ;;  %v1074_v39 = vld [vmem:[#allocation7 + $0x30] sm:$0xff] }
  0xc8   : > { %1094 = vmatpush.msra.mxu0 %v1075_v38 }
  0xc9   : > { %v759_v3 = vpop.permute.xlu2 %758 }
  0xca   : > { %v777_v4 = vmul.f32 %v5290_v40, %v759_v3  ;;  %1095 = vmatpush.msra.mxu0 %v1074_v39 }
  0xcc   : > { %1096 = vmatpush.msra.mxu0 %v1073_v42 }
  0xce   : > { %v754_v44 = vpop.permute.xlu0 %753 }
  0xcf   : > { %v789_v45 = vpop.permute.xlu1 %788  ;;  %v776_v15 = vmul.f32 %v5290_v40, %v754_v44  ;;  %v1071_v44 = vld [vmem:[#allocation7 + $0x18] sm:$0xff] }
  0xd0   : > { %v823_v46 = vmul.f32 %v5292_v41, %v789_v45  ;;  %v1070_v45 = vld [vmem:[#allocation7 + $0x10] sm:$0xff] }
  0xd2   : > { %v831_v49 = vadd.f32 %v823_v46, %v773_v43  ;;  %v1072_v43 = vld [vmem:[#allocation7 + $0x20] sm:$0xff] }
  0xd3   : > { %1097 = vmatpush.msra.mxu0 %v1072_v43 }
  0xd4   : > { %v5304_v51 = vadd.f32 %v5299_v47, %v831_v49  ;;  %v1069_v49 = vld [vmem:[#allocation7 + $0x8] sm:$0xff] }
  0xd5   : > { %1098 = vmatpush.msra.mxu0 %v1071_v44 }
  0xd6   : > { %852 = vadd.xlane.f32.xlu1 %v5304_v51  ;;  %v875_v27 = vmul.f32 %v5304_v51, %v5304_v51 }
  0xd7   : > { %v784_v53 = vpop.permute.xlu0 %783  ;;  %1099 = vmatpush.msra.mxu0 %v1070_v45 }
  0xd8   : > { %v822_v56 = vmul.f32 %v5292_v41, %v784_v53  ;;  %v749_v57 = vpop.permute.xlu1 %748  ;;  %v1068_v53 = vld [vmem:[#allocation7] sm:$0xff] }
  0xd9   : > { %v775_v59 = vmul.f32 %v5290_v40, %v749_v57  ;;  %1100 = vmatpush.msra.mxu0 %v1069_v49 }
  0xda   : > { %v830_v58 = vadd.f32 %v822_v56, %v772_v55 }
  0xdb   : > { %v833_v63 = vadd.f32 %v825_v61, %v775_v59  ;;  %1101 = vmatpush.msra.mxu0 %v1068_v53 }
  0xdc   : > { %v5315_v62 = vadd.f32 %v5299_v47, %v830_v58 }
  0xdd   : > { %v5322_v2 = vadd.f32 %v5299_v47, %v833_v63 }
  0xde   : > { %854 = vadd.xlane.f32.xlu1 %v5311_v60  ;;  %850 = vadd.xlane.f32.xlu2 %v5315_v62  ;;  %v874_v0 = vmul.f32 %v5315_v62, %v5315_v62 }
  0xdf   : > { %v877_v16 = vmul.f32 %v5322_v2, %v5322_v2 }
  0xe0   : > { %882 = vadd.xlane.f32.xlu0 %v874_v0 }
  0xe1   : > { %v804_v1 = vpop.permute.xlu1 %803 }
  0xe2   : > { %v826_v13 = vmul.f32 %v5292_v41, %v804_v1 }
  0xe4   : > { %v834_v17 = vadd.f32 %v826_v13, %v776_v15 }
  0xe6   : > { %856 = vadd.xlane.f32.xlu1 %v5322_v2  ;;  %v5337_v19 = vadd.f32 %v5299_v47, %v834_v17 }
  0xe8   : > { %v878_v20 = vmul.f32 %v5337_v19, %v5337_v19 }
  0xe9   : > { %v809_v5 = vpop.permute.xlu1 %808 }
  0xea   : > { %v827_v7 = vmul.f32 %v5292_v41, %v809_v5 }
  0xec   : > { %v835_v8 = vadd.f32 %v827_v7, %v777_v4 }
  0xee   : > { %v5329_v10 = vadd.f32 %v5299_v47, %v835_v8 }
  0xf0   : > { %860 = vadd.xlane.f32.xlu1 %v5329_v10  ;;  %v879_v23 = vmul.f32 %v5329_v10, %v5329_v10 }
  0xf2   : > { %v764_v18 = vpop.permute.xlu1 %763 }
  0xf3   : > { %v778_v22 = vmul.f32 %v5290_v40, %v764_v18 }
  0xf4   : > { %818 = vperm.xlu0 %4451, %v729_v12   ;;  %v5365_v12 = vld [vmem:[%s6935_s4] ss:$0 sm:$0xff] }
  0xf6   : > { %768 = vperm.xlu2 %4453, %v713_v14  }
  0xf8   : > { %888 = vadd.xlane.f32.xlu1 %v877_v16 }
  0xfb   : > { %v814_v21 = vpop.permute.xlu1 %813 }
  0xfc   : > { %v828_v24 = vmul.f32 %v5292_v41, %v814_v21 }
  0xfe   : > { %v836_v25 = vadd.f32 %v828_v24, %v778_v22 }
 0x100   : > { %890 = vadd.xlane.f32.xlu1 %v878_v20  ;;  %v5346_v26 = vadd.f32 %v5299_v47, %v836_v25 }
 0x102   : > { %v880_v29 = vmul.f32 %v5346_v26, %v5346_v26 }
 0x108   : > { %892 = vadd.xlane.f32.xlu1 %v879_v23 }
 0x110   : > { %862 = vadd.xlane.f32.xlu1 %v5346_v26 }
 0x11e   : > { %858 = vadd.xlane.f32.xlu0 %v5337_v19 }
 0x11f   : > { %884 = vadd.xlane.f32.xlu2 %v875_v27 }
 0x127   : > { %886 = vadd.xlane.f32.xlu2 %v876_v28 }
 0x12f   : > { %894 = vadd.xlane.f32.xlu2 %v880_v29 }
 0x149   : > { %v853_v56 = vpop.xlane.xlu1 %852 }
 0x14a   : > { %v5383_v28 = vmul.f32 0.03125, %v853_v56 }
 0x14c   : > { %v907_v29 = vmul.f32 %v5383_v28, %v5383_v28 }
 0x151   : > { %v851_v46 = vpop.xlane.xlu2 %850  ;;  %v855_v59 = vpop.xlane.xlu1 %854 }
 0x152   : > { %v866_v48 = vmul.f32 0.03125, %v851_v46  ;;  %v5398_v46 = vmul.f32 0.03125, %v855_v59 }
 0x153   : > { %v883_v50 = vpop.xlane.xlu0 %882 }
 0x154   : > { %v906_v52 = vmul.f32 %v866_v48, %v866_v48  ;;  %v898_v54 = vmul.f32 0.03125, %v883_v50  ;;  %v922_v9 = vsub.f32 %v5315_v62, %v866_v48  ;;  %v5373_v62 = vld [vmem:[%s6936_s5] ss:$0 sm:$0xff]  ;;  %v908_v49 = vmul.f32 %v5398_v46, %v5398_v46 }
 0x156   : > { %v914_v55 = vsub.f32 %v898_v54, %v906_v52 }
 0x158   : > { %v930_v57 = vadd.f32 1e-05, %v914_v55 }
 0x159   : > { %v769_v0 = vpop.permute.xlu2 %768  ;;  %v857_v13 = vpop.xlane.xlu1 %856 }
 0x15a   : > { %4477 = vrsqrt.f32 %v930_v57  ;;  %v779_v4 = vmul.f32 %v5290_v40, %v769_v0  ;;  %vm944_vm1 = vweird.f32 %v930_v57  ;;  %v5377_v21 = vmul.f32 0.03125, %v857_v13 }
 0x15c   : > { %v909_v22 = vmul.f32 %v5377_v21, %v5377_v21 }
 0x160   : > { %v4478_v58 = vpop.eup %4477 }
 0x161   : > { %v939_v61 = vmul.f32 %v4478_v58, %v930_v57  ;;  %vm945_vm0 = vweird.f32 %v4478_v58 }
 0x162   : > { %vm946_vm2 = vmor %vm944_vm1, %vm945_vm0 }
 0x163   : > { %v940_v63 = vmul.f32 %v4478_v58, %v939_v61  ;;  %v861_v17 = vpop.xlane.xlu1 %860 }
 0x164   : > { %v5392_v37 = vmul.f32 0.03125, %v861_v17 }
 0x165   : > { %v941_v1 = vmul.f32 0.5, %v940_v63 }
 0x166   : > { %v819_v3 = vpop.permute.xlu0 %818  ;;  %v911_v42 = vmul.f32 %v5392_v37, %v5392_v37 }
 0x167   : > { %v829_v5 = vmul.f32 %v5292_v41, %v819_v3  ;;  %v942_v6 = vsub.f32 1.5, %v941_v1 }
 0x169   : > { %v837_v7 = vadd.f32 %v829_v5, %v779_v4  ;;  %v943_v8 = vmul.f32 %v4478_v58, %v942_v6 }
 0x16b   : > { %v5360_v11 = vadd.f32 %v5299_v47, %v837_v7  ;;  %v947_v40 = vsel %vm946_vm2, %v4478_v58, %v943_v8  ;;  %v889_v20 = vpop.xlane.xlu1 %888 }
 0x16c   : > { %v1018_v14 = vmul.f32 %v947_v40, %v922_v9  ;;  %v901_v23 = vmul.f32 0.03125, %v889_v20  ;;  %v923_v20 = vsub.f32 %v5304_v51, %v5383_v28 }
 0x16d   : > { %864 = vadd.xlane.f32.xlu1 %v5360_v11  ;;  %v881_v41 = vmul.f32 %v5360_v11, %v5360_v11 }
 0x16e   : > { %v1027_v47 = vmul.f32 %v5365_v12, %v1018_v14  ;;  %v917_v25 = vsub.f32 %v901_v23, %v909_v22 }
 0x16f   : > { %896 = vadd.xlane.f32.xlu2 %v881_v41 }
 0x170   : > { %v1036_v15 = vadd.f32 %v5373_v62, %v1027_v47  ;;  %v5381_v27 = vadd.f32 1e-05, %v917_v25 }
 0x172   : > { %vm1044_vm3 = vcmp.ge.f32.partialorder %v1036_v15, 0.0  ;;  %v1052_v16 = vmul.f32 0.01, %v1036_v15  ;;  %4479 = vrsqrt.f32 %v5381_v27  ;;  %vm974_vm6 = vweird.f32 %v5381_v27 }
 0x173   : > { %v891_v24 = vpop.xlane.xlu1 %890 }
 0x174   : > { %v1060_v18 = vsel %vm1044_vm3, %v1036_v15, %v1052_v16  ;;  %v902_v35 = vmul.f32 0.03125, %v891_v24 }
 0x175   : > { %1102 = vmatmul.f32.vlgmr.msra.gmra.mxu0 %v1060_v18 }
 0x178   : > { %v5396_v45 = vpop.eup %4479 }
 0x179   : > { %v969_v52 = vmul.f32 %v5396_v45, %v5381_v27  ;;  %vm975_vm7 = vweird.f32 %v5396_v45 }
 0x17a   : > { %vm5430_vm9 = vmor %vm974_vm6, %vm975_vm7 }
 0x17b   : > { %v893_v31 = vpop.xlane.xlu1 %892  ;;  %v970_v58 = vmul.f32 %v5396_v45, %v969_v52 }
 0x17c   : > { %v903_v43 = vmul.f32 0.03125, %v893_v31 }
 0x17d   : > { %v971_v6 = vmul.f32 0.5, %v970_v58 }
 0x17e   : > { %v919_v53 = vsub.f32 %v903_v43, %v911_v42  ;;  %v924_v42 = vsub.f32 %v5311_v60, %v5398_v46  ;;  %v925_v43 = vsub.f32 %v5322_v2, %v5377_v21 }
 0x17f   : > { %v972_v14 = vsub.f32 1.5, %v971_v6 }
 0x180   : > { %v5408_v59 = vadd.f32 1e-05, %v919_v53 }
 0x181   : > { %v973_v24 = vmul.f32 %v5396_v45, %v972_v14 }
 0x182   : > { %vm994_vm2 = vweird.f32 %v5408_v59 }
 0x183   : > { %v863_v55 = vpop.xlane.xlu1 %862 }
 0x184   : > { %v5410_v61 = vmul.f32 0.03125, %v863_v55 }
 0x186   : > { %v912_v3 = vmul.f32 %v5410_v61, %v5410_v61 }
 0x191   : > { %v859_v30 = vpop.xlane.xlu0 %858 }
 0x192   : > { %v5388_v32 = vmul.f32 0.03125, %v859_v30  ;;  %v885_v33 = vpop.xlane.xlu2 %884 }
 0x193   : > { %v899_v34 = vmul.f32 0.03125, %v885_v33 }
 0x194   : > { %v910_v36 = vmul.f32 %v5388_v32, %v5388_v32  ;;  %v926_v58 = vsub.f32 %v5337_v19, %v5388_v32  ;;  %v927_v32 = vsub.f32 %v5329_v10, %v5392_v37 }
 0x195   : > { %v915_v38 = vsub.f32 %v899_v34, %v907_v29  ;;  %v977_v34 = vsel %vm5430_vm9, %v5396_v45, %v973_v24 }
 0x196   : > { %v918_v39 = vsub.f32 %v902_v35, %v910_v36  ;;  %v1021_v53 = vmul.f32 %v977_v34, %v925_v43 }
 0x197   : > { %v931_v44 = vadd.f32 1e-05, %v915_v38 }
 0x198   : > { %v5400_v48 = vadd.f32 1e-05, %v918_v39  ;;  %v1030_v21 = vmul.f32 %v5365_v12, %v1021_v53 }
 0x199   : > { %4481 = vrsqrt.f32 %v931_v44  ;;  %vm954_vm5 = vweird.f32 %v931_v44 }
 0x19a   : > { %v887_v50 = vpop.xlane.xlu2 %886  ;;  %4483 = vrsqrt.f32 %v5400_v48  ;;  %vm984_vm15 = vweird.f32 %v5400_v48 }
 0x19b   : > { %v900_v54 = vmul.f32 0.03125, %v887_v50 }
 0x19d   : > { %v916_v56 = vsub.f32 %v900_v54, %v908_v49 }
 0x19f   : > { %v4482_v57 = vpop.eup %4481  ;;  %v932_v63 = vadd.f32 1e-05, %v916_v56 }
 0x1a0   : > { %v949_v0 = vmul.f32 %v4482_v57, %v931_v44  ;;  %v5412_v1 = vpop.eup %4483  ;;  %vm955_vm4 = vweird.f32 %v4482_v57 }
 0x1a1   : > { %4485 = vrsqrt.f32 %v932_v63  ;;  %v979_v8 = vmul.f32 %v5412_v1, %v5400_v48  ;;  %vm956_vm8 = vmor %vm954_vm5, %vm955_vm4  ;;  %vm964_vm11 = vweird.f32 %v932_v63  ;;  %vm985_vm14 = vweird.f32 %v5412_v1 }
 0x1a2   : > { %v950_v4 = vmul.f32 %v4482_v57, %v949_v0  ;;  %v895_v5 = vpop.xlane.xlu2 %894  ;;  %4487 = vrsqrt.f32 %v5408_v59  ;;  %vm986_vm0 = vmor %vm984_vm15, %vm985_vm14 }
 0x1a3   : > { %v904_v7 = vmul.f32 0.03125, %v895_v5  ;;  %v980_v15 = vmul.f32 %v5412_v1, %v979_v8 }
 0x1a4   : > { %v951_v9 = vmul.f32 0.5, %v950_v4 }
 0x1a5   : > { %v920_v13 = vsub.f32 %v904_v7, %v912_v3  ;;  %v981_v51 = vmul.f32 0.5, %v980_v15  ;;  %v1039_v3 = vadd.f32 %v5373_v62, %v1030_v21  ;;  %v928_v15 = vsub.f32 %v5346_v26, %v5410_v61 }
 0x1a6   : > { %v952_v40 = vsub.f32 1.5, %v951_v9 }
 0x1a7   : > { %v4486_v41 = vpop.eup %4485  ;;  %v5419_v47 = vadd.f32 1e-05, %v920_v13  ;;  %v982_v36 = vsub.f32 1.5, %v981_v51  ;;  %v1055_v6 = vmul.f32 0.01, %v1039_v3  ;;  %vm1047_vm5 = vcmp.ge.f32.partialorder %v1039_v3, 0.0 }
 0x1a8   : > { %v953_v16 = vmul.f32 %v4482_v57, %v952_v40  ;;  %v959_v17 = vmul.f32 %v4486_v41, %v932_v63  ;;  %v5422_v18 = vpop.eup %4487  ;;  %vm965_vm10 = vweird.f32 %v4486_v41 }
 0x1a9   : > { %4489 = vrsqrt.f32 %v5419_v47  ;;  %v989_v30 = vmul.f32 %v5422_v18, %v5408_v59  ;;  %vm966_vm12 = vmor %vm964_vm11, %vm965_vm10  ;;  %v983_v54 = vmul.f32 %v5412_v1, %v982_v36  ;;  %vm995_vm3 = vweird.f32 %v5422_v18 }
 0x1aa   : > { %v960_v22 = vmul.f32 %v4486_v41, %v959_v17  ;;  %v957_v23 = vsel %vm956_vm8, %v4482_v57, %v953_v16  ;;  %vm996_vm4 = vmor %vm994_vm2, %vm995_vm3  ;;  %vm1004_vm6 = vweird.f32 %v5419_v47  ;;  %v1063_v59 = vsel %vm1047_vm5, %v1039_v3, %v1055_v6  ;;  %v1361_v3 = vld [vmem:[#allocation7 + $0xe8] sm:$0xff]  ;;  %v1359_v6 = vld [vmem:[#allocation7 + $0xd8] sm:$0xff] }
 0x1ab   : > { %v1019_v25 = vmul.f32 %v957_v23, %v923_v20  ;;  %v990_v35 = vmul.f32 %v5422_v18, %v989_v30  ;;  %v987_v56 = vsel %vm986_vm0, %v5412_v1, %v983_v54 }
 0x1ac   : > { %v961_v28 = vmul.f32 0.5, %v960_v22  ;;  %v1022_v0 = vmul.f32 %v987_v56, %v926_v58 }
 0x1ad   : > { %v1028_v27 = vmul.f32 %v5365_v12, %v1019_v25  ;;  %v991_v45 = vmul.f32 0.5, %v990_v35 }
 0x1ae   : > { %v962_v31 = vsub.f32 1.5, %v961_v28  ;;  %v1031_v1 = vmul.f32 %v5365_v12, %v1022_v0  ;;  %v1362_v0 = vld [vmem:[#allocation7 + $0xf0] sm:$0xff] }
 0x1af   : > { %v1037_v33 = vadd.f32 %v5373_v62, %v1028_v27  ;;  %v4490_v39 = vpop.eup %4489  ;;  %v992_v46 = vsub.f32 1.5, %v991_v45 }
 0x1b0   : > { %v963_v38 = vmul.f32 %v4486_v41, %v962_v31  ;;  %v999_v55 = vmul.f32 %v4490_v39, %v5419_v47  ;;  %vm1005_vm7 = vweird.f32 %v4490_v39  ;;  %v1040_v8 = vadd.f32 %v5373_v62, %v1031_v1  ;;  %v5475_v31 = vld [vmem:[%s6934_s3 + $0x1] ss:$0 sm:$0xff] }
 0x1b1   : > { %vm1045_vm13 = vcmp.ge.f32.partialorder %v1037_v33, 0.0  ;;  %v1053_v44 = vmul.f32 0.01, %v1037_v33  ;;  %v993_v4 = vmul.f32 %v5422_v18, %v992_v46  ;;  %vm1006_vm8 = vmor %vm1004_vm6, %vm1005_vm7 }
 0x1b2   : > { %v967_v49 = vsel %vm966_vm12, %v4486_v41, %v963_v38  ;;  %v1000_v57 = vmul.f32 %v4490_v39, %v999_v55  ;;  %v1056_v40 = vmul.f32 0.01, %v1040_v8  ;;  %vm1048_vm9 = vcmp.ge.f32.partialorder %v1040_v8, 0.0 }
 0x1b3   : > { %v1061_v50 = vsel %vm1045_vm13, %v1037_v33, %v1053_v44  ;;  %v1020_v52 = vmul.f32 %v967_v49, %v924_v42  ;;  %v997_v19 = vsel %vm996_vm4, %v5422_v18, %v993_v4 }
 0x1b4   : > { %1105 = vmatmul.f32.gmra.mxu0 %v1061_v50  ;;  %v1001_v5 = vmul.f32 0.5, %v1000_v57  ;;  %v1023_v9 = vmul.f32 %v997_v19, %v927_v32  ;;  %v1064_v16 = vsel %vm1048_vm9, %v1040_v8, %v1056_v40  ;;  %v1357_v32 = vld [vmem:[#allocation7 + $0xc8] sm:$0xff]  ;;  %v1356_v8 = vld [vmem:[#allocation7 + $0xc0] sm:$0xff]  ;;  %v1354_v40 = vld [vmem:[#allocation7 + $0xb0] sm:$0xff] }
 0x1b5   : > { %v1029_v60 = vmul.f32 %v5365_v12, %v1020_v52 }
 0x1b6   : > { %v1002_v7 = vsub.f32 1.5, %v1001_v5  ;;  %v1032_v41 = vmul.f32 %v5365_v12, %v1023_v9  ;;  %v1360_v5 = vld [vmem:[#allocation7 + $0xe0] sm:$0xff] }
 0x1b7   : > { %v1038_v2 = vadd.f32 %v5373_v62, %v1029_v60 }
 0x1b8   : > { %v1003_v13 = vmul.f32 %v4490_v39, %v1002_v7  ;;  %v1041_v10 = vadd.f32 %v5373_v62, %v1032_v41  ;;  %v1358_v7 = vld [vmem:[#allocation7 + $0xd0] sm:$0xff]  ;;  %v1353_v41 = vld [vmem:[#allocation7 + $0xa8] sm:$0xff] }
 0x1b9   : > { %vm1046_vm1 = vcmp.ge.f32.partialorder %v1038_v2, 0.0  ;;  %v1054_v63 = vmul.f32 0.01, %v1038_v2 }
 0x1ba   : > { %v1007_v14 = vsel %vm1006_vm8, %v4490_v39, %v1003_v13  ;;  %v1057_v47 = vmul.f32 0.01, %v1041_v10  ;;  %vm1049_vm10 = vcmp.ge.f32.partialorder %v1041_v10, 0.0  ;;  %v1355_v13 = vld [vmem:[#allocation7 + $0xb8] sm:$0xff] }
 0x1bb   : > { %v1062_v48 = vsel %vm1046_vm1, %v1038_v2, %v1054_v63  ;;  %v1024_v37 = vmul.f32 %v1007_v14, %v928_v15  ;;  %v1363_v63 = vld [vmem:[#allocation7 + $0xf8] sm:$0xff]  ;;  %v1352_v14 = vld [vmem:[#allocation7 + $0xa0] sm:$0xff] }
 0x1bc   : > { %1108 = vmatmul.f32.gmra.mxu0 %v1062_v48  ;;  %v1065_v18 = vsel %vm1049_vm10, %v1041_v10, %v1057_v47  ;;  %1366 = vmatpush.msra.mxu1 %v1363_v63  ;;  %v1351_v15 = vld [vmem:[#allocation7 + $0x98] sm:$0xff]  ;;  %v1349_v10 = vld [vmem:[#allocation7 + $0x88] sm:$0xff]  ;;  %v1348_v47 = vld [vmem:[#allocation7 + $0x80] sm:$0xff] }
 0x1bd   : > { %v1033_v17 = vmul.f32 %v5365_v12, %v1024_v37 }
 0x1be   : > { %1367 = vmatpush.msra.mxu1 %v1362_v0 }
 0x1bf   : > { %v1042_v20 = vadd.f32 %v5373_v62, %v1033_v17 }
 0x1c0   : > { %1368 = vmatpush.msra.mxu1 %v1361_v3 }
 0x1c1   : > { %v1058_v22 = vmul.f32 0.01, %v1042_v20  ;;  %vm1050_vm11 = vcmp.ge.f32.partialorder %v1042_v20, 0.0 }
 0x1c2   : > { %1369 = vmatpush.msra.mxu1 %v1360_v5 }
 0x1c3   : > { %v1066_v23 = vsel %vm1050_vm11, %v1042_v20, %v1058_v22 }
 0x1c4   : > { %1111 = vmatmul.f32.gmra.mxu0 %v1063_v59  ;;  %1370 = vmatpush.msra.mxu1 %v1359_v6 }
 0x1c6   : > { %1371 = vmatpush.msra.mxu1 %v1358_v7 }
 0x1c8   : > { %1372 = vmatpush.msra.mxu1 %v1357_v32 }
 0x1ca   : > { %1373 = vmatpush.msra.mxu1 %v1356_v8 }
 0x1cc   : > { %1114 = vmatmul.f32.gmra.mxu0 %v1064_v16  ;;  %1374 = vmatpush.msra.mxu1 %v1355_v13  ;;  %v1350_v16 = vld [vmem:[#allocation7 + $0x90] sm:$0xff] }
 0x1ce   : > { %1375 = vmatpush.msra.mxu1 %v1354_v40 }
 0x1d0   : > { %1376 = vmatpush.msra.mxu1 %v1353_v41 }
 0x1d2   : > { %1377 = vmatpush.msra.mxu1 %v1352_v14 }
 0x1d4   : > { %1117 = vmatmul.f32.gmra.mxu0 %v1065_v18  ;;  %1378 = vmatpush.msra.mxu1 %v1351_v15 }
 0x1d6   : > { %1379 = vmatpush.msra.mxu1 %v1350_v16 }
 0x1d8   : > { %1380 = vmatpush.msra.mxu1 %v1349_v10 }
 0x1da   : > { %1381 = vmatpush.msra.mxu1 %v1348_v47 }
 0x1dc   : > { %1120 = vmatmul.f32.gmra.mxu0 %v1066_v23 }
 0x1e0   : > { %v865_v24 = vpop.xlane.xlu1 %864 }
 0x1e1   : > { %v873_v25 = vmul.f32 0.03125, %v865_v24 }
 0x1e2   : > { %v897_v26 = vpop.xlane.xlu2 %896 }
 0x1e3   : > { %v913_v61 = vmul.f32 %v873_v25, %v873_v25  ;;  %v905_v29 = vmul.f32 0.03125, %v897_v26  ;;  %v929_v43 = vsub.f32 %v5360_v11, %v873_v25 }
 0x1e5   : > { %v921_v30 = vsub.f32 %v905_v29, %v913_v61 }
 0x1e7   : > { %v937_v51 = vadd.f32 1e-05, %v921_v30 }
 0x1e9   : > { %4491 = vrsqrt.f32 %v937_v51  ;;  %vm1014_vm13 = vweird.f32 %v937_v51 }
 0x1ef   : > { %v4492_v28 = vpop.eup %4491 }
 0x1f0   : > { %v1009_v27 = vmul.f32 %v4492_v28, %v937_v51  ;;  %vm1015_vm12 = vweird.f32 %v4492_v28 }
 0x1f1   : > { %vm1016_vm14 = vmor %vm1014_vm13, %vm1015_vm12 }
 0x1f2   : > { %v1010_v33 = vmul.f32 %v4492_v28, %v1009_v27  ;;  %v1103_v34 = vpop.f32.mrf.mxu0 }
 0x1f3   : > { %v5478_v36 = vadd.f32 %v5475_v31, %v1103_v34  ;;  %v5529_v34 = vld [vmem:[%s6935_s4 + $0x1] ss:$0 sm:$0xff] }
 0x1f4   : > { %v1011_v35 = vmul.f32 0.5, %v1010_v33 }
 0x1f5   : > { %1129 = vadd.xlane.f32.xlu1 %v5478_v36  ;;  %v1153_v39 = vmul.f32 %v5478_v36, %v5478_v36 }
 0x1f6   : > { %v1012_v38 = vsub.f32 1.5, %v1011_v35 }
 0x1f7   : > { %1161 = vadd.xlane.f32.xlu2 %v1153_v39 }
 0x1f8   : > { %v1013_v42 = vmul.f32 %v4492_v28, %v1012_v38 }
 0x1fa   : > { %v1017_v44 = vsel %vm1016_vm14, %v4492_v28, %v1013_v42 }
 0x1fb   : > { %v1025_v49 = vmul.f32 %v1017_v44, %v929_v43 }
 0x1fd   : > { %v1034_v50 = vmul.f32 %v5365_v12, %v1025_v49 }
 0x1ff   : > { %v1043_v52 = vadd.f32 %v5373_v62, %v1034_v50 }
 0x201   : > { %vm1051_vm15 = vcmp.ge.f32.partialorder %v1043_v52, 0.0  ;;  %v1059_v53 = vmul.f32 0.01, %v1043_v52 }
 0x203   : > { %v1067_v45 = vsel %vm1051_vm15, %v1043_v52, %v1059_v53 }
 0x204   : > { %1123 = vmatmul.f32.gmra.mxu0 %v1067_v45 }
 0x231   : > { %v1106_v54 = vpop.f32.mrf.mxu0 }
 0x232   : > { %v5487_v55 = vadd.f32 %v5475_v31, %v1106_v54 }
 0x234   : > { %1131 = vadd.xlane.f32.xlu0 %v5487_v55  ;;  %v1154_v11 = vmul.f32 %v5487_v55, %v5487_v55 }
 0x236   : > { %1163 = vadd.xlane.f32.xlu1 %v1154_v11 }
 0x239   : > { %v1109_v60 = vpop.f32.mrf.mxu0 }
 0x23a   : > { %v5493_v2 = vadd.f32 %v5475_v31, %v1109_v60 }
 0x23c   : > { %1133 = vadd.xlane.f32.xlu2 %v5493_v2  ;;  %v1155_v12 = vmul.f32 %v5493_v2, %v5493_v2 }
 0x23e   : > { %1165 = vadd.xlane.f32.xlu0 %v1155_v12 }
 0x241   : > { %v1112_v62 = vpop.f32.mrf.mxu0 }
 0x242   : > { %v5499_v21 = vadd.f32 %v5475_v31, %v1112_v62 }
 0x244   : > { %1135 = vadd.xlane.f32.xlu1 %v5499_v21  ;;  %v1156_v46 = vmul.f32 %v5499_v21, %v5499_v21 }
 0x246   : > { %1167 = vadd.xlane.f32.xlu2 %v1156_v46 }
 0x249   : > { %v1115_v56 = vpop.f32.mrf.mxu0 }
 0x24a   : > { %v5505_v57 = vadd.f32 %v5475_v31, %v1115_v56 }
 0x24c   : > { %1137 = vadd.xlane.f32.xlu0 %v5505_v57  ;;  %v1157_v58 = vmul.f32 %v5505_v57, %v5505_v57 }
 0x24e   : > { %1169 = vadd.xlane.f32.xlu1 %v1157_v58 }
 0x251   : > { %v1118_v48 = vpop.f32.mrf.mxu0 }
 0x252   : > { %v5511_v4 = vadd.f32 %v5475_v31, %v1118_v48 }
 0x254   : > { %1139 = vadd.xlane.f32.xlu2 %v5511_v4  ;;  %v1158_v1 = vmul.f32 %v5511_v4, %v5511_v4 }
 0x256   : > { %1171 = vadd.xlane.f32.xlu0 %v1158_v1 }
 0x259   : > { %v1121_v19 = vpop.f32.mrf.mxu0 }
 0x25a   : > { %v5517_v59 = vadd.f32 %v5475_v31, %v1121_v19 }
 0x25c   : > { %1141 = vadd.xlane.f32.xlu1 %v5517_v59  ;;  %v1159_v9 = vmul.f32 %v5517_v59, %v5517_v59 }
 0x25e   : > { %1173 = vadd.xlane.f32.xlu2 %v1159_v9 }
 0x268   : > { %v1130_v37 = vpop.xlane.xlu1 %1129 }
 0x269   : > { %v1145_v17 = vmul.f32 0.03125, %v1130_v37 }
 0x26a   : > { %v1162_v18 = vpop.xlane.xlu2 %1161 }
 0x26b   : > { %v1185_v20 = vmul.f32 %v1145_v17, %v1145_v17  ;;  %v1177_v22 = vmul.f32 0.03125, %v1162_v18  ;;  %v1201_v27 = vsub.f32 %v5478_v36, %v1145_v17  ;;  %v5537_v36 = vld [vmem:[%s6936_s5 + $0x1] ss:$0 sm:$0xff] }
 0x26d   : > { %v1193_v23 = vsub.f32 %v1177_v22, %v1185_v20 }
 0x26f   : > { %v1209_v24 = vadd.f32 1e-05, %v1193_v23 }
 0x271   : > { %4493 = vrsqrt.f32 %v1209_v24  ;;  %vm1223_vm1 = vweird.f32 %v1209_v24 }
 0x277   : > { %v4494_v25 = vpop.eup %4493 }
 0x278   : > { %v1218_v26 = vmul.f32 %v4494_v25, %v1209_v24  ;;  %vm1224_vm0 = vweird.f32 %v4494_v25 }
 0x279   : > { %vm1225_vm2 = vmor %vm1223_vm1, %vm1224_vm0 }
 0x27a   : > { %v1219_v61 = vmul.f32 %v4494_v25, %v1218_v26 }
 0x27c   : > { %v1220_v29 = vmul.f32 0.5, %v1219_v61 }
 0x27e   : > { %v1221_v30 = vsub.f32 1.5, %v1220_v29 }
 0x280   : > { %v1222_v51 = vmul.f32 %v4494_v25, %v1221_v30 }
 0x281   : > { %v1124_v28 = vpop.f32.mrf.mxu0 }
 0x282   : > { %v5524_v33 = vadd.f32 %v5475_v31, %v1124_v28  ;;  %v1226_v35 = vsel %vm1225_vm2, %v4494_v25, %v1222_v51 }
 0x283   : > { %v1297_v39 = vmul.f32 %v1226_v35, %v1201_v27 }
 0x284   : > { %1143 = vadd.xlane.f32.xlu0 %v5524_v33  ;;  %v1160_v38 = vmul.f32 %v5524_v33, %v5524_v33 }
 0x285   : > { %v1306_v31 = vmul.f32 %v5529_v34, %v1297_v39 }
 0x286   : > { %1175 = vadd.xlane.f32.xlu1 %v1160_v38 }
 0x287   : > { %v1315_v42 = vadd.f32 %v5537_v36, %v1306_v31 }
 0x289   : > { %vm1323_vm3 = vcmp.ge.f32.partialorder %v1315_v42, 0.0  ;;  %v1331_v43 = vmul.f32 0.01, %v1315_v42 }
 0x28b   : > { %v1339_v44 = vsel %vm1323_vm3, %v1315_v42, %v1331_v43 }
 0x28c   : > { %1382 = vmatmul.f32.vlgmr.msra.gmra.mxu1 %v1339_v44 }
 0x2a7   : > { %v1132_v49 = vpop.xlane.xlu0 %1131 }
 0x2a8   : > { %v1146_v50 = vmul.f32 0.03125, %v1132_v49 }
 0x2a9   : > { %v1164_v52 = vpop.xlane.xlu1 %1163 }
 0x2aa   : > { %v1186_v53 = vmul.f32 %v1146_v50, %v1146_v50  ;;  %v1178_v45 = vmul.f32 0.03125, %v1164_v52  ;;  %v1202_v16 = vsub.f32 %v5487_v55, %v1146_v50 }
 0x2ac   : > { %v1194_v54 = vsub.f32 %v1178_v45, %v1186_v53 }
 0x2ae   : > { %v1210_v11 = vadd.f32 1e-05, %v1194_v54 }
 0x2af   : > { %v1134_v60 = vpop.xlane.xlu2 %1133 }
 0x2b0   : > { %4495 = vrsqrt.f32 %v1210_v11  ;;  %v1147_v12 = vmul.f32 0.03125, %v1134_v60  ;;  %vm1233_vm5 = vweird.f32 %v1210_v11 }
 0x2b1   : > { %v1166_v62 = vpop.xlane.xlu0 %1165 }
 0x2b2   : > { %v1187_v46 = vmul.f32 %v1147_v12, %v1147_v12  ;;  %v1179_v56 = vmul.f32 0.03125, %v1166_v62  ;;  %v1203_v27 = vsub.f32 %v5493_v2, %v1147_v12 }
 0x2b4   : > { %v1195_v58 = vsub.f32 %v1179_v56, %v1187_v46 }
 0x2b6   : > { %v4496_v63 = vpop.eup %4495  ;;  %v1211_v0 = vadd.f32 1e-05, %v1195_v58 }
 0x2b7   : > { %v1228_v48 = vmul.f32 %v4496_v63, %v1210_v11  ;;  %v1136_v3 = vpop.xlane.xlu1 %1135  ;;  %vm1234_vm4 = vweird.f32 %v4496_v63 }
 0x2b8   : > { %4497 = vrsqrt.f32 %v1211_v0  ;;  %v5541_v5 = vmul.f32 0.03125, %v1136_v3  ;;  %vm1235_vm6 = vmor %vm1233_vm5, %vm1234_vm4  ;;  %vm1243_vm8 = vweird.f32 %v1211_v0 }
 0x2b9   : > { %v1229_v1 = vmul.f32 %v4496_v63, %v1228_v48  ;;  %v1168_v6 = vpop.xlane.xlu2 %1167 }
 0x2ba   : > { %v1188_v7 = vmul.f32 %v5541_v5, %v5541_v5  ;;  %v1180_v19 = vmul.f32 0.03125, %v1168_v6  ;;  %v1204_v56 = vsub.f32 %v5499_v21, %v5541_v5 }
 0x2bb   : > { %v1230_v32 = vmul.f32 0.5, %v1229_v1 }
 0x2bc   : > { %v1196_v8 = vsub.f32 %v1180_v19, %v1188_v7 }
 0x2bd   : > { %v1231_v9 = vsub.f32 1.5, %v1230_v32 }
 0x2be   : > { %v4498_v13 = vpop.eup %4497  ;;  %v1212_v40 = vadd.f32 1e-05, %v1196_v8 }
 0x2bf   : > { %v1232_v41 = vmul.f32 %v4496_v63, %v1231_v9  ;;  %v1238_v14 = vmul.f32 %v4498_v13, %v1211_v0  ;;  %v1138_v15 = vpop.xlane.xlu0 %1137  ;;  %vm1244_vm7 = vweird.f32 %v4498_v13 }
 0x2c0   : > { %4499 = vrsqrt.f32 %v1212_v40  ;;  %v5546_v10 = vmul.f32 0.03125, %v1138_v15  ;;  %vm1245_vm9 = vmor %vm1243_vm8, %vm1244_vm7  ;;  %vm1253_vm12 = vweird.f32 %v1212_v40 }
 0x2c1   : > { %v1239_v37 = vmul.f32 %v4498_v13, %v1238_v14  ;;  %v1170_v47 = vpop.xlane.xlu1 %1169  ;;  %v1236_v17 = vsel %vm1235_vm6, %v4496_v63, %v1232_v41 }
 0x2c2   : > { %v1189_v18 = vmul.f32 %v5546_v10, %v5546_v10  ;;  %v1181_v20 = vmul.f32 0.03125, %v1170_v47  ;;  %v1298_v22 = vmul.f32 %v1236_v17, %v1202_v16  ;;  %v1205_v15 = vsub.f32 %v5505_v57, %v5546_v10 }
 0x2c3   : > { %v1240_v23 = vmul.f32 0.5, %v1239_v37 }
 0x2c4   : > { %v1197_v24 = vsub.f32 %v1181_v20, %v1189_v18  ;;  %v1307_v25 = vmul.f32 %v5529_v34, %v1298_v22 }
 0x2c5   : > { %v1241_v26 = vsub.f32 1.5, %v1240_v23 }
 0x2c6   : > { %v4500_v61 = vpop.eup %4499  ;;  %v1213_v55 = vadd.f32 1e-05, %v1197_v24  ;;  %v1316_v29 = vadd.f32 %v5537_v36, %v1307_v25 }
 0x2c7   : > { %v1242_v30 = vmul.f32 %v4498_v13, %v1241_v26  ;;  %v1248_v51 = vmul.f32 %v4500_v61, %v1212_v40  ;;  %v1140_v28 = vpop.xlane.xlu2 %1139  ;;  %vm1254_vm11 = vweird.f32 %v4500_v61 }
 0x2c8   : > { %4501 = vrsqrt.f32 %v1213_v55  ;;  %v5553_v35 = vmul.f32 0.03125, %v1140_v28  ;;  %vm1324_vm10 = vcmp.ge.f32.partialorder %v1316_v29, 0.0  ;;  %v1332_v31 = vmul.f32 0.01, %v1316_v29  ;;  %vm1255_vm13 = vmor %vm1253_vm12, %vm1254_vm11 }
 0x2c9   : > { %v1249_v38 = vmul.f32 %v4500_v61, %v1248_v51  ;;  %v1172_v39 = vpop.xlane.xlu0 %1171  ;;  %v1246_v42 = vsel %vm1245_vm9, %v4498_v13, %v1242_v30  ;;  %vm1263_vm0 = vweird.f32 %v1213_v55 }
 0x2ca   : > { %v1190_v43 = vmul.f32 %v5553_v35, %v5553_v35  ;;  %v1182_v44 = vmul.f32 0.03125, %v1172_v39  ;;  %v1299_v49 = vmul.f32 %v1246_v42, %v1203_v27  ;;  %v1340_v52 = vsel %vm1324_vm10, %v1316_v29, %v1332_v31 }
 0x2cb   : > { %v1250_v50 = vmul.f32 0.5, %v1249_v38  ;;  %1385 = vmatmul.f32.gmra.mxu1 %v1340_v52  ;;  %v1206_v10 = vsub.f32 %v5511_v4, %v5553_v35 }
 0x2cc   : > { %v1198_v53 = vsub.f32 %v1182_v44, %v1190_v43  ;;  %v1308_v2 = vmul.f32 %v5529_v34, %v1299_v49 }
 0x2cd   : > { %v1251_v45 = vsub.f32 1.5, %v1250_v50 }
 0x2ce   : > { %v4502_v54 = vpop.eup %4501  ;;  %v1214_v11 = vadd.f32 1e-05, %v1198_v53  ;;  %v1317_v60 = vadd.f32 %v5537_v36, %v1308_v2 }
 0x2cf   : > { %v1252_v12 = vmul.f32 %v4500_v61, %v1251_v45  ;;  %v1258_v62 = vmul.f32 %v4502_v54, %v1213_v55  ;;  %v1142_v46 = vpop.xlane.xlu1 %1141  ;;  %vm1264_vm15 = vweird.f32 %v4502_v54 }
 0x2d0   : > { %4503 = vrsqrt.f32 %v1214_v11  ;;  %v5561_v58 = vmul.f32 0.03125, %v1142_v46  ;;  %vm1325_vm14 = vcmp.ge.f32.partialorder %v1317_v60, 0.0  ;;  %v1333_v48 = vmul.f32 0.01, %v1317_v60  ;;  %vm1265_vm1 = vmor %vm1263_vm0, %vm1264_vm15 }
 0x2d1   : > { %v1259_v63 = vmul.f32 %v4502_v54, %v1258_v62  ;;  %v1174_v0 = vpop.xlane.xlu2 %1173  ;;  %v1256_v3 = vsel %vm1255_vm13, %v4500_v61, %v1252_v12  ;;  %vm1273_vm4 = vweird.f32 %v1214_v11 }
 0x2d2   : > { %v1191_v1 = vmul.f32 %v5561_v58, %v5561_v58  ;;  %v1183_v6 = vmul.f32 0.03125, %v1174_v0  ;;  %v1300_v7 = vmul.f32 %v1256_v3, %v1204_v56  ;;  %v1341_v32 = vsel %vm1325_vm14, %v1317_v60, %v1333_v48  ;;  %v5582_v56 = vld [vmem:[%s6934_s3 + $0x2] ss:$0 sm:$0xff] }
 0x2d3   : > { %v1260_v19 = vmul.f32 0.5, %v1259_v63  ;;  %1388 = vmatmul.f32.gmra.mxu1 %v1341_v32  ;;  %v1207_v4 = vsub.f32 %v5517_v59, %v5561_v58 }
 0x2d4   : > { %v1199_v8 = vsub.f32 %v1183_v6, %v1191_v1  ;;  %v1309_v21 = vmul.f32 %v5529_v34, %v1300_v7 }
 0x2d5   : > { %v1261_v5 = vsub.f32 1.5, %v1260_v19 }
 0x2d6   : > { %v4504_v9 = vpop.eup %4503  ;;  %v1215_v13 = vadd.f32 1e-05, %v1199_v8  ;;  %v1318_v40 = vadd.f32 %v5537_v36, %v1309_v21 }
 0x2d7   : > { %v1262_v41 = vmul.f32 %v4502_v54, %v1261_v5  ;;  %v1268_v14 = vmul.f32 %v4504_v9, %v1214_v11  ;;  %vm1274_vm3 = vweird.f32 %v4504_v9 }
 0x2d8   : > { %4505 = vrsqrt.f32 %v1215_v13  ;;  %vm1326_vm2 = vcmp.ge.f32.partialorder %v1318_v40, 0.0  ;;  %v1334_v16 = vmul.f32 0.01, %v1318_v40  ;;  %vm1275_vm5 = vmor %vm1273_vm4, %vm1274_vm3  ;;  %vm1283_vm8 = vweird.f32 %v1215_v13 }
 0x2d9   : > { %v1269_v37 = vmul.f32 %v4504_v9, %v1268_v14  ;;  %v1266_v47 = vsel %vm1265_vm1, %v4502_v54, %v1262_v41 }
 0x2da   : > { %v1342_v17 = vsel %vm1326_vm2, %v1318_v40, %v1334_v16  ;;  %v1301_v18 = vmul.f32 %v1266_v47, %v1205_v15 }
 0x2db   : > { %v1270_v20 = vmul.f32 0.5, %v1269_v37  ;;  %1391 = vmatmul.f32.gmra.mxu1 %v1342_v17 }
 0x2dc   : > { %v1310_v22 = vmul.f32 %v5529_v34, %v1301_v18  ;;  %v1672_v18 = vld [vmem:[#allocation9 + $0x168] sm:$0xff] }
 0x2dd   : > { %v1271_v23 = vsub.f32 1.5, %v1270_v20  ;;  %v1673_v20 = vld [vmem:[#allocation9 + $0x170] sm:$0xff]  ;;  %1683 = vmatpush.msra.mxu2 %v1672_v18  ;;  %v5658_v18 = vld [vmem:[#allocation10 + $0x78] sm:$0xff] }
 0x2de   : > { %v4506_v24 = vpop.eup %4505  ;;  %v1319_v25 = vadd.f32 %v5537_v36, %v1310_v22  ;;  %v1674_v22 = vld [vmem:[#allocation9 + $0x178] sm:$0xff]  ;;  %1724 = vmatpush.msra.mxu3 %v1673_v20 }
 0x2df   : > { %v1272_v26 = vmul.f32 %v4504_v9, %v1271_v23  ;;  %v1278_v57 = vmul.f32 %v4506_v24, %v1215_v13  ;;  %vm1284_vm7 = vweird.f32 %v4506_v24  ;;  %1765 = vmatpush.msrb.mxu0 %v1674_v22  ;;  %v1669_v23 = vld [vmem:[#allocation9 + $0x150] sm:$0xff]  ;;  %v1630_v22 = vld [vmem:[#allocation9 + $0x18] sm:$0xff] }
 0x2e0   : > { %vm1327_vm6 = vcmp.ge.f32.partialorder %v1319_v25, 0.0  ;;  %v1335_v61 = vmul.f32 0.01, %v1319_v25  ;;  %vm1285_vm9 = vmor %vm1283_vm8, %vm1284_vm7  ;;  %1684 = vmatpush.msra.mxu2 %v1669_v23  ;;  %v1631_v23 = vld [vmem:[#allocation9 + $0x20] sm:$0xff] }
 0x2e1   : > { %v1279_v55 = vmul.f32 %v4506_v24, %v1278_v57  ;;  %v1276_v29 = vsel %vm1275_vm5, %v4504_v9, %v1272_v26  ;;  %v1666_v26 = vld [vmem:[#allocation9 + $0x138] sm:$0xff]  ;;  %v1667_v57 = vld [vmem:[#allocation9 + $0x140] sm:$0xff] }
 0x2e2   : > { %v1343_v30 = vsel %vm1327_vm6, %v1319_v25, %v1335_v61  ;;  %v1302_v51 = vmul.f32 %v1276_v29, %v1206_v10  ;;  %v1671_v25 = vld [vmem:[#allocation9 + $0x160] sm:$0xff]  ;;  %v1668_v10 = vld [vmem:[#allocation9 + $0x148] sm:$0xff]  ;;  %1685 = vmatpush.msra.mxu2 %v1666_v26 }
 0x2e3   : > { %v1280_v28 = vmul.f32 0.5, %v1279_v55  ;;  %1394 = vmatmul.f32.gmra.mxu1 %v1343_v30  ;;  %1766 = vmatpush.msrb.mxu0 %v1671_v25  ;;  %v1663_v29 = vld [vmem:[#allocation9 + $0x120] sm:$0xff]  ;;  %v1664_v30 = vld [vmem:[#allocation9 + $0x128] sm:$0xff] }
 0x2e4   : > { %v1311_v27 = vmul.f32 %v5529_v34, %v1302_v51  ;;  %v1665_v51 = vld [vmem:[#allocation9 + $0x130] sm:$0xff]  ;;  %1686 = vmatpush.msra.mxu2 %v1663_v29  ;;  %v1632_v25 = vld [vmem:[#allocation9 + $0x28] sm:$0xff]  ;;  %v5661_v26 = vld [vmem:[#allocation10 + $0x60] sm:$0xff] }
 0x2e5   : > { %v1281_v38 = vsub.f32 1.5, %v1280_v28  ;;  %1767 = vmatpush.msrb.mxu0 %v1668_v10  ;;  %v5620_v28 = vld [vmem:[#allocation10 + $0x168] sm:$0xff]  ;;  %v1627_v10 = vld [vmem:[#allocation9] sm:$0xff] }
 0x2e6   : > { %v1320_v39 = vadd.f32 %v5537_v36, %v1311_v27  ;;  %1892 = vmatpush.msrb.mxu1 %v5620_v28 }
 0x2e7   : > { %v1282_v31 = vmul.f32 %v4506_v24, %v1281_v38  ;;  %1768 = vmatpush.msrb.mxu0 %v1665_v51  ;;  %v1660_v38 = vld [vmem:[#allocation9 + $0x108] sm:$0xff]  ;;  %v1629_v51 = vld [vmem:[#allocation9 + $0x10] sm:$0xff] }
 0x2e8   : > { %vm1328_vm10 = vcmp.ge.f32.partialorder %v1320_v39, 0.0  ;;  %v1336_v35 = vmul.f32 0.01, %v1320_v39  ;;  %1687 = vmatpush.msra.mxu2 %v1660_v38 }
 0x2e9   : > { %v1286_v42 = vsel %vm1285_vm9, %v4506_v24, %v1282_v31  ;;  %v1670_v24 = vld [vmem:[#allocation9 + $0x158] sm:$0xff] }
 0x2ea   : > { %v1344_v43 = vsel %vm1328_vm10, %v1320_v39, %v1336_v35  ;;  %v1303_v44 = vmul.f32 %v1286_v42, %v1207_v4  ;;  %1725 = vmatpush.msra.mxu3 %v1670_v24  ;;  %v1661_v39 = vld [vmem:[#allocation9 + $0x110] sm:$0xff]  ;;  %v1662_v31 = vld [vmem:[#allocation9 + $0x118] sm:$0xff] }
 0x2eb   : > { %1397 = vmatmul.f32.gmra.mxu1 %v1344_v43  ;;  %v5626_v4 = vld [vmem:[#allocation10 + $0x150] sm:$0xff]  ;;  %v1658_v42 = vld [vmem:[#allocation9 + $0xf8] sm:$0xff]  ;;  %v1659_v43 = vld [vmem:[#allocation9 + $0x100] sm:$0xff]  ;;  %1769 = vmatpush.msrb.mxu0 %v1662_v31 }
 0x2ec   : > { %v1312_v49 = vmul.f32 %v5529_v34, %v1303_v44  ;;  %1726 = vmatpush.msra.mxu3 %v1667_v57  ;;  %v1657_v35 = vld [vmem:[#allocation9 + $0xf0] sm:$0xff]  ;;  %1893 = vmatpush.msrb.mxu1 %v5626_v4  ;;  %v5629_v44 = vld [vmem:[#allocation10 + $0x138] sm:$0xff] }
 0x2ed   : > { %1688 = vmatpush.msra.mxu2 %v1657_v35  ;;  %1770 = vmatpush.msrb.mxu0 %v1659_v43  ;;  %v1839_v35 = vld [vmem:[#allocation10 + $0x18] sm:$0xff]  ;;  %v5038_v43 = vmov 0.0  }
 0x2ee   : > { %v1321_v50 = vadd.f32 %v5537_v36, %v1312_v49  ;;  %1727 = vmatpush.msra.mxu3 %v1664_v30  ;;  %v1654_v49 = vld [vmem:[#allocation9 + $0xd8] sm:$0xff]  ;;  %1894 = vmatpush.msrb.mxu1 %v5629_v44 }
 0x2ef   : > { %1689 = vmatpush.msra.mxu2 %v1654_v49 }
 0x2f0   : > { %vm1329_vm11 = vcmp.ge.f32.partialorder %v1321_v50, 0.0  ;;  %v1337_v52 = vmul.f32 0.01, %v1321_v50  ;;  %1728 = vmatpush.msra.mxu3 %v1661_v39  ;;  %v1842_v39 = vld [vmem:[#allocation10 + $0x30] sm:$0xff] }
 0x2f2   : > { %v1345_v53 = vsel %vm1329_vm11, %v1321_v50, %v1337_v52  ;;  %1729 = vmatpush.msra.mxu3 %v1658_v42  ;;  %v1655_v50 = vld [vmem:[#allocation9 + $0xe0] sm:$0xff]  ;;  %v1656_v52 = vld [vmem:[#allocation9 + $0xe8] sm:$0xff] }
 0x2f3   : > { %1400 = vmatmul.f32.gmra.mxu1 %v1345_v53  ;;  %1771 = vmatpush.msrb.mxu0 %v1656_v52  ;;  %v1836_v42 = vld [vmem:[#allocation10] sm:$0xff] }
 0x2f4   : > { %1730 = vmatpush.msra.mxu3 %v1655_v50 }
 0x2f7   : > { %v1144_v2 = vpop.xlane.xlu0 %1143 }
 0x2f8   : > { %v1152_v45 = vmul.f32 0.03125, %v1144_v2  ;;  %v5632_v2 = vld [vmem:[#allocation10 + $0x120] sm:$0xff] }
 0x2f9   : > { %v1176_v54 = vpop.xlane.xlu1 %1175  ;;  %1895 = vmatpush.msrb.mxu1 %v5632_v2 }
 0x2fa   : > { %v1192_v11 = vmul.f32 %v1152_v45, %v1152_v45  ;;  %v1184_v59 = vmul.f32 0.03125, %v1176_v54  ;;  %v1208_v7 = vsub.f32 %v5524_v33, %v1152_v45  ;;  %v1651_v54 = vld [vmem:[#allocation9 + $0xc0] sm:$0xff] }
 0x2fb   : > { %1690 = vmatpush.msra.mxu2 %v1651_v54 }
 0x2fc   : > { %v1200_v60 = vsub.f32 %v1184_v59, %v1192_v11  ;;  %v1652_v11 = vld [vmem:[#allocation9 + $0xc8] sm:$0xff]  ;;  %v1653_v59 = vld [vmem:[#allocation9 + $0xd0] sm:$0xff] }
 0x2fd   : > { %1731 = vmatpush.msra.mxu3 %v1652_v11  ;;  %1772 = vmatpush.msrb.mxu0 %v1653_v59 }
 0x2fe   : > { %v1216_v12 = vadd.f32 1e-05, %v1200_v60  ;;  %v5638_v60 = vld [vmem:[#allocation10 + $0x108] sm:$0xff] }
 0x2ff   : > { %1896 = vmatpush.msrb.mxu1 %v5638_v60 }
 0x300   : > { %4507 = vrsqrt.f32 %v1216_v12  ;;  %vm1293_vm13 = vweird.f32 %v1216_v12 }
 0x306   : > { %v4508_v62 = vpop.eup %4507 }
 0x307   : > { %v1288_v46 = vmul.f32 %v4508_v62, %v1216_v12  ;;  %vm1294_vm12 = vweird.f32 %v4508_v62 }
 0x308   : > { %vm1295_vm14 = vmor %vm1293_vm13, %vm1294_vm12 }
 0x309   : > { %v1289_v58 = vmul.f32 %v4508_v62, %v1288_v46  ;;  %v1383_v63 = vpop.f32.mrf.mxu1  ;;  %v1649_v46 = vld [vmem:[#allocation9 + $0xb0] sm:$0xff] }
 0x30a   : > { %v5585_v48 = vadd.f32 %v5582_v56, %v1383_v63  ;;  %v5643_v63 = vld [vmem:[#allocation10 + $0xf0] sm:$0xff]  ;;  %1732 = vmatpush.msra.mxu3 %v1649_v46 }
 0x30b   : > { %v1290_v0 = vmul.f32 0.5, %v1289_v58  ;;  %v1650_v58 = vld [vmem:[#allocation9 + $0xb8] sm:$0xff]  ;;  %1897 = vmatpush.msrb.mxu1 %v5643_v63 }
 0x30c   : > { %1409 = vadd.xlane.f32.xlu2 %v5585_v48  ;;  %v1433_v1 = vmul.f32 %v5585_v48, %v5585_v48  ;;  %1773 = vmatpush.msrb.mxu0 %v1650_v58 }
 0x30d   : > { %v1291_v3 = vsub.f32 1.5, %v1290_v0  ;;  %v1645_v0 = vld [vmem:[#allocation9 + $0x90] sm:$0xff] }
 0x30e   : > { %1441 = vadd.xlane.f32.xlu0 %v1433_v1  ;;  %v1647_v1 = vld [vmem:[#allocation9 + $0xa0] sm:$0xff] }
 0x30f   : > { %v1292_v6 = vmul.f32 %v4508_v62, %v1291_v3  ;;  %v1646_v3 = vld [vmem:[#allocation9 + $0x98] sm:$0xff]  ;;  %1774 = vmatpush.msrb.mxu0 %v1647_v1 }
 0x310   : > { %1733 = vmatpush.msra.mxu3 %v1646_v3 }
 0x311   : > { %v1296_v19 = vsel %vm1295_vm14, %v4508_v62, %v1292_v6  ;;  %v1648_v62 = vld [vmem:[#allocation9 + $0xa8] sm:$0xff]  ;;  %v5646_v6 = vld [vmem:[#allocation10 + $0xd8] sm:$0xff] }
 0x312   : > { %v1304_v32 = vmul.f32 %v1296_v19, %v1208_v7  ;;  %1691 = vmatpush.msra.mxu2 %v1648_v62  ;;  %v1642_v7 = vld [vmem:[#allocation9 + $0x78] sm:$0xff]  ;;  %v1643_v19 = vld [vmem:[#allocation9 + $0x80] sm:$0xff]  ;;  %1898 = vmatpush.msrb.mxu1 %v5646_v6 }
 0x313   : > { %1734 = vmatpush.msra.mxu3 %v1643_v19 }
 0x314   : > { %v1313_v8 = vmul.f32 %v5529_v34, %v1304_v32  ;;  %1692 = vmatpush.msra.mxu2 %v1645_v0  ;;  %v1644_v32 = vld [vmem:[#allocation9 + $0x88] sm:$0xff] }
 0x315   : > { %1775 = vmatpush.msrb.mxu0 %v1644_v32 }
 0x316   : > { %v1322_v21 = vadd.f32 %v5537_v36, %v1313_v8  ;;  %v5649_v8 = vld [vmem:[#allocation10 + $0xc0] sm:$0xff]  ;;  %1693 = vmatpush.msra.mxu2 %v1642_v7 }
 0x317   : > { %1899 = vmatpush.msrb.mxu1 %v5649_v8 }
 0x318   : > { %vm1330_vm15 = vcmp.ge.f32.partialorder %v1322_v21, 0.0  ;;  %v1338_v5 = vmul.f32 0.01, %v1322_v21 }
 0x31a   : > { %v1346_v9 = vsel %vm1330_vm15, %v1322_v21, %v1338_v5  ;;  %v1639_v21 = vld [vmem:[#allocation9 + $0x60] sm:$0xff]  ;;  %v1640_v5 = vld [vmem:[#allocation9 + $0x68] sm:$0xff] }
 0x31b   : > { %1403 = vmatmul.f32.gmra.mxu1 %v1346_v9  ;;  %v1641_v9 = vld [vmem:[#allocation9 + $0x70] sm:$0xff]  ;;  %1694 = vmatpush.msra.mxu2 %v1639_v21 }
 0x31c   : > { %1735 = vmatpush.msra.mxu3 %v1640_v5  ;;  %1776 = vmatpush.msrb.mxu0 %v1641_v9 }
 0x348   : > { %v1386_v13 = vpop.f32.mrf.mxu1 }
 0x349   : > { %v5594_v40 = vadd.f32 %v5582_v56, %v1386_v13  ;;  %v5652_v13 = vld [vmem:[#allocation10 + $0xa8] sm:$0xff] }
 0x34a   : > { %1900 = vmatpush.msrb.mxu1 %v5652_v13 }
 0x34b   : > { %1411 = vadd.xlane.f32.xlu1 %v5594_v40  ;;  %v1434_v33 = vmul.f32 %v5594_v40, %v5594_v40 }
 0x34d   : > { %1443 = vadd.xlane.f32.xlu2 %v1434_v33  ;;  %v1636_v33 = vld [vmem:[#allocation9 + $0x48] sm:$0xff] }
 0x34e   : > { %1695 = vmatpush.msra.mxu2 %v1636_v33 }
 0x350   : > { %v1389_v41 = vpop.f32.mrf.mxu1 }
 0x351   : > { %v5600_v14 = vadd.f32 %v5582_v56, %v1389_v41  ;;  %v1637_v41 = vld [vmem:[#allocation9 + $0x50] sm:$0xff] }
 0x352   : > { %1736 = vmatpush.msra.mxu3 %v1637_v41 }
 0x353   : > { %1413 = vadd.xlane.f32.xlu0 %v5600_v14  ;;  %v1435_v34 = vmul.f32 %v5600_v14, %v5600_v14 }
 0x355   : > { %1445 = vadd.xlane.f32.xlu1 %v1435_v34  ;;  %v1638_v34 = vld [vmem:[#allocation9 + $0x58] sm:$0xff] }
 0x356   : > { %1777 = vmatpush.msrb.mxu0 %v1638_v34 }
 0x358   : > { %v1392_v36 = vpop.f32.mrf.mxu1 }
 0x359   : > { %v5606_v15 = vadd.f32 %v5582_v56, %v1392_v36  ;;  %v5655_v36 = vld [vmem:[#allocation10 + $0x90] sm:$0xff] }
 0x35a   : > { %1901 = vmatpush.msrb.mxu1 %v5655_v36 }
 0x35b   : > { %1415 = vadd.xlane.f32.xlu2 %v5606_v15  ;;  %v1436_v16 = vmul.f32 %v5606_v15, %v5606_v15 }
 0x35c   : > { %1902 = vmatpush.msrb.mxu1 %v5658_v18 }
 0x35d   : > { %1447 = vadd.xlane.f32.xlu0 %v1436_v16  ;;  %v1633_v16 = vld [vmem:[#allocation9 + $0x30] sm:$0xff] }
 0x35e   : > { %1696 = vmatpush.msra.mxu2 %v1633_v16  ;;  %1903 = vmatpush.msrb.mxu1 %v5661_v26 }
 0x360   : > { %v1395_v37 = vpop.f32.mrf.mxu1  ;;  %1697 = vmatpush.msra.mxu2 %v1630_v22 }
 0x361   : > { %v5612_v47 = vadd.f32 %v5582_v56, %v1395_v37  ;;  %v1634_v37 = vld [vmem:[#allocation9 + $0x38] sm:$0xff] }
 0x362   : > { %1737 = vmatpush.msra.mxu3 %v1634_v37  ;;  %1698 = vmatpush.msra.mxu2 %v1627_v10 }
 0x363   : > { %1417 = vadd.xlane.f32.xlu1 %v5612_v47  ;;  %v1437_v17 = vmul.f32 %v5612_v47, %v5612_v47 }
 0x364   : > { %1738 = vmatpush.msra.mxu3 %v1631_v23 }
 0x365   : > { %1449 = vadd.xlane.f32.xlu2 %v1437_v17  ;;  %v1635_v17 = vld [vmem:[#allocation9 + $0x40] sm:$0xff] }
 0x366   : > { %1778 = vmatpush.msrb.mxu0 %v1635_v17 }
 0x368   : > { %v1398_v61 = vpop.f32.mrf.mxu1  ;;  %1779 = vmatpush.msrb.mxu0 %v1632_v25 }
 0x369   : > { %v5618_v55 = vadd.f32 %v5582_v56, %v1398_v61  ;;  %v1628_v61 = vld [vmem:[#allocation9 + $0x8] sm:$0xff] }
 0x36a   : > { %1739 = vmatpush.msra.mxu3 %v1628_v61  ;;  %1780 = vmatpush.msrb.mxu0 %v1629_v51 }
 0x36b   : > { %1419 = vadd.xlane.f32.xlu0 %v5618_v55  ;;  %v1438_v27 = vmul.f32 %v5618_v55, %v5618_v55 }
 0x36d   : > { %1451 = vadd.xlane.f32.xlu1 %v1438_v27  ;;  %v1845_v27 = vld [vmem:[#allocation10 + $0x48] sm:$0xff] }
 0x36e   : > { %1904 = vmatpush.msrb.mxu1 %v1845_v27 }
 0x370   : > { %v1401_v53 = vpop.f32.mrf.mxu1  ;;  %1905 = vmatpush.msrb.mxu1 %v1842_v39 }
 0x371   : > { %v5635_v45 = vadd.f32 %v5582_v56, %v1401_v53 }
 0x372   : > { %1906 = vmatpush.msrb.mxu1 %v1839_v35 }
 0x373   : > { %1421 = vadd.xlane.f32.xlu2 %v5635_v45  ;;  %v1439_v12 = vmul.f32 %v5635_v45, %v5635_v45 }
 0x374   : > { %1907 = vmatpush.msrb.mxu1 %v1836_v42 }
 0x375   : > { %1453 = vadd.xlane.f32.xlu0 %v1439_v12  ;;  %1908 = vmatmul.f32.vlgmr.msrb.gmra.mxu1 %v5038_v43 }
 0x376   : > { %2031 = vmatpush.msra.mxu1 %v5620_v28 }
 0x378   : > { %2032 = vmatpush.msra.mxu1 %v5626_v4 }
 0x37a   : > { %2033 = vmatpush.msra.mxu1 %v5629_v44  ;;  %v5679_v44 = vld [vmem:[%s6935_s4 + $0x2] ss:$0 sm:$0xff] }
 0x37c   : > { %2034 = vmatpush.msra.mxu1 %v5632_v2 }
 0x37e   : > { %2035 = vmatpush.msra.mxu1 %v5638_v60 }
 0x37f   : > { %v1410_v20 = vpop.xlane.xlu2 %1409 }
 0x380   : > { %v1425_v24 = vmul.f32 0.03125, %v1410_v20  ;;  %2036 = vmatpush.msra.mxu1 %v5643_v63 }
 0x381   : > { %v1442_v57 = vpop.xlane.xlu0 %1441 }
 0x382   : > { %v1465_v29 = vmul.f32 %v1425_v24, %v1425_v24  ;;  %v1457_v30 = vmul.f32 0.03125, %v1442_v57  ;;  %v1481_v28 = vsub.f32 %v5585_v48, %v1425_v24  ;;  %2037 = vmatpush.msra.mxu1 %v5646_v6  ;;  %v5688_v48 = vld [vmem:[%s6936_s5 + $0x2] ss:$0 sm:$0xff] }
 0x384   : > { %v1473_v38 = vsub.f32 %v1457_v30, %v1465_v29  ;;  %2038 = vmatpush.msra.mxu1 %v5649_v8 }
 0x386   : > { %v1489_v31 = vadd.f32 1e-05, %v1473_v38  ;;  %2039 = vmatpush.msra.mxu1 %v5652_v13 }
 0x388   : > { %4509 = vrsqrt.f32 %v1489_v31  ;;  %vm1503_vm1 = vweird.f32 %v1489_v31  ;;  %2040 = vmatpush.msra.mxu1 %v5655_v36 }
 0x38a   : > { %2041 = vmatpush.msra.mxu1 %v5658_v18 }
 0x38c   : > { %2042 = vmatpush.msra.mxu1 %v5661_v26 }
 0x38e   : > { %v4510_v49 = vpop.eup %4509  ;;  %2043 = vmatpush.msra.mxu1 %v1845_v27 }
 0x38f   : > { %v1498_v50 = vmul.f32 %v4510_v49, %v1489_v31  ;;  %vm1504_vm0 = vweird.f32 %v4510_v49 }
 0x390   : > { %vm1505_vm2 = vmor %vm1503_vm1, %vm1504_vm0  ;;  %2044 = vmatpush.msra.mxu1 %v1842_v39 }
 0x391   : > { %v1499_v52 = vmul.f32 %v4510_v49, %v1498_v50 }
 0x392   : > { %2045 = vmatpush.msra.mxu1 %v1839_v35 }
 0x393   : > { %v1500_v53 = vmul.f32 0.5, %v1499_v52 }
 0x394   : > { %2046 = vmatpush.msra.mxu1 %v1836_v42 }
 0x395   : > { %v1501_v54 = vsub.f32 1.5, %v1500_v53 }
 0x397   : > { %v1502_v11 = vmul.f32 %v4510_v49, %v1501_v54 }
 0x398   : > { %v1404_v59 = vpop.f32.mrf.mxu1 }
 0x399   : > { %v5674_v4 = vadd.f32 %v5582_v56, %v1404_v59  ;;  %v1506_v2 = vsel %vm1505_vm2, %v4510_v49, %v1502_v11 }
 0x39a   : > { %v1577_v12 = vmul.f32 %v1506_v2, %v1481_v28 }
 0x39b   : > { %1423 = vadd.xlane.f32.xlu1 %v5674_v4  ;;  %v1440_v60 = vmul.f32 %v5674_v4, %v5674_v4 }
 0x39c   : > { %v1586_v56 = vmul.f32 %v5679_v44, %v1577_v12 }
 0x39d   : > { %1455 = vadd.xlane.f32.xlu2 %v1440_v60 }
 0x39e   : > { %v1595_v62 = vadd.f32 %v5688_v48, %v1586_v56 }
 0x3a0   : > { %vm1603_vm3 = vcmp.ge.f32.partialorder %v1595_v62, 0.0  ;;  %v1611_v46 = vmul.f32 0.01, %v1595_v62 }
 0x3a2   : > { %v1619_v58 = vsel %vm1603_vm3, %v1595_v62, %v1611_v46 }
 0x3a3   : > { %1699 = vmatmul.f32.vlgmr.msra.gmra.mxu2 %v1619_v58  ;;  %1740 = vmatmul.f32.vlgmr.msra.gmra.mxu3 %v1619_v58 }
 0x3a4   : > { %1781 = vmatmul.f32.vlgmr.msrb.gmra.mxu0 %v1619_v58 }
 0x3be   : > { %v1412_v63 = vpop.xlane.xlu1 %1411 }
 0x3bf   : > { %v1426_v0 = vmul.f32 0.03125, %v1412_v63  ;;  %v5722_v63 = vld [vmem:[#allocation10 + $0x170] sm:$0xff] }
 0x3c0   : > { %v1444_v3 = vpop.xlane.xlu2 %1443  ;;  %1912 = vmatpush.msrb.mxu2 %v5722_v63  ;;  %2190 = vmatpush.msrb.mxu1 %v5722_v63 }
 0x3c1   : > { %v1466_v1 = vmul.f32 %v1426_v0, %v1426_v0  ;;  %v1458_v6 = vmul.f32 0.03125, %v1444_v3  ;;  %v1482_v30 = vsub.f32 %v5594_v40, %v1426_v0  ;;  %v5724_v0 = vld [vmem:[#allocation10 + $0x178] sm:$0xff] }
 0x3c2   : > { %1932 = vmatpush.msrb.mxu3 %v5724_v0 }
 0x3c3   : > { %v1474_v7 = vsub.f32 %v1458_v6, %v1466_v1  ;;  %v5730_v6 = vld [vmem:[#allocation10 + $0x158] sm:$0xff] }
 0x3c4   : > { %1913 = vmatpush.msrb.mxu2 %v5730_v6  ;;  %2191 = vmatpush.msrb.mxu1 %v5730_v6 }
 0x3c5   : > { %v1490_v19 = vadd.f32 1e-05, %v1474_v7 }
 0x3c6   : > { %v1414_v32 = vpop.xlane.xlu0 %1413 }
 0x3c7   : > { %4511 = vrsqrt.f32 %v1490_v19  ;;  %v1427_v21 = vmul.f32 0.03125, %v1414_v32  ;;  %vm1513_vm5 = vweird.f32 %v1490_v19  ;;  %v5732_v32 = vld [vmem:[#allocation10 + $0x160] sm:$0xff] }
 0x3c8   : > { %v1446_v5 = vpop.xlane.xlu1 %1445  ;;  %1933 = vmatpush.msrb.mxu3 %v5732_v32 }
 0x3c9   : > { %v1467_v9 = vmul.f32 %v1427_v21, %v1427_v21  ;;  %v1459_v13 = vmul.f32 0.03125, %v1446_v5  ;;  %v1483_v60 = vsub.f32 %v5600_v14, %v1427_v21 }
 0x3cb   : > { %v1475_v33 = vsub.f32 %v1459_v13, %v1467_v9  ;;  %v5738_v13 = vld [vmem:[#allocation10 + $0x140] sm:$0xff] }
 0x3cc   : > { %1914 = vmatpush.msrb.mxu2 %v5738_v13  ;;  %2192 = vmatpush.msrb.mxu1 %v5738_v13 }
 0x3cd   : > { %v4512_v41 = vpop.eup %4511  ;;  %v1491_v34 = vadd.f32 1e-05, %v1475_v33  ;;  %v5740_v33 = vld [vmem:[#allocation10 + $0x148] sm:$0xff] }
 0x3ce   : > { %v1508_v36 = vmul.f32 %v4512_v41, %v1490_v19  ;;  %v1416_v16 = vpop.xlane.xlu2 %1415  ;;  %vm1514_vm4 = vweird.f32 %v4512_v41  ;;  %1934 = vmatpush.msrb.mxu3 %v5740_v33 }
 0x3cf   : > { %4513 = vrsqrt.f32 %v1491_v34  ;;  %v5697_v37 = vmul.f32 0.03125, %v1416_v16  ;;  %vm1515_vm6 = vmor %vm1513_vm5, %vm1514_vm4  ;;  %vm1523_vm8 = vweird.f32 %v1491_v34  ;;  %v5746_v16 = vld [vmem:[#allocation10 + $0x128] sm:$0xff] }
 0x3d0   : > { %v1509_v17 = vmul.f32 %v4512_v41, %v1508_v36  ;;  %v1448_v18 = vpop.xlane.xlu0 %1447  ;;  %1915 = vmatpush.msrb.mxu2 %v5746_v16  ;;  %2193 = vmatpush.msrb.mxu1 %v5746_v16 }
 0x3d1   : > { %v1468_v20 = vmul.f32 %v5697_v37, %v5697_v37  ;;  %v1460_v22 = vmul.f32 0.03125, %v1448_v18 }
 0x3d2   : > { %v1510_v23 = vmul.f32 0.5, %v1509_v17 }
 0x3d3   : > { %v1476_v24 = vsub.f32 %v1460_v22, %v1468_v20  ;;  %v5753_v22 = vld [vmem:[#allocation10 + $0x130] sm:$0xff] }
 0x3d4   : > { %v1511_v25 = vsub.f32 1.5, %v1510_v23  ;;  %v1484_v23 = vsub.f32 %v5606_v15, %v5697_v37  ;;  %1935 = vmatpush.msrb.mxu3 %v5753_v22 }
 0x3d5   : > { %v4514_v26 = vpop.eup %4513  ;;  %v5701_v57 = vadd.f32 1e-05, %v1476_v24 }
 0x3d6   : > { %v1512_v10 = vmul.f32 %v4512_v41, %v1511_v25  ;;  %v1518_v61 = vmul.f32 %v4514_v26, %v1491_v34  ;;  %v1418_v29 = vpop.xlane.xlu1 %1417  ;;  %vm1524_vm7 = vweird.f32 %v4514_v26 }
 0x3d7   : > { %4515 = vrsqrt.f32 %v5701_v57  ;;  %v5705_v51 = vmul.f32 0.03125, %v1418_v29  ;;  %vm1525_vm9 = vmor %vm1523_vm8, %vm1524_vm7  ;;  %vm1533_vm12 = vweird.f32 %v5701_v57 }
 0x3d8   : > { %v1516_v27 = vsel %vm1515_vm6, %v4512_v41, %v1512_v10  ;;  %v1519_v38 = vmul.f32 %v4514_v26, %v1518_v61  ;;  %v1450_v39 = vpop.xlane.xlu2 %1449 }
 0x3d9   : > { %v1469_v31 = vmul.f32 %v5705_v51, %v5705_v51  ;;  %v1461_v35 = vmul.f32 0.03125, %v1450_v39  ;;  %v1578_v42 = vmul.f32 %v1516_v27, %v1482_v30 }
 0x3da   : > { %v1520_v49 = vmul.f32 0.5, %v1519_v38 }
 0x3db   : > { %v1477_v50 = vsub.f32 %v1461_v35, %v1469_v31  ;;  %v1587_v52 = vmul.f32 %v5679_v44, %v1578_v42  ;;  %v5771_v31 = vld [vmem:[#allocation10 + $0x110] sm:$0xff]  ;;  %v5773_v35 = vld [vmem:[#allocation10 + $0x118] sm:$0xff] }
 0x3dc   : > { %v1521_v53 = vsub.f32 1.5, %v1520_v49  ;;  %v5775_v42 = vld [vmem:[#allocation10 + $0xf8] sm:$0xff]  ;;  %1916 = vmatpush.msrb.mxu2 %v5771_v31  ;;  %1936 = vmatpush.msrb.mxu3 %v5773_v35 }
 0x3dd   : > { %v5710_v40 = vpop.eup %4515  ;;  %v5712_v54 = vadd.f32 1e-05, %v1477_v50  ;;  %v1596_v11 = vadd.f32 %v5688_v48, %v1587_v52  ;;  %2194 = vmatpush.msrb.mxu1 %v5771_v31 }
 0x3de   : > { %v1522_v59 = vmul.f32 %v4514_v26, %v1521_v53  ;;  %v1528_v28 = vmul.f32 %v5710_v40, %v5701_v57  ;;  %v1420_v2 = vpop.xlane.xlu0 %1419  ;;  %vm1534_vm11 = vweird.f32 %v5710_v40  ;;  %1917 = vmatpush.msrb.mxu2 %v5775_v42 }
 0x3df   : > { %4517 = vrsqrt.f32 %v5712_v54  ;;  %v5719_v12 = vmul.f32 0.03125, %v1420_v2  ;;  %vm1604_vm10 = vcmp.ge.f32.partialorder %v1596_v11, 0.0  ;;  %v1612_v58 = vmul.f32 0.01, %v1596_v11  ;;  %vm1535_vm13 = vmor %vm1533_vm12, %vm1534_vm11  ;;  %2195 = vmatpush.msrb.mxu1 %v5775_v42 }
 0x3e0   : > { %v1526_v56 = vsel %vm1525_vm9, %v4514_v26, %v1522_v59  ;;  %v1529_v62 = vmul.f32 %v5710_v40, %v1528_v28  ;;  %v1452_v46 = vpop.xlane.xlu1 %1451  ;;  %vm1543_vm0 = vweird.f32 %v5712_v54 }
 0x3e1   : > { %v1470_v3 = vmul.f32 %v5719_v12, %v5719_v12  ;;  %v1462_v1 = vmul.f32 0.03125, %v1452_v46  ;;  %v1579_v14 = vmul.f32 %v1526_v56, %v1483_v60  ;;  %v1620_v19 = vsel %vm1604_vm10, %v1596_v11, %v1612_v58  ;;  %v5787_v60 = vld [vmem:[#allocation10 + $0x100] sm:$0xff] }
 0x3e2   : > { %v1530_v7 = vmul.f32 0.5, %v1529_v62  ;;  %1702 = vmatmul.f32.gmra.mxu2 %v1620_v19  ;;  %1743 = vmatmul.f32.gmra.mxu3 %v1620_v19  ;;  %v1485_v11 = vsub.f32 %v5612_v47, %v5705_v51 }
 0x3e3   : > { %v1478_v21 = vsub.f32 %v1462_v1, %v1470_v3  ;;  %v1588_v5 = vmul.f32 %v5679_v44, %v1579_v14  ;;  %1784 = vmatmul.f32.gmra.mxu0 %v1620_v19  ;;  %1937 = vmatpush.msrb.mxu3 %v5787_v60  ;;  %v1486_v14 = vsub.f32 %v5618_v55, %v5719_v12 }
 0x3e4   : > { %v1531_v9 = vsub.f32 1.5, %v1530_v7 }
 0x3e5   : > { %v4518_v41 = vpop.eup %4517  ;;  %v5742_v34 = vadd.f32 1e-05, %v1478_v21  ;;  %v1597_v36 = vadd.f32 %v5688_v48, %v1588_v5 }
 0x3e6   : > { %v1532_v17 = vmul.f32 %v5710_v40, %v1531_v9  ;;  %v1538_v18 = vmul.f32 %v4518_v41, %v5712_v54  ;;  %v1422_v20 = vpop.xlane.xlu2 %1421  ;;  %vm1544_vm15 = vweird.f32 %v4518_v41 }
 0x3e7   : > { %4519 = vrsqrt.f32 %v5742_v34  ;;  %v5760_v24 = vmul.f32 0.03125, %v1422_v20  ;;  %vm1605_vm14 = vcmp.ge.f32.partialorder %v1597_v36, 0.0  ;;  %v1613_v10 = vmul.f32 0.01, %v1597_v36  ;;  %vm1545_vm1 = vmor %vm1543_vm0, %vm1544_vm15 }
 0x3e8   : > { %v1536_v25 = vsel %vm1535_vm13, %v5710_v40, %v1532_v17  ;;  %v1539_v26 = vmul.f32 %v4518_v41, %v1538_v18  ;;  %v1454_v57 = vpop.xlane.xlu0 %1453  ;;  %vm1553_vm4 = vweird.f32 %v5742_v34 }
 0x3e9   : > { %v1471_v15 = vmul.f32 %v5760_v24, %v5760_v24  ;;  %v1463_v37 = vmul.f32 0.03125, %v1454_v57  ;;  %v1580_v61 = vmul.f32 %v1536_v25, %v1484_v23  ;;  %v1621_v30 = vsel %vm1605_vm14, %v1597_v36, %v1613_v10 }
 0x3ea   : > { %v1540_v29 = vmul.f32 0.5, %v1539_v26  ;;  %1705 = vmatmul.f32.gmra.mxu2 %v1621_v30  ;;  %1746 = vmatmul.f32.gmra.mxu3 %v1621_v30  ;;  %v1487_v55 = vsub.f32 %v5635_v45, %v5760_v24  ;;  %v5806_v45 = vld [vmem:[#allocation10 + $0xc8] sm:$0xff]  ;;  %v5810_v24 = vld [vmem:[#allocation10 + $0xd0] sm:$0xff] }
 0x3eb   : > { %v1479_v27 = vsub.f32 %v1463_v37, %v1471_v15  ;;  %v1589_v38 = vmul.f32 %v5679_v44, %v1580_v61  ;;  %1787 = vmatmul.f32.gmra.mxu0 %v1621_v30  ;;  %v5802_v15 = vld [vmem:[#allocation10 + $0xe0] sm:$0xff]  ;;  %v5804_v37 = vld [vmem:[#allocation10 + $0xe8] sm:$0xff]  ;;  %v5817_v30 = vld [vmem:[#allocation10 + $0xb8] sm:$0xff] }
 0x3ec   : > { %v1541_v39 = vsub.f32 1.5, %v1540_v29  ;;  %1918 = vmatpush.msrb.mxu2 %v5802_v15  ;;  %1938 = vmatpush.msrb.mxu3 %v5804_v37  ;;  %v5812_v29 = vld [vmem:[#allocation10 + $0xb0] sm:$0xff] }
 0x3ed   : > { %v4520_v49 = vpop.eup %4519  ;;  %v1495_v50 = vadd.f32 1e-05, %v1479_v27  ;;  %v1598_v52 = vadd.f32 %v5688_v48, %v1589_v38  ;;  %2196 = vmatpush.msrb.mxu1 %v5802_v15  ;;  %v5819_v27 = vld [vmem:[#allocation10 + $0x98] sm:$0xff]  ;;  %v5822_v38 = vld [vmem:[#allocation10 + $0xa0] sm:$0xff] }
 0x3ee   : > { %v1542_v53 = vmul.f32 %v4518_v41, %v1541_v39  ;;  %v1548_v40 = vmul.f32 %v4520_v49, %v5742_v34  ;;  %vm1554_vm3 = vweird.f32 %v4520_v49  ;;  %1919 = vmatpush.msrb.mxu2 %v5806_v45  ;;  %1939 = vmatpush.msrb.mxu3 %v5810_v24 }
 0x3ef   : > { %4521 = vrsqrt.f32 %v1495_v50  ;;  %vm1606_vm2 = vcmp.ge.f32.partialorder %v1598_v52, 0.0  ;;  %v1614_v59 = vmul.f32 0.01, %v1598_v52  ;;  %vm1555_vm5 = vmor %vm1553_vm4, %vm1554_vm3  ;;  %vm1563_vm8 = vweird.f32 %v1495_v50  ;;  %2197 = vmatpush.msrb.mxu1 %v5806_v45 }
 0x3f0   : > { %v1546_v28 = vsel %vm1545_vm1, %v4518_v41, %v1542_v53  ;;  %v1549_v2 = vmul.f32 %v4520_v49, %v1548_v40  ;;  %1920 = vmatpush.msrb.mxu2 %v5812_v29  ;;  %1940 = vmatpush.msrb.mxu3 %v5817_v30  ;;  %v5834_v40 = vld [vmem:[#allocation10 + $0x68] sm:$0xff] }
 0x3f1   : > { %v1622_v54 = vsel %vm1606_vm2, %v1598_v52, %v1614_v59  ;;  %v1581_v56 = vmul.f32 %v1546_v28, %v1485_v11  ;;  %v5831_v52 = vld [vmem:[#allocation10 + $0x88] sm:$0xff]  ;;  %2198 = vmatpush.msrb.mxu1 %v5812_v29  ;;  %v5840_v28 = vld [vmem:[#allocation10 + $0x70] sm:$0xff] }
 0x3f2   : > { %v1550_v62 = vmul.f32 0.5, %v1549_v2  ;;  %1708 = vmatmul.f32.gmra.mxu2 %v1622_v54  ;;  %1749 = vmatmul.f32.gmra.mxu3 %v1622_v54  ;;  %v5843_v2 = vld [vmem:[#allocation10 + $0x50] sm:$0xff] }
 0x3f3   : > { %v1590_v47 = vmul.f32 %v5679_v44, %v1581_v56  ;;  %1790 = vmatmul.f32.gmra.mxu0 %v1622_v54  ;;  %1921 = vmatpush.msrb.mxu2 %v5819_v27  ;;  %v5847_v56 = vld [vmem:[#allocation10 + $0x58] sm:$0xff] }
 0x3f4   : > { %v1551_v51 = vsub.f32 1.5, %v1550_v62  ;;  %1941 = vmatpush.msrb.mxu3 %v5822_v38  ;;  %2199 = vmatpush.msrb.mxu1 %v5819_v27  ;;  %v5850_v62 = vld [vmem:[#allocation10 + $0x38] sm:$0xff] }
 0x3f5   : > { %v4522_v46 = vpop.eup %4521  ;;  %v1599_v58 = vadd.f32 %v5688_v48, %v1590_v47 }
 0x3f6   : > { %v1552_v3 = vmul.f32 %v4520_v49, %v1551_v51  ;;  %v1558_v1 = vmul.f32 %v4522_v46, %v1495_v50  ;;  %vm1564_vm7 = vweird.f32 %v4522_v46  ;;  %1942 = vmatpush.msrb.mxu3 %v5831_v52  ;;  %v5854_v51 = vld [vmem:[#allocation10 + $0x40] sm:$0xff] }
 0x3f7   : > { %vm1607_vm6 = vcmp.ge.f32.partialorder %v1599_v58, 0.0  ;;  %v1615_v7 = vmul.f32 0.01, %v1599_v58  ;;  %vm1565_vm9 = vmor %vm1563_vm8, %vm1564_vm7 }
 0x3f8   : > { %v1556_v19 = vsel %vm1555_vm5, %v4520_v49, %v1552_v3  ;;  %v1559_v21 = vmul.f32 %v4522_v46, %v1558_v1  ;;  %v5825_v49 = vld [vmem:[#allocation10 + $0x80] sm:$0xff]  ;;  %1943 = vmatpush.msrb.mxu3 %v5840_v28  ;;  %v5864_v3 = vld [vmem:[#allocation10 + $0x8] sm:$0xff]  ;;  %v5868_v1 = vld [vmem:[#allocation10 + $0x10] sm:$0xff] }
 0x3f9   : > { %v1623_v5 = vsel %vm1607_vm6, %v1599_v58, %v1615_v7  ;;  %v1582_v9 = vmul.f32 %v1556_v19, %v1486_v14  ;;  %1922 = vmatpush.msrb.mxu2 %v5825_v49  ;;  %2200 = vmatpush.msrb.mxu1 %v5825_v49  ;;  %v5861_v58 = vld [vmem:[#allocation10 + $0x28] sm:$0xff] }
 0x3fa   : > { %v1560_v41 = vmul.f32 0.5, %v1559_v21  ;;  %1711 = vmatmul.f32.gmra.mxu2 %v1623_v5  ;;  %1752 = vmatmul.f32.gmra.mxu3 %v1623_v5 }
 0x3fb   : > { %v1591_v36 = vmul.f32 %v5679_v44, %v1582_v9  ;;  %1793 = vmatmul.f32.gmra.mxu0 %v1623_v5  ;;  %1923 = vmatpush.msrb.mxu2 %v5834_v40 }
 0x3fc   : > { %v1561_v17 = vsub.f32 1.5, %v1560_v41  ;;  %1944 = vmatpush.msrb.mxu3 %v5847_v56  ;;  %2201 = vmatpush.msrb.mxu1 %v5834_v40 }
 0x3fd   : > { %v1600_v34 = vadd.f32 %v5688_v48, %v1591_v36  ;;  %1924 = vmatpush.msrb.mxu2 %v5843_v2 }
 0x3fe   : > { %v1562_v18 = vmul.f32 %v4522_v46, %v1561_v17  ;;  %1945 = vmatpush.msrb.mxu3 %v5854_v51  ;;  %2202 = vmatpush.msrb.mxu1 %v5843_v2 }
 0x3ff   : > { %vm1608_vm10 = vcmp.ge.f32.partialorder %v1600_v34, 0.0  ;;  %v1616_v12 = vmul.f32 0.01, %v1600_v34  ;;  %1925 = vmatpush.msrb.mxu2 %v5850_v62 }
 0x400   : > { %v1566_v20 = vsel %vm1565_vm9, %v4522_v46, %v1562_v18  ;;  %v5857_v46 = vld [vmem:[#allocation10 + $0x20] sm:$0xff]  ;;  %1946 = vmatpush.msrb.mxu3 %v5861_v58  ;;  %2203 = vmatpush.msrb.mxu1 %v5850_v62 }
 0x401   : > { %v1624_v23 = vsel %vm1608_vm10, %v1600_v34, %v1616_v12  ;;  %v1583_v25 = vmul.f32 %v1566_v20, %v1487_v55  ;;  %1926 = vmatpush.msrb.mxu2 %v5857_v46 }
 0x402   : > { %1714 = vmatmul.f32.gmra.mxu2 %v1624_v23  ;;  %1755 = vmatmul.f32.gmra.mxu3 %v1624_v23 }
 0x403   : > { %v1592_v26 = vmul.f32 %v5679_v44, %v1583_v25  ;;  %1796 = vmatmul.f32.gmra.mxu0 %v1624_v23  ;;  %1927 = vmatpush.msrb.mxu2 %v5864_v3 }
 0x404   : > { %1947 = vmatpush.msrb.mxu3 %v5868_v1  ;;  %2204 = vmatpush.msrb.mxu1 %v5857_v46 }
 0x405   : > { %v1601_v57 = vadd.f32 %v5688_v48, %v1592_v26  ;;  %2051 = vmatpush.msra.mxu2 %v5722_v63 }
 0x406   : > { %2071 = vmatpush.msra.mxu3 %v5724_v0  ;;  %2205 = vmatpush.msrb.mxu1 %v5864_v3 }
 0x407   : > { %vm1609_vm11 = vcmp.ge.f32.partialorder %v1601_v57, 0.0  ;;  %v1617_v10 = vmul.f32 0.01, %v1601_v57  ;;  %2052 = vmatpush.msra.mxu2 %v5730_v6 }
 0x408   : > { %2072 = vmatpush.msra.mxu3 %v5732_v32 }
 0x409   : > { %v1625_v61 = vsel %vm1609_vm11, %v1601_v57, %v1617_v10  ;;  %2053 = vmatpush.msra.mxu2 %v5738_v13 }
 0x40a   : > { %1717 = vmatmul.f32.gmra.mxu2 %v1625_v61  ;;  %1758 = vmatmul.f32.gmra.mxu3 %v1625_v61 }
 0x40b   : > { %1799 = vmatmul.f32.gmra.mxu0 %v1625_v61  ;;  %2073 = vmatpush.msra.mxu3 %v5740_v33  ;;  %v1884_v61 = vld [vmem:[#allocation13] sm:$0x7] }
 0x40c   : > { %2054 = vmatpush.msra.mxu2 %v5746_v16 }
 0x40d   : > { %2074 = vmatpush.msra.mxu3 %v5753_v22 }
 0x40e   : > { %v1424_v39 = vpop.xlane.xlu1 %1423  ;;  %2055 = vmatpush.msra.mxu2 %v5771_v31 }
 0x40f   : > { %v5828_v50 = vmul.f32 0.03125, %v1424_v39  ;;  %2075 = vmatpush.msra.mxu3 %v5773_v35  ;;  %v1675_v39 = vld [vmem:[#allocation12] sm:$0x7] }
 0x410   : > { %v1456_v53 = vpop.xlane.xlu2 %1455  ;;  %2056 = vmatpush.msra.mxu2 %v5775_v42 }
 0x411   : > { %v1472_v11 = vmul.f32 %v5828_v50, %v5828_v50  ;;  %v1464_v59 = vmul.f32 0.03125, %v1456_v53  ;;  %v1488_v41 = vsub.f32 %v5674_v4, %v5828_v50  ;;  %2076 = vmatpush.msra.mxu3 %v5787_v60  ;;  %v5946_v50 = vperm.slane %v1675_v39, 0 }
 0x412   : > { %2057 = vmatpush.msra.mxu2 %v5802_v15  ;;  %v1886_v53 = vperm.slane %v1884_v61, 0 }
 0x413   : > { %v1480_v54 = vsub.f32 %v1464_v59, %v1472_v11  ;;  %2077 = vmatpush.msra.mxu3 %v5804_v37  ;;  %v1909_v11 = vpop.f32.mrf.mxu1 }
 0x414   : > { %2058 = vmatpush.msra.mxu2 %v5806_v45 }
 0x415   : > { %v1496_v47 = vadd.f32 1e-05, %v1480_v54  ;;  %2078 = vmatpush.msra.mxu3 %v5810_v24 }
 0x416   : > { %2059 = vmatpush.msra.mxu2 %v5812_v29 }
 0x417   : > { %4523 = vrsqrt.f32 %v1496_v47  ;;  %vm1573_vm13 = vweird.f32 %v1496_v47  ;;  %2079 = vmatpush.msra.mxu3 %v5817_v30 }
 0x418   : > { %2060 = vmatpush.msra.mxu2 %v5819_v27 }
 0x419   : > { %2080 = vmatpush.msra.mxu3 %v5822_v38 }
 0x41a   : > { %2061 = vmatpush.msra.mxu2 %v5825_v49 }
 0x41b   : > { %2081 = vmatpush.msra.mxu3 %v5831_v52 }
 0x41c   : > { %2062 = vmatpush.msra.mxu2 %v5834_v40 }
 0x41d   : > { %v4524_v14 = vpop.eup %4523  ;;  %2082 = vmatpush.msra.mxu3 %v5840_v28 }
 0x41e   : > { %v1568_v7 = vmul.f32 %v4524_v14, %v1496_v47  ;;  %vm1574_vm12 = vweird.f32 %v4524_v14  ;;  %2063 = vmatpush.msra.mxu2 %v5843_v2 }
 0x41f   : > { %vm1575_vm14 = vmor %vm1573_vm13, %vm1574_vm12  ;;  %2083 = vmatpush.msra.mxu3 %v5847_v56 }
 0x420   : > { %v1569_v19 = vmul.f32 %v4524_v14, %v1568_v7  ;;  %2064 = vmatpush.msra.mxu2 %v5850_v62 }
 0x421   : > { %2084 = vmatpush.msra.mxu3 %v5854_v51 }
 0x422   : > { %v1570_v21 = vmul.f32 0.5, %v1569_v19  ;;  %2065 = vmatpush.msra.mxu2 %v5857_v46 }
 0x423   : > { %2085 = vmatpush.msra.mxu3 %v5861_v58 }
 0x424   : > { %v1571_v5 = vsub.f32 1.5, %v1570_v21  ;;  %2066 = vmatpush.msra.mxu2 %v5864_v3 }
 0x425   : > { %2086 = vmatpush.msra.mxu3 %v5868_v1 }
 0x426   : > { %v1572_v9 = vmul.f32 %v4524_v14, %v1571_v5 }
 0x428   : > { %v1576_v36 = vsel %vm1575_vm14, %v4524_v14, %v1572_v9  ;;  %v1910_v14 = vadd.f32 %v1909_v11, %v1886_v53  ;;  %v5957_v9 = vld [vmem:[#allocation10 + $0x168] sm:$0xff]  ;;  %v1888_v53 = vperm.slane %v1884_v61, 2 }
 0x429   : > { %v1584_v17 = vmul.f32 %v1576_v36, %v1488_v41  ;;  %v5959_v41 = vld [vmem:[#allocation10 + $0x150] sm:$0xff]  ;;  %2170 = vmatpush.msra.mxu0 %v5957_v9 }
 0x42b   : > { %v1593_v34 = vmul.f32 %v5679_v44, %v1584_v17  ;;  %v1741_v44 = vpop.f32.mrf.mxu3  ;;  %2171 = vmatpush.msra.mxu0 %v5959_v41 }
 0x42d   : > { %v1602_v18 = vadd.f32 %v5688_v48, %v1593_v34  ;;  %v5967_v34 = vld [vmem:[#allocation10 + $0x138] sm:$0xff] }
 0x42e   : > { %2172 = vmatpush.msra.mxu0 %v5967_v34 }
 0x42f   : > { %vm1610_vm15 = vcmp.ge.f32.partialorder %v1602_v18, 0.0  ;;  %v1618_v4 = vmul.f32 0.01, %v1602_v18 }
 0x431   : > { %v1626_v55 = vsel %vm1610_vm15, %v1602_v18, %v1618_v4  ;;  %v5971_v4 = vld [vmem:[#allocation10 + $0x120] sm:$0xff] }
 0x432   : > { %1720 = vmatmul.f32.gmra.mxu2 %v1626_v55  ;;  %1761 = vmatmul.f32.gmra.mxu3 %v1626_v55 }
 0x433   : > { %1802 = vmatmul.f32.gmra.mxu0 %v1626_v55  ;;  %v5975_v55 = vperm.slane %v1675_v39, 1 }
 0x434   : > { %2173 = vmatpush.msra.mxu0 %v5971_v4 }
 0x43a   : > { %1928 = vmatmul.f32.vlgmr.msrb.gmra.mxu2 %v5038_v43  ;;  %1948 = vmatmul.f32.vlgmr.msrb.gmra.mxu3 %v5038_v43  ;;  %v1700_v43 = vpop.f32.mrf.mxu2 }
 0x43b   : > { %2210 = vmatpush.msrb.mxu2 %v5724_v0  ;;  %v1701_v47 = vadd.f32 %v1700_v43, %v5946_v50  ;;  %2309 = vmatpush.msrb.mxu3 %v5957_v9  ;;  %v1887_v43 = vperm.slane %v1884_v61, 1  ;;  %v1742_v61 = vadd.f32 %v1741_v44, %v5975_v55 }
 0x43d   : > { %2211 = vmatpush.msrb.mxu2 %v5732_v32  ;;  %v1958_v7 = vadd.f32 %v1910_v14, %v1701_v47  ;;  %2310 = vmatpush.msrb.mxu3 %v5959_v41  ;;  %v5977_v47 = vld [vmem:[#allocation10 + $0x108] sm:$0xff]  ;;  %v5981_v14 = vperm.slane %v1675_v39, 2 }
 0x43e   : > { %2174 = vmatpush.msra.mxu0 %v5977_v47 }
 0x43f   : > { %2212 = vmatpush.msrb.mxu2 %v5740_v33  ;;  %v1959_v19 = vmul.f32 0.5, %v1958_v7  ;;  %2311 = vmatpush.msrb.mxu3 %v5967_v34  ;;  %v1782_v7 = vpop.f32.mrf.mxu0 }
 0x440   : > { %v1783_v39 = vadd.f32 %v1782_v7, %v5981_v14 }
 0x441   : > { %2213 = vmatpush.msrb.mxu2 %v5753_v22  ;;  %4525 = vtanh.f32 %v1959_v19  ;;  %2312 = vmatpush.msrb.mxu3 %v5971_v4  ;;  %v5983_v19 = vld [vmem:[#allocation10 + $0xf0] sm:$0xff] }
 0x442   : > { %2175 = vmatpush.msra.mxu0 %v5983_v19 }
 0x443   : > { %2214 = vmatpush.msrb.mxu2 %v5773_v35  ;;  %2313 = vmatpush.msrb.mxu3 %v5977_v47 }
 0x445   : > { %2215 = vmatpush.msrb.mxu2 %v5787_v60  ;;  %2314 = vmatpush.msrb.mxu3 %v5983_v19 }
 0x447   : > { %2216 = vmatpush.msrb.mxu2 %v5804_v37  ;;  %v4526_v18 = vpop.eup %4525 }
 0x448   : > { %v1961_v11 = vmul.f32 0.5, %v4526_v18 }
 0x449   : > { %2217 = vmatpush.msrb.mxu2 %v5810_v24 }
 0x44b   : > { %2218 = vmatpush.msrb.mxu2 %v5817_v30 }
 0x44d   : > { %2219 = vmatpush.msrb.mxu2 %v5822_v38 }
 0x44f   : > { %2220 = vmatpush.msrb.mxu2 %v5831_v52 }
 0x451   : > { %2221 = vmatpush.msrb.mxu2 %v5840_v28 }
 0x453   : > { %2222 = vmatpush.msrb.mxu2 %v5847_v56 }
 0x455   : > { %2223 = vmatpush.msrb.mxu2 %v5854_v51 }
 0x457   : > { %2224 = vmatpush.msrb.mxu2 %v5861_v58 }
 0x459   : > { %2225 = vmatpush.msrb.mxu2 %v5868_v1 }
 0x465   : > { %v5930_v48 = vpop.f32.mrf.mxu2  ;;  %v5932_v12 = vpop.f32.mrf.mxu3 }
 0x46d   : > { %v5934_v20 = vpop.f32.mrf.mxu2  ;;  %v5936_v23 = vpop.f32.mrf.mxu3 }
 0x475   : > { %v5938_v25 = vpop.f32.mrf.mxu2  ;;  %v5940_v26 = vpop.f32.mrf.mxu3 }
 0x476   : > { %6990 = vst [vmem:[#allocation35_spill] sm:$0xff] %v5938_v25 }
 0x477   : > { %6991 = vst [vmem:[#allocation36_spill] sm:$0xff] %v5940_v26 }
 0x47d   : > { %v5942_v57 = vpop.f32.mrf.mxu2  ;;  %v5944_v10 = vpop.f32.mrf.mxu3 }
 0x47e   : > { %6992 = vst [vmem:[#allocation37_spill] sm:$0xff] %v5942_v57 }
 0x47f   : > { %6993 = vst [vmem:[#allocation38_spill] sm:$0xff] %v5944_v10 }
 0x485   : > { %v5948_v59 = vpop.f32.mrf.mxu2  ;;  %v5950_v54 = vpop.f32.mrf.mxu3 }
 0x486   : > { %6994 = vst [vmem:[#allocation39_spill] sm:$0xff] %v5948_v59 }
 0x487   : > { %6995 = vst [vmem:[#allocation40_spill] sm:$0xff] %v5950_v54  ;;  %v5988_v54 = vld [vmem:[#allocation10 + $0xd8] sm:$0xff] }
 0x488   : > { %2176 = vmatpush.msra.mxu0 %v5988_v54  ;;  %2315 = vmatpush.msrb.mxu3 %v5988_v54 }
 0x48a   : > { %2177 = vmatpush.msra.mxu0 %v5649_v8  ;;  %v6024_v8 = vld [vmem:[#allocation10 + $0xa8] sm:$0xff] }
 0x48c   : > { %2178 = vmatpush.msra.mxu0 %v6024_v8 }
 0x48d   : > { %v5953_v21 = vpop.f32.mrf.mxu2  ;;  %v5955_v5 = vpop.f32.mrf.mxu3 }
 0x48e   : > { %6996 = vst [vmem:[#allocation41_spill] sm:$0xff] %v5953_v21  ;;  %v1962_v21 = vadd.f32 0.5, %v1961_v11 }
 0x48f   : > { %6997 = vst [vmem:[#allocation42_spill] sm:$0xff] %v5955_v5 }
 0x4b5   : > { %v5961_v36 = vpop.f32.mrf.mxu2  ;;  %v5963_v17 = vpop.f32.mrf.mxu3 }
 0x4b6   : > { %6998 = vst [vmem:[#allocation43_spill] sm:$0xff] %v5961_v36 }
 0x4b7   : > { %6999 = vst [vmem:[#allocation44_spill] sm:$0xff] %v5963_v17 }
 0x4bd   : > { %v1929_v17 = vpop.f32.mrf.mxu2  ;;  %v1949_v36 = vpop.f32.mrf.mxu3 }
 0x4be   : > { %v1930_v18 = vadd.f32 %v1929_v17, %v1887_v43  ;;  %v1950_v5 = vadd.f32 %v1949_v36, %v1888_v53 }
 0x4c0   : > { %v1963_v59 = vadd.f32 %v1930_v18, %v1742_v61  ;;  %v1968_v10 = vmul.f32 %v1962_v21, %v1950_v5 }
 0x4c2   : > { %v1964_v57 = vmul.f32 0.5, %v1963_v59  ;;  %v1969_v26 = vadd.f32 %v1968_v10, %v1783_v39 }
 0x4c4   : > { %4527 = vtanh.f32 %v1964_v57 }
 0x4c5   : > { %4529 = vtanh.f32 %v1969_v26  ;;  %v1745_v26 = vadd.f32 %v5932_v12, %v5975_v55 }
 0x4ca   : > { %v4528_v44 = vpop.eup %4527 }
 0x4cb   : > { %v4530_v36 = vpop.eup %4529  ;;  %v1966_v17 = vmul.f32 0.5, %v4528_v44 }
 0x4cc   : > { %v1971_v53 = vsub.f32 0.0, %v4530_v36 }
 0x4cd   : > { %v1967_v43 = vadd.f32 0.5, %v1966_v17 }
 0x4cf   : > { %v1972_v11 = vmul.f32 %v1971_v53, %v1967_v43 }
 0x4d1   : > { %v5996_v25 = vadd.f32 %v4530_v36, %v1972_v11 }
 0x4d3   : > { %2047 = vmatmul.f32.vlgmr.msra.gmra.mxu1 %v5996_v25  ;;  %2067 = vmatmul.f32.vlgmr.msra.gmra.mxu2 %v5996_v25 }
 0x4d4   : > { %2087 = vmatmul.f32.vlgmr.msra.gmra.mxu3 %v5996_v25  ;;  %2349 = vmatpush.msra.mxu1 %v5724_v0  ;;  %v6027_v0 = vld [vmem:[#allocation10 + $0x90] sm:$0xff] }
 0x4d5   : > { %2448 = vmatpush.msra.mxu2 %v5957_v9  ;;  %2179 = vmatpush.msra.mxu0 %v6027_v0 }
 0x4d6   : > { %2350 = vmatpush.msra.mxu1 %v5732_v32  ;;  %v2023_v32 = vld [vmem:[#allocation13] sm:$0x7] }
 0x4d7   : > { %2449 = vmatpush.msra.mxu2 %v5959_v41  ;;  %v2027_v59 = vperm.slane %v2023_v32, 2 }
 0x4d8   : > { %2351 = vmatpush.msra.mxu1 %v5740_v33  ;;  %v6030_v33 = vld [vmem:[#allocation10 + $0x78] sm:$0xff] }
 0x4d9   : > { %2450 = vmatpush.msra.mxu2 %v5967_v34  ;;  %2180 = vmatpush.msra.mxu0 %v6030_v33 }
 0x4da   : > { %2352 = vmatpush.msra.mxu1 %v5753_v22  ;;  %v6033_v22 = vld [vmem:[#allocation10 + $0x60] sm:$0xff] }
 0x4db   : > { %2451 = vmatpush.msra.mxu2 %v5971_v4  ;;  %2181 = vmatpush.msra.mxu0 %v6033_v22 }
 0x4dc   : > { %2353 = vmatpush.msra.mxu1 %v5773_v35  ;;  %v2025_v35 = vperm.slane %v2023_v32, 0 }
 0x4dd   : > { %2452 = vmatpush.msra.mxu2 %v5977_v47 }
 0x4de   : > { %2354 = vmatpush.msra.mxu1 %v5787_v60  ;;  %v6036_v60 = vld [vmem:[#allocation10 + $0x48] sm:$0xff] }
 0x4df   : > { %2453 = vmatpush.msra.mxu2 %v5983_v19  ;;  %2182 = vmatpush.msra.mxu0 %v6036_v60 }
 0x4e0   : > { %2355 = vmatpush.msra.mxu1 %v5804_v37  ;;  %v6038_v37 = vld [vmem:[#allocation10 + $0x30] sm:$0xff] }
 0x4e1   : > { %2454 = vmatpush.msra.mxu2 %v5988_v54  ;;  %2183 = vmatpush.msra.mxu0 %v6038_v37 }
 0x4e2   : > { %2356 = vmatpush.msra.mxu1 %v5810_v24 }
 0x4e4   : > { %2357 = vmatpush.msra.mxu1 %v5817_v30  ;;  %v6041_v30 = vld [vmem:[#allocation10 + $0x18] sm:$0xff] }
 0x4e5   : > { %2184 = vmatpush.msra.mxu0 %v6041_v30 }
 0x4e6   : > { %2358 = vmatpush.msra.mxu1 %v5822_v38  ;;  %v1704_v38 = vadd.f32 %v5930_v48, %v5946_v50 }
 0x4e8   : > { %2359 = vmatpush.msra.mxu1 %v5831_v52 }
 0x4ea   : > { %2360 = vmatpush.msra.mxu1 %v5840_v28  ;;  %v6046_v28 = vld [vmem:[#allocation10] sm:$0xff] }
 0x4eb   : > { %2185 = vmatpush.msra.mxu0 %v6046_v28 }
 0x4ec   : > { %2361 = vmatpush.msra.mxu1 %v5847_v56 }
 0x4ed   : > { %2329 = vmatpush.msrb.mxu0 %v5722_v63  ;;  %v1785_v63 = vpop.f32.mrf.mxu0 }
 0x4ee   : > { %2362 = vmatpush.msra.mxu1 %v5854_v51  ;;  %v2026_v51 = vperm.slane %v2023_v32, 1 }
 0x4ef   : > { %2330 = vmatpush.msrb.mxu0 %v5730_v6  ;;  %v1786_v6 = vadd.f32 %v1785_v63, %v5981_v14  ;;  %v6172_v63 = vld [vmem:[#allocation10 + $0x100] sm:$0xff] }
 0x4f0   : > { %2363 = vmatpush.msra.mxu1 %v5861_v58 }
 0x4f1   : > { %2331 = vmatpush.msrb.mxu0 %v5738_v13 }
 0x4f2   : > { %2364 = vmatpush.msra.mxu1 %v5868_v1 }
 0x4f3   : > { %2332 = vmatpush.msrb.mxu0 %v5746_v16 }
 0x4f5   : > { %2333 = vmatpush.msrb.mxu0 %v5771_v31 }
 0x4f7   : > { %2334 = vmatpush.msrb.mxu0 %v5775_v42 }
 0x4f9   : > { %2335 = vmatpush.msrb.mxu0 %v5802_v15 }
 0x4fb   : > { %2336 = vmatpush.msrb.mxu0 %v5806_v45 }
 0x4fd   : > { %2337 = vmatpush.msrb.mxu0 %v5812_v29  ;;  %v1788_v29 = vpop.f32.mrf.mxu0 }
 0x4ff   : > { %2338 = vmatpush.msrb.mxu0 %v5819_v27 }
 0x501   : > { %2339 = vmatpush.msrb.mxu0 %v5825_v49 }
 0x503   : > { %2340 = vmatpush.msrb.mxu0 %v5834_v40 }
 0x505   : > { %2341 = vmatpush.msrb.mxu0 %v5843_v2  ;;  %v6082_v27 = vpop.f32.mrf.mxu0 }
 0x507   : > { %2342 = vmatpush.msrb.mxu0 %v5850_v62  ;;  %v6090_v62 = vld [vmem:[#allocation10 + $0xc0] sm:$0xff] }
 0x508   : > { %2316 = vmatpush.msrb.mxu3 %v6090_v62  ;;  %2455 = vmatpush.msra.mxu2 %v6090_v62 }
 0x509   : > { %2343 = vmatpush.msrb.mxu0 %v5857_v46 }
 0x50a   : > { %2317 = vmatpush.msrb.mxu3 %v6024_v8  ;;  %2456 = vmatpush.msra.mxu2 %v6024_v8 }
 0x50b   : > { %2344 = vmatpush.msrb.mxu0 %v5864_v3  ;;  %v2162_v3 = vld [vmem:[#allocation13] sm:$0x7] }
 0x50c   : > { %2318 = vmatpush.msrb.mxu3 %v6027_v0  ;;  %2457 = vmatpush.msra.mxu2 %v6027_v0  ;;  %v2166_v11 = vperm.slane %v2162_v3, 2 }
 0x50d   : > { %v6084_v49 = vpop.f32.mrf.mxu0 }
 0x50e   : > { %2319 = vmatpush.msrb.mxu3 %v6030_v33  ;;  %2458 = vmatpush.msra.mxu2 %v6030_v33 }
 0x510   : > { %2320 = vmatpush.msrb.mxu3 %v6033_v22  ;;  %2459 = vmatpush.msra.mxu2 %v6033_v22 }
 0x512   : > { %2321 = vmatpush.msrb.mxu3 %v6036_v60  ;;  %2460 = vmatpush.msra.mxu2 %v6036_v60 }
 0x514   : > { %2322 = vmatpush.msrb.mxu3 %v6038_v37  ;;  %2461 = vmatpush.msra.mxu2 %v6038_v37 }
 0x515   : > { %v6086_v40 = vpop.f32.mrf.mxu0 }
 0x516   : > { %2323 = vmatpush.msrb.mxu3 %v6041_v30  ;;  %2462 = vmatpush.msra.mxu2 %v6041_v30 }
 0x518   : > { %2324 = vmatpush.msrb.mxu3 %v6046_v28  ;;  %2463 = vmatpush.msra.mxu2 %v6046_v28 }
 0x51d   : > { %v6088_v2 = vpop.f32.mrf.mxu0 }
 0x525   : > { %v6097_v46 = vpop.f32.mrf.mxu0 }
 0x526   : > { %7000 = vst [vmem:[#allocation45_spill] sm:$0xff] %v6097_v46 }
 0x550   : > { %v2048_v24 = vpop.f32.mrf.mxu1 }
 0x551   : > { %v2049_v52 = vadd.f32 %v2048_v24, %v2025_v35  ;;  %v1789_v35 = vadd.f32 %v1788_v29, %v5981_v14  ;;  %v6216_v29 = vld [vmem:[#allocation10 + $0x70] sm:$0xff] }
 0x553   : > { %v2097_v56 = vadd.f32 %v2049_v52, %v1704_v38 }
 0x555   : > { %v2098_v58 = vmul.f32 0.5, %v2097_v56 }
 0x556   : > { %v2068_v1 = vpop.f32.mrf.mxu2 }
 0x557   : > { %4531 = vtanh.f32 %v2098_v58  ;;  %v2069_v48 = vadd.f32 %v2068_v1, %v2026_v51  ;;  %v2088_v5 = vpop.f32.mrf.mxu3  ;;  %v6132_v51 = vld [vmem:[#allocation10 + $0x170] sm:$0xff]  ;;  %v6134_v58 = vld [vmem:[#allocation10 + $0x178] sm:$0xff] }
 0x558   : > { %v2089_v61 = vadd.f32 %v2088_v5, %v2027_v59  ;;  %2468 = vmatpush.msra.mxu3 %v6132_v51  ;;  %v6138_v1 = vld [vmem:[#allocation10 + $0x158] sm:$0xff]  ;;  %v6156_v59 = vld [vmem:[#allocation10 + $0x130] sm:$0xff] }
 0x559   : > { %v2102_v57 = vadd.f32 %v2069_v48, %v1745_v26  ;;  %v6140_v26 = vld [vmem:[#allocation10 + $0x160] sm:$0xff]  ;;  %v6164_v5 = vld [vmem:[#allocation10 + $0x118] sm:$0xff] }
 0x55a   : > { %2469 = vmatpush.msra.mxu3 %v6138_v1  ;;  %v6146_v48 = vld [vmem:[#allocation10 + $0x140] sm:$0xff] }
 0x55b   : > { %v2103_v10 = vmul.f32 0.5, %v2102_v57  ;;  %v6148_v57 = vld [vmem:[#allocation10 + $0x148] sm:$0xff] }
 0x55c   : > { %2470 = vmatpush.msra.mxu3 %v6146_v48 }
 0x55d   : > { %v4532_v21 = vpop.eup %4531  ;;  %4533 = vtanh.f32 %v2103_v10  ;;  %v6154_v10 = vld [vmem:[#allocation10 + $0x128] sm:$0xff] }
 0x55e   : > { %v2100_v7 = vmul.f32 0.5, %v4532_v21  ;;  %2471 = vmatpush.msra.mxu3 %v6154_v10  ;;  %v6162_v21 = vld [vmem:[#allocation10 + $0x110] sm:$0xff] }
 0x560   : > { %v2101_v12 = vadd.f32 0.5, %v2100_v7  ;;  %2472 = vmatpush.msra.mxu3 %v6162_v21  ;;  %v6170_v7 = vld [vmem:[#allocation10 + $0xf8] sm:$0xff] }
 0x562   : > { %v2107_v18 = vmul.f32 %v2101_v12, %v2089_v61  ;;  %2473 = vmatpush.msra.mxu3 %v6170_v7  ;;  %v6178_v61 = vld [vmem:[#allocation10 + $0xe0] sm:$0xff]  ;;  %v6180_v12 = vld [vmem:[#allocation10 + $0xe8] sm:$0xff] }
 0x563   : > { %v4534_v16 = vpop.eup %4533 }
 0x564   : > { %v2108_v13 = vadd.f32 %v2107_v18, %v1786_v6  ;;  %v2105_v31 = vmul.f32 0.5, %v4534_v16  ;;  %2474 = vmatpush.msra.mxu3 %v6178_v61  ;;  %v6186_v6 = vld [vmem:[#allocation10 + $0xc8] sm:$0xff]  ;;  %v6188_v18 = vld [vmem:[#allocation10 + $0xd0] sm:$0xff]  ;;  %v6196_v16 = vld [vmem:[#allocation10 + $0xb8] sm:$0xff] }
 0x566   : > { %4535 = vtanh.f32 %v2108_v13  ;;  %v2106_v42 = vadd.f32 0.5, %v2105_v31  ;;  %2475 = vmatpush.msra.mxu3 %v6186_v6  ;;  %v6194_v13 = vld [vmem:[#allocation10 + $0xb0] sm:$0xff]  ;;  %v6198_v31 = vld [vmem:[#allocation10 + $0x98] sm:$0xff] }
 0x568   : > { %2476 = vmatpush.msra.mxu3 %v6194_v13 }
 0x56a   : > { %2477 = vmatpush.msra.mxu3 %v6198_v31 }
 0x56c   : > { %v4536_v39 = vpop.eup %4535 }
 0x56d   : > { %v2110_v44 = vsub.f32 %v5996_v25, %v4536_v39 }
 0x56f   : > { %v2111_v15 = vmul.f32 %v2110_v44, %v2106_v42  ;;  %v6206_v42 = vld [vmem:[#allocation10 + $0x80] sm:$0xff]  ;;  %v6208_v44 = vld [vmem:[#allocation10 + $0x88] sm:$0xff] }
 0x570   : > { %2478 = vmatpush.msra.mxu3 %v6206_v42 }
 0x571   : > { %v6068_v45 = vadd.f32 %v4536_v39, %v2111_v15  ;;  %v6204_v39 = vld [vmem:[#allocation10 + $0xa0] sm:$0xff]  ;;  %v6214_v15 = vld [vmem:[#allocation10 + $0x68] sm:$0xff] }
 0x572   : > { %2479 = vmatpush.msra.mxu3 %v6214_v15 }
 0x573   : > { %2186 = vmatmul.f32.vlgmr.msra.gmra.mxu0 %v6068_v45  ;;  %2206 = vmatmul.f32.vlgmr.msrb.gmra.mxu1 %v6068_v45 }
 0x574   : > { %2226 = vmatmul.f32.vlgmr.msrb.gmra.mxu2 %v6068_v45  ;;  %2587 = vmatpush.msrb.mxu1 %v5957_v9 }
 0x575   : > { %2488 = vmatpush.msra.mxu0 %v6134_v58  ;;  %2607 = vmatpush.msrb.mxu2 %v6132_v51 }
 0x576   : > { %2588 = vmatpush.msrb.mxu1 %v5959_v41  ;;  %v2165_v41 = vperm.slane %v2162_v3, 1 }
 0x577   : > { %2489 = vmatpush.msra.mxu0 %v6140_v26  ;;  %2608 = vmatpush.msrb.mxu2 %v6138_v1 }
 0x578   : > { %2589 = vmatpush.msrb.mxu1 %v5967_v34  ;;  %v1707_v34 = vadd.f32 %v5934_v20, %v5946_v50  ;;  %v1748_v20 = vadd.f32 %v5936_v23, %v5975_v55 }
 0x579   : > { %2490 = vmatpush.msra.mxu0 %v6148_v57  ;;  %2609 = vmatpush.msrb.mxu2 %v6146_v48 }
 0x57a   : > { %2590 = vmatpush.msrb.mxu1 %v5971_v4 }
 0x57b   : > { %2491 = vmatpush.msra.mxu0 %v6156_v59  ;;  %2610 = vmatpush.msrb.mxu2 %v6154_v10 }
 0x57c   : > { %2591 = vmatpush.msrb.mxu1 %v5977_v47 }
 0x57d   : > { %2492 = vmatpush.msra.mxu0 %v6164_v5  ;;  %2611 = vmatpush.msrb.mxu2 %v6162_v21 }
 0x57e   : > { %2592 = vmatpush.msrb.mxu1 %v5983_v19 }
 0x57f   : > { %2493 = vmatpush.msra.mxu0 %v6172_v63  ;;  %2612 = vmatpush.msrb.mxu2 %v6170_v7 }
 0x580   : > { %2593 = vmatpush.msrb.mxu1 %v5988_v54  ;;  %v2164_v54 = vperm.slane %v2162_v3, 0  ;;  %v2301_v3 = vld [vmem:[#allocation13] sm:$0x7] }
 0x581   : > { %2494 = vmatpush.msra.mxu0 %v6180_v12  ;;  %2613 = vmatpush.msrb.mxu2 %v6178_v61 }
 0x582   : > { %2594 = vmatpush.msrb.mxu1 %v6090_v62 }
 0x583   : > { %2495 = vmatpush.msra.mxu0 %v6188_v18  ;;  %2614 = vmatpush.msrb.mxu2 %v6186_v6 }
 0x584   : > { %2595 = vmatpush.msrb.mxu1 %v6024_v8 }
 0x585   : > { %2496 = vmatpush.msra.mxu0 %v6196_v16  ;;  %2615 = vmatpush.msrb.mxu2 %v6194_v13 }
 0x586   : > { %2596 = vmatpush.msrb.mxu1 %v6027_v0 }
 0x587   : > { %2497 = vmatpush.msra.mxu0 %v6204_v39  ;;  %2616 = vmatpush.msrb.mxu2 %v6198_v31 }
 0x588   : > { %2597 = vmatpush.msrb.mxu1 %v6030_v33 }
 0x589   : > { %2498 = vmatpush.msra.mxu0 %v6208_v44  ;;  %2617 = vmatpush.msrb.mxu2 %v6206_v42 }
 0x58a   : > { %2598 = vmatpush.msrb.mxu1 %v6033_v22 }
 0x58b   : > { %2499 = vmatpush.msra.mxu0 %v6216_v29  ;;  %2618 = vmatpush.msrb.mxu2 %v6214_v15 }
 0x58c   : > { %2599 = vmatpush.msrb.mxu1 %v6036_v60 }
 0x58e   : > { %2600 = vmatpush.msrb.mxu1 %v6038_v37 }
 0x590   : > { %2601 = vmatpush.msrb.mxu1 %v6041_v30 }
 0x592   : > { %2602 = vmatpush.msrb.mxu1 %v6046_v28 }
 0x5f0   : > { %v2187_v9 = vpop.f32.mrf.mxu0  ;;  %v2207_v47 = vpop.f32.mrf.mxu1 }
 0x5f1   : > { %v2188_v4 = vadd.f32 %v2187_v9, %v2164_v54  ;;  %v2208_v36 = vadd.f32 %v2207_v47, %v2165_v41  ;;  %v6222_v54 = vld [vmem:[#allocation10 + $0x50] sm:$0xff]  ;;  %v6224_v9 = vld [vmem:[#allocation10 + $0x58] sm:$0xff]  ;;  %v2303_v41 = vperm.slane %v2301_v3, 0  ;;  %v2304_v47 = vperm.slane %v2301_v3, 1 }
 0x5f2   : > { %2480 = vmatpush.msra.mxu3 %v6222_v54  ;;  %2500 = vmatpush.msra.mxu0 %v6224_v9 }
 0x5f3   : > { %v2236_v19 = vadd.f32 %v2188_v4, %v1707_v34  ;;  %v2241_v43 = vadd.f32 %v2208_v36, %v1748_v20  ;;  %v6230_v34 = vld [vmem:[#allocation10 + $0x38] sm:$0xff]  ;;  %v6232_v4 = vld [vmem:[#allocation10 + $0x40] sm:$0xff]  ;;  %2619 = vmatpush.msrb.mxu2 %v6222_v54  ;;  %v7001_v20 = vld [vmem:[#allocation35_spill] sm:$0xff] }
 0x5f4   : > { %v6238_v36 = vld [vmem:[#allocation10 + $0x20] sm:$0xff]  ;;  %2481 = vmatpush.msra.mxu3 %v6230_v34  ;;  %2501 = vmatpush.msra.mxu0 %v6232_v4 }
 0x5f5   : > { %v2237_v17 = vmul.f32 0.5, %v2236_v19  ;;  %v2242_v53 = vmul.f32 0.5, %v2241_v43  ;;  %v1710_v43 = vadd.f32 %v7001_v20, %v5946_v50  ;;  %2620 = vmatpush.msrb.mxu2 %v6230_v34 }
 0x5f6   : > { %2482 = vmatpush.msra.mxu3 %v6238_v36 }
 0x5f7   : > { %4537 = vtanh.f32 %v2237_v17  ;;  %v2227_v0 = vpop.f32.mrf.mxu2  ;;  %v6240_v17 = vld [vmem:[#allocation10 + $0x28] sm:$0xff]  ;;  %2621 = vmatpush.msrb.mxu2 %v6238_v36 }
 0x5f8   : > { %4539 = vtanh.f32 %v2242_v53  ;;  %v2228_v33 = vadd.f32 %v2227_v0, %v2166_v11  ;;  %v6250_v0 = vld [vmem:[#allocation10 + $0x10] sm:$0xff]  ;;  %2502 = vmatpush.msra.mxu0 %v6240_v17 }
 0x5fa   : > { %2503 = vmatpush.msra.mxu0 %v6250_v0 }
 0x5fd   : > { %v4538_v8 = vpop.eup %4537 }
 0x5fe   : > { %v2239_v32 = vmul.f32 0.5, %v4538_v8  ;;  %v4540_v24 = vpop.eup %4539  ;;  %v6248_v8 = vld [vmem:[#allocation10 + $0x8] sm:$0xff] }
 0x5ff   : > { %v2244_v30 = vmul.f32 0.5, %v4540_v24  ;;  %2483 = vmatpush.msra.mxu3 %v6248_v8  ;;  %2622 = vmatpush.msrb.mxu2 %v6248_v8 }
 0x600   : > { %v2240_v22 = vadd.f32 0.5, %v2239_v32 }
 0x601   : > { %v2245_v38 = vadd.f32 0.5, %v2244_v30  ;;  %v2305_v30 = vperm.slane %v2301_v3, 2 }
 0x602   : > { %v2246_v60 = vmul.f32 %v2240_v22, %v2228_v33 }
 0x604   : > { %v2247_v37 = vadd.f32 %v2246_v60, %v1789_v35  ;;  %v7002_v35 = vld [vmem:[#allocation36_spill] sm:$0xff] }
 0x605   : > { %v1751_v60 = vadd.f32 %v7002_v35, %v5975_v55 }
 0x606   : > { %4541 = vtanh.f32 %v2247_v37 }
 0x60c   : > { %v4542_v23 = vpop.eup %4541 }
 0x60d   : > { %v2249_v52 = vsub.f32 %v6068_v45, %v4542_v23 }
 0x60f   : > { %v2250_v28 = vmul.f32 %v2249_v52, %v2245_v38 }
 0x611   : > { %v6127_v56 = vadd.f32 %v4542_v23, %v2250_v28 }
 0x613   : > { %2325 = vmatmul.f32.vlgmr.msrb.gmra.mxu3 %v6127_v56  ;;  %2345 = vmatmul.f32.vlgmr.msrb.gmra.mxu0 %v6127_v56 }
 0x614   : > { %2365 = vmatmul.f32.vlgmr.msra.gmra.mxu1 %v6127_v56  ;;  %2627 = vmatpush.msrb.mxu3 %v6134_v58 }
 0x615   : > { %2746 = vmatpush.msra.mxu1 %v6132_v51 }
 0x616   : > { %2628 = vmatpush.msrb.mxu3 %v6140_v26 }
 0x617   : > { %2747 = vmatpush.msra.mxu1 %v6138_v1 }
 0x618   : > { %2629 = vmatpush.msrb.mxu3 %v6148_v57 }
 0x619   : > { %2748 = vmatpush.msra.mxu1 %v6146_v48 }
 0x61a   : > { %2630 = vmatpush.msrb.mxu3 %v6156_v59 }
 0x61b   : > { %2749 = vmatpush.msra.mxu1 %v6154_v10 }
 0x61c   : > { %2631 = vmatpush.msrb.mxu3 %v6164_v5 }
 0x61d   : > { %2750 = vmatpush.msra.mxu1 %v6162_v21 }
 0x61e   : > { %2632 = vmatpush.msrb.mxu3 %v6172_v63 }
 0x61f   : > { %2751 = vmatpush.msra.mxu1 %v6170_v7 }
 0x620   : > { %2633 = vmatpush.msrb.mxu3 %v6180_v12 }
 0x621   : > { %2752 = vmatpush.msra.mxu1 %v6178_v61 }
 0x622   : > { %2634 = vmatpush.msrb.mxu3 %v6188_v18 }
 0x623   : > { %2753 = vmatpush.msra.mxu1 %v6186_v6 }
 0x624   : > { %2635 = vmatpush.msrb.mxu3 %v6196_v16 }
 0x625   : > { %2754 = vmatpush.msra.mxu1 %v6194_v13 }
 0x626   : > { %2636 = vmatpush.msrb.mxu3 %v6204_v39 }
 0x627   : > { %2755 = vmatpush.msra.mxu1 %v6198_v31 }
 0x628   : > { %2637 = vmatpush.msrb.mxu3 %v6208_v44 }
 0x629   : > { %2756 = vmatpush.msra.mxu1 %v6206_v42 }
 0x62a   : > { %2638 = vmatpush.msrb.mxu3 %v6216_v29 }
 0x62b   : > { %2757 = vmatpush.msra.mxu1 %v6214_v15 }
 0x62c   : > { %2639 = vmatpush.msrb.mxu3 %v6224_v9 }
 0x62d   : > { %2758 = vmatpush.msra.mxu1 %v6222_v54 }
 0x62e   : > { %2640 = vmatpush.msrb.mxu3 %v6232_v4 }
 0x62f   : > { %2759 = vmatpush.msra.mxu1 %v6230_v34 }
 0x630   : > { %2641 = vmatpush.msrb.mxu3 %v6240_v17 }
 0x631   : > { %2760 = vmatpush.msra.mxu1 %v6238_v36 }
 0x632   : > { %2642 = vmatpush.msrb.mxu3 %v6250_v0 }
 0x633   : > { %2761 = vmatpush.msra.mxu1 %v6248_v8 }
 0x690   : > { %v2346_v53 = vpop.f32.mrf.mxu0 }
 0x691   : > { %v2347_v33 = vadd.f32 %v2346_v53, %v2304_v47  ;;  %v2366_v38 = vpop.f32.mrf.mxu1  ;;  %v1792_v47 = vadd.f32 %v6082_v27, %v5981_v14 }
 0x692   : > { %v2367_v28 = vadd.f32 %v2366_v38, %v2305_v30 }
 0x693   : > { %v2380_v37 = vadd.f32 %v2347_v33, %v1751_v60 }
 0x695   : > { %v2381_v24 = vmul.f32 0.5, %v2380_v37 }
 0x696   : > { %v2326_v19 = vpop.f32.mrf.mxu3 }
 0x697   : > { %v2327_v11 = vadd.f32 %v2326_v19, %v2303_v41 }
 0x699   : > { %v2375_v32 = vadd.f32 %v2327_v11, %v1710_v43 }
 0x69b   : > { %v2376_v22 = vmul.f32 0.5, %v2375_v32 }
 0x69d   : > { %4543 = vtanh.f32 %v2376_v22  ;;  %v2440_v22 = vld [vmem:[#allocation13] sm:$0x7] }
 0x69e   : > { %4545 = vtanh.f32 %v2381_v24  ;;  %v2442_v35 = vperm.slane %v2440_v22, 0  ;;  %v2443_v37 = vperm.slane %v2440_v22, 1  ;;  %v7003_v24 = vld [vmem:[#allocation37_spill] sm:$0xff] }
 0x69f   : > { %v1713_v30 = vadd.f32 %v7003_v24, %v5946_v50 }
 0x6a3   : > { %v4544_v23 = vpop.eup %4543 }
 0x6a4   : > { %v2378_v52 = vmul.f32 0.5, %v4544_v23  ;;  %v4546_v3 = vpop.eup %4545 }
 0x6a5   : > { %v2383_v43 = vmul.f32 0.5, %v4546_v3  ;;  %v2444_v3 = vperm.slane %v2440_v22, 2 }
 0x6a6   : > { %v2379_v41 = vadd.f32 0.5, %v2378_v52 }
 0x6a7   : > { %v2384_v11 = vadd.f32 0.5, %v2383_v43 }
 0x6a8   : > { %v2385_v19 = vmul.f32 %v2379_v41, %v2367_v28 }
 0x6aa   : > { %v2386_v20 = vadd.f32 %v2385_v19, %v1792_v47  ;;  %v7004_v47 = vld [vmem:[#allocation38_spill] sm:$0xff] }
 0x6ab   : > { %v1754_v19 = vadd.f32 %v7004_v47, %v5975_v55 }
 0x6ac   : > { %4547 = vtanh.f32 %v2386_v20 }
 0x6b2   : > { %v4548_v53 = vpop.eup %4547 }
 0x6b3   : > { %v2388_v27 = vsub.f32 %v6127_v56, %v4548_v53 }
 0x6b5   : > { %v2389_v32 = vmul.f32 %v2388_v27, %v2384_v11 }
 0x6b7   : > { %v6281_v33 = vadd.f32 %v4548_v53, %v2389_v32 }
 0x6b9   : > { %2464 = vmatmul.f32.vlgmr.msra.gmra.mxu2 %v6281_v33  ;;  %2484 = vmatmul.f32.vlgmr.msra.gmra.mxu3 %v6281_v33 }
 0x6ba   : > { %2504 = vmatmul.f32.vlgmr.msra.gmra.mxu0 %v6281_v33  ;;  %2766 = vmatpush.msra.mxu2 %v6134_v58 }
 0x6bc   : > { %2767 = vmatpush.msra.mxu2 %v6140_v26 }
 0x6be   : > { %2768 = vmatpush.msra.mxu2 %v6148_v57 }
 0x6c0   : > { %2769 = vmatpush.msra.mxu2 %v6156_v59 }
 0x6c2   : > { %2770 = vmatpush.msra.mxu2 %v6164_v5 }
 0x6c4   : > { %2771 = vmatpush.msra.mxu2 %v6172_v63 }
 0x6c6   : > { %2772 = vmatpush.msra.mxu2 %v6180_v12 }
 0x6c8   : > { %2773 = vmatpush.msra.mxu2 %v6188_v18 }
 0x6ca   : > { %2774 = vmatpush.msra.mxu2 %v6196_v16 }
 0x6cc   : > { %2775 = vmatpush.msra.mxu2 %v6204_v39 }
 0x6ce   : > { %2776 = vmatpush.msra.mxu2 %v6208_v44 }
 0x6d0   : > { %2777 = vmatpush.msra.mxu2 %v6216_v29 }
 0x6d2   : > { %2778 = vmatpush.msra.mxu2 %v6224_v9 }
 0x6d4   : > { %2779 = vmatpush.msra.mxu2 %v6232_v4 }
 0x6d6   : > { %2780 = vmatpush.msra.mxu2 %v6240_v17 }
 0x6d8   : > { %2781 = vmatpush.msra.mxu2 %v6250_v0 }
 0x737   : > { %v2505_v11 = vpop.f32.mrf.mxu0 }
 0x738   : > { %v2506_v32 = vadd.f32 %v2505_v11, %v2444_v3  ;;  %v6347_v3 = vld [vmem:[#allocation10 + $0x30] sm:$0xff]  ;;  %v6350_v11 = vld [vmem:[#allocation10 + $0x18] sm:$0xff] }
 0x73c   : > { %v2465_v60 = vpop.f32.mrf.mxu2  ;;  %v2485_v38 = vpop.f32.mrf.mxu3 }
 0x73d   : > { %v2466_v23 = vadd.f32 %v2465_v60, %v2442_v35  ;;  %v2486_v28 = vadd.f32 %v2485_v38, %v2443_v37  ;;  %v1795_v35 = vadd.f32 %v6084_v49, %v5981_v14  ;;  %v2715_v49 = vld [vmem:[#allocation10 + $0x168] sm:$0xff] }
 0x73e   : > { %2726 = vmatpush.msrb.mxu0 %v2715_v49  ;;  %2865 = vmatpush.msra.mxu3 %v2715_v49  ;;  %v2959_v49 = vld [vmem:[#allocation15 + $0x10] sm:$0xff] }
 0x73f   : > { %v2514_v52 = vadd.f32 %v2466_v23, %v1713_v30  ;;  %v2519_v20 = vadd.f32 %v2486_v28, %v1754_v19  ;;  %v6345_v19 = vld [vmem:[#allocation10 + $0x48] sm:$0xff] }
 0x741   : > { %v2515_v41 = vmul.f32 0.5, %v2514_v52  ;;  %v2520_v43 = vmul.f32 0.5, %v2519_v20  ;;  %v2964_v20 = vld [vmem:[#allocation15 + $0x38] sm:$0xff] }
 0x743   : > { %4549 = vtanh.f32 %v2515_v41  ;;  %v2965_v41 = vld [vmem:[#allocation15 + $0x40] sm:$0xff] }
 0x744   : > { %4551 = vtanh.f32 %v2520_v43  ;;  %v2963_v43 = vld [vmem:[#allocation15 + $0x30] sm:$0xff] }
 0x749   : > { %v4550_v53 = vpop.eup %4549 }
 0x74a   : > { %v2517_v27 = vmul.f32 0.5, %v4550_v53  ;;  %v4552_v37 = vpop.eup %4551 }
 0x74b   : > { %v2522_v30 = vmul.f32 0.5, %v4552_v37  ;;  %v2961_v37 = vld [vmem:[#allocation15 + $0x20] sm:$0xff] }
 0x74c   : > { %v2518_v46 = vadd.f32 0.5, %v2517_v27  ;;  %v2962_v27 = vld [vmem:[#allocation15 + $0x28] sm:$0xff] }
 0x74d   : > { %v2523_v38 = vadd.f32 0.5, %v2522_v30 }
 0x74e   : > { %v2524_v60 = vmul.f32 %v2518_v46, %v2506_v32  ;;  %v2712_v46 = vld [vmem:[#allocation10 + $0x150] sm:$0xff] }
 0x74f   : > { %2727 = vmatpush.msrb.mxu0 %v2712_v46  ;;  %2866 = vmatpush.msra.mxu3 %v2712_v46  ;;  %v7005_v32 = vld [vmem:[#allocation39_spill] sm:$0xff]  ;;  %v7006_v46 = vld [vmem:[#allocation40_spill] sm:$0xff] }
 0x750   : > { %v2525_v24 = vadd.f32 %v2524_v60, %v1795_v35  ;;  %v1716_v35 = vadd.f32 %v7005_v32, %v5946_v50 }
 0x752   : > { %4553 = vtanh.f32 %v2525_v24  ;;  %v6355_v24 = vld [vmem:[#allocation10] sm:$0xff] }
 0x758   : > { %v4554_v23 = vpop.eup %4553 }
 0x759   : > { %v2527_v52 = vsub.f32 %v6281_v33, %v4554_v23 }
 0x75b   : > { %v2528_v22 = vmul.f32 %v2527_v52, %v2523_v38  ;;  %v2960_v38 = vld [vmem:[#allocation15 + $0x18] sm:$0xff] }
 0x75d   : > { %v6311_v28 = vadd.f32 %v4554_v23, %v2528_v22 }
 0x75f   : > { %2603 = vmatmul.f32.vlgmr.msrb.gmra.mxu1 %v6311_v28  ;;  %2623 = vmatmul.f32.vlgmr.msrb.gmra.mxu2 %v6311_v28 }
 0x760   : > { %2643 = vmatmul.f32.vlgmr.msrb.gmra.mxu3 %v6311_v28  ;;  %2905 = vmatpush.msrb.mxu1 %v6134_v58  ;;  %v2709_v58 = vld [vmem:[#allocation10 + $0x138] sm:$0xff] }
 0x761   : > { %2728 = vmatpush.msrb.mxu0 %v2709_v58  ;;  %2867 = vmatpush.msra.mxu3 %v2709_v58  ;;  %v1757_v58 = vadd.f32 %v7006_v46, %v5975_v55 }
 0x762   : > { %2906 = vmatpush.msrb.mxu1 %v6140_v26  ;;  %v2706_v26 = vld [vmem:[#allocation10 + $0x120] sm:$0xff] }
 0x763   : > { %2729 = vmatpush.msrb.mxu0 %v2706_v26  ;;  %2868 = vmatpush.msra.mxu3 %v2706_v26 }
 0x764   : > { %2907 = vmatpush.msrb.mxu1 %v6148_v57  ;;  %v2703_v57 = vld [vmem:[#allocation10 + $0x108] sm:$0xff] }
 0x765   : > { %2730 = vmatpush.msrb.mxu0 %v2703_v57  ;;  %2869 = vmatpush.msra.mxu3 %v2703_v57  ;;  %v2958_v57 = vld [vmem:[#allocation15 + $0x8] sm:$0xff] }
 0x766   : > { %2908 = vmatpush.msrb.mxu1 %v6156_v59  ;;  %v2972_v59 = vld [vmem:[#allocation15 + $0x78] sm:$0xff] }
 0x767   : > { %2975 = vmatpush.msrb.mxu2 %v2972_v59 }
 0x768   : > { %2909 = vmatpush.msrb.mxu1 %v6164_v5  ;;  %v2700_v5 = vld [vmem:[#allocation10 + $0xf0] sm:$0xff] }
 0x769   : > { %2731 = vmatpush.msrb.mxu0 %v2700_v5  ;;  %2870 = vmatpush.msra.mxu3 %v2700_v5  ;;  %v2957_v5 = vld [vmem:[#allocation15] sm:$0xff] }
 0x76a   : > { %2910 = vmatpush.msrb.mxu1 %v6172_v63  ;;  %v2971_v63 = vld [vmem:[#allocation15 + $0x70] sm:$0xff] }
 0x76b   : > { %2976 = vmatpush.msrb.mxu2 %v2971_v63 }
 0x76c   : > { %2911 = vmatpush.msrb.mxu1 %v6180_v12  ;;  %v2697_v12 = vld [vmem:[#allocation10 + $0xd8] sm:$0xff] }
 0x76d   : > { %2732 = vmatpush.msrb.mxu0 %v2697_v12  ;;  %2871 = vmatpush.msra.mxu3 %v2697_v12 }
 0x76e   : > { %2912 = vmatpush.msrb.mxu1 %v6188_v18  ;;  %v2970_v18 = vld [vmem:[#allocation15 + $0x68] sm:$0xff] }
 0x76f   : > { %2977 = vmatpush.msrb.mxu2 %v2970_v18  ;;  %2733 = vmatpush.msrb.mxu0 %v6090_v62  ;;  %v6342_v62 = vld [vmem:[#allocation10 + $0x60] sm:$0xff] }
 0x770   : > { %2913 = vmatpush.msrb.mxu1 %v6196_v16  ;;  %v2969_v16 = vld [vmem:[#allocation15 + $0x60] sm:$0xff] }
 0x771   : > { %2978 = vmatpush.msrb.mxu2 %v2969_v16 }
 0x772   : > { %2914 = vmatpush.msrb.mxu1 %v6204_v39  ;;  %v6333_v39 = vld [vmem:[#allocation10 + $0xa8] sm:$0xff] }
 0x773   : > { %2734 = vmatpush.msrb.mxu0 %v6333_v39 }
 0x774   : > { %2915 = vmatpush.msrb.mxu1 %v6208_v44  ;;  %v2968_v44 = vld [vmem:[#allocation15 + $0x58] sm:$0xff] }
 0x775   : > { %2979 = vmatpush.msrb.mxu2 %v2968_v44 }
 0x776   : > { %2916 = vmatpush.msrb.mxu1 %v6216_v29  ;;  %v6336_v29 = vld [vmem:[#allocation10 + $0x90] sm:$0xff] }
 0x777   : > { %2735 = vmatpush.msrb.mxu0 %v6336_v29 }
 0x778   : > { %2917 = vmatpush.msrb.mxu1 %v6224_v9  ;;  %v2967_v9 = vld [vmem:[#allocation15 + $0x50] sm:$0xff] }
 0x779   : > { %2980 = vmatpush.msrb.mxu2 %v2967_v9 }
 0x77a   : > { %2918 = vmatpush.msrb.mxu1 %v6232_v4  ;;  %v2579_v4 = vld [vmem:[#allocation13] sm:$0x7] }
 0x77b   : > { %v2581_v47 = vperm.slane %v2579_v4, 0  ;;  %v2582_v23 = vperm.slane %v2579_v4, 1  ;;  %v2583_v12 = vperm.slane %v2579_v4, 2 }
 0x77c   : > { %2919 = vmatpush.msrb.mxu1 %v6240_v17  ;;  %v6339_v17 = vld [vmem:[#allocation10 + $0x78] sm:$0xff] }
 0x77d   : > { %2736 = vmatpush.msrb.mxu0 %v6339_v17 }
 0x77e   : > { %2920 = vmatpush.msrb.mxu1 %v6250_v0  ;;  %v2966_v0 = vld [vmem:[#allocation15 + $0x48] sm:$0xff] }
 0x77f   : > { %2981 = vmatpush.msrb.mxu2 %v2966_v0  ;;  %2737 = vmatpush.msrb.mxu0 %v6342_v62 }
 0x781   : > { %2982 = vmatpush.msrb.mxu2 %v2965_v41  ;;  %2738 = vmatpush.msrb.mxu0 %v6345_v19 }
 0x783   : > { %2983 = vmatpush.msrb.mxu2 %v2964_v20  ;;  %2739 = vmatpush.msrb.mxu0 %v6347_v3 }
 0x785   : > { %2984 = vmatpush.msrb.mxu2 %v2963_v43  ;;  %2740 = vmatpush.msrb.mxu0 %v6350_v11 }
 0x787   : > { %2985 = vmatpush.msrb.mxu2 %v2962_v27  ;;  %2741 = vmatpush.msrb.mxu0 %v6355_v24  ;;  %v1801_v27 = vadd.f32 %v6088_v2, %v5981_v14 }
 0x789   : > { %2986 = vmatpush.msrb.mxu2 %v2961_v37  ;;  %2885 = vmatpush.msra.mxu0 %v6132_v51 }
 0x78b   : > { %2987 = vmatpush.msrb.mxu2 %v2960_v38  ;;  %2886 = vmatpush.msra.mxu0 %v6138_v1  ;;  %v1798_v1 = vadd.f32 %v6086_v40, %v5981_v14 }
 0x78d   : > { %2988 = vmatpush.msrb.mxu2 %v2959_v49  ;;  %2887 = vmatpush.msra.mxu0 %v6146_v48 }
 0x78f   : > { %2989 = vmatpush.msrb.mxu2 %v2958_v57  ;;  %2888 = vmatpush.msra.mxu0 %v6154_v10 }
 0x791   : > { %2990 = vmatpush.msrb.mxu2 %v2957_v5  ;;  %2889 = vmatpush.msra.mxu0 %v6162_v21 }
 0x793   : > { %2890 = vmatpush.msra.mxu0 %v6170_v7 }
 0x795   : > { %2891 = vmatpush.msra.mxu0 %v6178_v61 }
 0x797   : > { %2892 = vmatpush.msra.mxu0 %v6186_v6 }
 0x799   : > { %2893 = vmatpush.msra.mxu0 %v6194_v13  ;;  %v2833_v13 = vld [vmem:[#allocation10 + $0xc0] sm:$0xff] }
 0x79a   : > { %2872 = vmatpush.msra.mxu3 %v2833_v13  ;;  %v3242_v13 = vld [vmem:[#allocation15 + $0xa8] sm:$0xff] }
 0x79b   : > { %2894 = vmatpush.msra.mxu0 %v6198_v31  ;;  %v2718_v31 = vld [vmem:[#allocation13] sm:$0x7] }
 0x79c   : > { %2873 = vmatpush.msra.mxu3 %v6333_v39  ;;  %v2722_v41 = vperm.slane %v2718_v31, 2 }
 0x79d   : > { %2895 = vmatpush.msra.mxu0 %v6206_v42  ;;  %v7007_v42 = vld [vmem:[#allocation41_spill] sm:$0xff] }
 0x79e   : > { %2874 = vmatpush.msra.mxu3 %v6336_v29 }
 0x79f   : > { %2896 = vmatpush.msra.mxu0 %v6214_v15  ;;  %v1719_v15 = vadd.f32 %v7007_v42, %v5946_v50 }
 0x7a0   : > { %2875 = vmatpush.msra.mxu3 %v6339_v17 }
 0x7a1   : > { %2897 = vmatpush.msra.mxu0 %v6222_v54 }
 0x7a2   : > { %2876 = vmatpush.msra.mxu3 %v6342_v62 }
 0x7a3   : > { %2898 = vmatpush.msra.mxu0 %v6230_v34 }
 0x7a4   : > { %2877 = vmatpush.msra.mxu3 %v6345_v19 }
 0x7a5   : > { %2899 = vmatpush.msra.mxu0 %v6238_v36 }
 0x7a6   : > { %2878 = vmatpush.msra.mxu3 %v6347_v3 }
 0x7a7   : > { %2900 = vmatpush.msra.mxu0 %v6248_v8 }
 0x7a8   : > { %2879 = vmatpush.msra.mxu3 %v6350_v11 }
 0x7aa   : > { %2880 = vmatpush.msra.mxu3 %v6355_v24 }
 0x7dc   : > { %v2604_v53 = vpop.f32.mrf.mxu1 }
 0x7dd   : > { %v2605_v60 = vadd.f32 %v2604_v53, %v2581_v47  ;;  %v6406_v47 = vld [vmem:[%s6942_s11] ss:$0 sm:$0xff] }
 0x7df   : > { %v2653_v30 = vadd.f32 %v2605_v60, %v1716_v35 }
 0x7e1   : > { %v2654_v52 = vmul.f32 0.5, %v2653_v30 }
 0x7e2   : > { %v2624_v22 = vpop.f32.mrf.mxu2 }
 0x7e3   : > { %4555 = vtanh.f32 %v2654_v52  ;;  %v2625_v26 = vadd.f32 %v2624_v22, %v2582_v23  ;;  %v2644_v18 = vpop.f32.mrf.mxu3 }
 0x7e4   : > { %v2645_v44 = vadd.f32 %v2644_v18, %v2583_v12 }
 0x7e5   : > { %v2658_v59 = vadd.f32 %v2625_v26, %v1757_v58 }
 0x7e7   : > { %v2659_v63 = vmul.f32 0.5, %v2658_v59 }
 0x7e9   : > { %v4556_v51 = vpop.eup %4555  ;;  %4557 = vtanh.f32 %v2659_v63 }
 0x7ea   : > { %v2656_v16 = vmul.f32 0.5, %v4556_v51 }
 0x7ec   : > { %v2657_v9 = vadd.f32 0.5, %v2656_v16 }
 0x7ee   : > { %v2663_v48 = vmul.f32 %v2657_v9, %v2645_v44 }
 0x7ef   : > { %v4558_v10 = vpop.eup %4557 }
 0x7f0   : > { %v2664_v4 = vadd.f32 %v2663_v48, %v1798_v1  ;;  %v2661_v21 = vmul.f32 0.5, %v4558_v10  ;;  %v3252_v1 = vld [vmem:[#allocation15 + $0xf8] sm:$0xff]  ;;  %v3251_v48 = vld [vmem:[#allocation15 + $0xf0] sm:$0xff]  ;;  %v3249_v10 = vld [vmem:[#allocation15 + $0xe0] sm:$0xff] }
 0x7f1   : > { %3255 = vmatpush.msrb.mxu3 %v3252_v1 }
 0x7f2   : > { %4559 = vtanh.f32 %v2664_v4  ;;  %v2662_v7 = vadd.f32 0.5, %v2661_v21  ;;  %v3250_v4 = vld [vmem:[#allocation15 + $0xe8] sm:$0xff]  ;;  %v3248_v21 = vld [vmem:[#allocation15 + $0xd8] sm:$0xff] }
 0x7f3   : > { %3256 = vmatpush.msrb.mxu3 %v3251_v48 }
 0x7f5   : > { %3257 = vmatpush.msrb.mxu3 %v3250_v4  ;;  %v6471_v4 = vld [vmem:[#allocation18] ss:$0 sm:$0xff] }
 0x7f7   : > { %3258 = vmatpush.msrb.mxu3 %v3249_v10 }
 0x7f8   : > { %v4560_v0 = vpop.eup %4559 }
 0x7f9   : > { %v2666_v40 = vsub.f32 %v6311_v28, %v4560_v0  ;;  %3259 = vmatpush.msrb.mxu3 %v3248_v21  ;;  %v6473_v21 = vld [vmem:[#allocation13] sm:$0x7] }
 0x7fb   : > { %v2667_v61 = vmul.f32 %v2666_v40, %v2662_v7  ;;  %v3246_v7 = vld [vmem:[#allocation15 + $0xc8] sm:$0xff]  ;;  %v3245_v40 = vld [vmem:[#allocation15 + $0xc0] sm:$0xff] }
 0x7fd   : > { %v6378_v6 = vadd.f32 %v4560_v0, %v2667_v61  ;;  %v3247_v0 = vld [vmem:[#allocation15 + $0xd0] sm:$0xff]  ;;  %v3244_v61 = vld [vmem:[#allocation15 + $0xb8] sm:$0xff] }
 0x7fe   : > { %3260 = vmatpush.msrb.mxu3 %v3247_v0 }
 0x7ff   : > { %2742 = vmatmul.f32.vlgmr.msrb.gmra.mxu0 %v6378_v6  ;;  %2762 = vmatmul.f32.vlgmr.msra.gmra.mxu1 %v6378_v6 }
 0x800   : > { %2782 = vmatmul.f32.vlgmr.msra.gmra.mxu2 %v6378_v6  ;;  %3261 = vmatpush.msrb.mxu3 %v3246_v7 }
 0x802   : > { %3262 = vmatpush.msrb.mxu3 %v3245_v40  ;;  %v2859_v40 = vperm.slane %v6473_v21, 0 }
 0x804   : > { %3263 = vmatpush.msrb.mxu3 %v3244_v61 }
 0x808   : > { %2991 = vmatmul.f32.vlgmr.msrb.gmra.mxu2 %v5996_v25  ;;  %v2720_v25 = vperm.slane %v2718_v31, 0 }
 0x810   : > { %2994 = vmatmul.f32.gmra.mxu2 %v6068_v45 }
 0x818   : > { %2997 = vmatmul.f32.gmra.mxu2 %v6127_v56  ;;  %v2721_v56 = vperm.slane %v2718_v31, 1  ;;  %v3241_v31 = vld [vmem:[#allocation15 + $0xa0] sm:$0xff] }
 0x820   : > { %3000 = vmatmul.f32.gmra.mxu2 %v6281_v33 }
 0x828   : > { %3003 = vmatmul.f32.gmra.mxu2 %v6311_v28  ;;  %v7008_v28 = vld [vmem:[#allocation42_spill] sm:$0xff] }
 0x829   : > { %v1760_v39 = vadd.f32 %v7008_v28, %v5975_v55 }
 0x830   : > { %3006 = vmatmul.f32.gmra.mxu2 %v6378_v6 }
 0x87c   : > { %v2743_v45 = vpop.f32.mrf.mxu0  ;;  %v2763_v34 = vpop.f32.mrf.mxu1 }
 0x87d   : > { %v2744_v54 = vadd.f32 %v2743_v45, %v2720_v25  ;;  %v2764_v8 = vadd.f32 %v2763_v34, %v2721_v56  ;;  %v3240_v25 = vld [vmem:[#allocation15 + $0x98] sm:$0xff]  ;;  %v3239_v56 = vld [vmem:[#allocation15 + $0x90] sm:$0xff] }
 0x87f   : > { %v2792_v36 = vadd.f32 %v2744_v54, %v1719_v15  ;;  %v2797_v17 = vadd.f32 %v2764_v8, %v1760_v39  ;;  %v3238_v54 = vld [vmem:[#allocation15 + $0x88] sm:$0xff]  ;;  %v3237_v8 = vld [vmem:[#allocation15 + $0x80] sm:$0xff] }
 0x881   : > { %v2793_v33 = vmul.f32 0.5, %v2792_v36  ;;  %v2798_v62 = vmul.f32 0.5, %v2797_v17 }
 0x883   : > { %4561 = vtanh.f32 %v2793_v33  ;;  %v2783_v29 = vpop.f32.mrf.mxu2 }
 0x884   : > { %4563 = vtanh.f32 %v2798_v62  ;;  %v2784_v43 = vadd.f32 %v2783_v29, %v2722_v41 }
 0x889   : > { %v4562_v19 = vpop.eup %4561 }
 0x88a   : > { %v2795_v20 = vmul.f32 0.5, %v4562_v19  ;;  %v4564_v24 = vpop.eup %4563 }
 0x88b   : > { %v2992_v3 = vpop.f32.mrf.mxu2  ;;  %v2800_v23 = vmul.f32 0.5, %v4564_v24 }
 0x88c   : > { %v2796_v53 = vadd.f32 0.5, %v2795_v20  ;;  %v6409_v11 = vadd.f32 %v6406_v47, %v2992_v3 }
 0x88d   : > { %v2801_v52 = vadd.f32 0.5, %v2800_v23 }
 0x88e   : > { %v2802_v32 = vmul.f32 %v2796_v53, %v2784_v43  ;;  %3018 = vadd.xlane.f32.xlu0 %v6409_v11  ;;  %v3042_v35 = vmul.f32 %v6409_v11, %v6409_v11 }
 0x890   : > { %v2803_v60 = vadd.f32 %v2802_v32, %v1801_v27  ;;  %3050 = vadd.xlane.f32.xlu1 %v3042_v35 }
 0x892   : > { %4565 = vtanh.f32 %v2803_v60 }
 0x893   : > { %v2995_v37 = vpop.f32.mrf.mxu2 }
 0x894   : > { %v6417_v30 = vadd.f32 %v6406_v47, %v2995_v37 }
 0x896   : > { %3020 = vadd.xlane.f32.xlu2 %v6417_v30  ;;  %v3043_v2 = vmul.f32 %v6417_v30, %v6417_v30 }
 0x898   : > { %v4566_v38 = vpop.eup %4565  ;;  %3052 = vadd.xlane.f32.xlu0 %v3043_v2 }
 0x899   : > { %v2805_v22 = vsub.f32 %v6378_v6, %v4566_v38  ;;  %v3243_v6 = vld [vmem:[#allocation15 + $0xb0] sm:$0xff] }
 0x89a   : > { %3264 = vmatpush.msrb.mxu3 %v3243_v6 }
 0x89b   : > { %v2998_v49 = vpop.f32.mrf.mxu2  ;;  %v2806_v46 = vmul.f32 %v2805_v22, %v2801_v52 }
 0x89c   : > { %v6424_v58 = vadd.f32 %v6406_v47, %v2998_v49  ;;  %3265 = vmatpush.msrb.mxu3 %v3242_v13  ;;  %v2860_v13 = vperm.slane %v6473_v21, 1 }
 0x89d   : > { %v6426_v26 = vadd.f32 %v4566_v38, %v2806_v46 }
 0x89e   : > { %3022 = vadd.xlane.f32.xlu1 %v6424_v58  ;;  %v3044_v57 = vmul.f32 %v6424_v58, %v6424_v58  ;;  %3266 = vmatpush.msrb.mxu3 %v3241_v31 }
 0x89f   : > { %2881 = vmatmul.f32.vlgmr.msra.gmra.mxu3 %v6426_v26  ;;  %2901 = vmatmul.f32.vlgmr.msra.gmra.mxu0 %v6426_v26 }
 0x8a0   : > { %3054 = vadd.xlane.f32.xlu2 %v3044_v57  ;;  %2921 = vmatmul.f32.vlgmr.msrb.gmra.mxu1 %v6426_v26 }
 0x8a1   : > { %3009 = vmatmul.f32.gmra.mxu2 %v6426_v26  ;;  %3267 = vmatpush.msrb.mxu3 %v3240_v25  ;;  %v7009_v25 = vld [vmem:[#allocation43_spill] sm:$0xff] }
 0x8a3   : > { %v3001_v59 = vpop.f32.mrf.mxu2  ;;  %3268 = vmatpush.msrb.mxu3 %v3239_v56 }
 0x8a4   : > { %v6436_v5 = vadd.f32 %v6406_v47, %v3001_v59 }
 0x8a5   : > { %3269 = vmatpush.msrb.mxu3 %v3238_v54 }
 0x8a6   : > { %3024 = vadd.xlane.f32.xlu0 %v6436_v5  ;;  %v3045_v63 = vmul.f32 %v6436_v5, %v6436_v5 }
 0x8a7   : > { %3270 = vmatpush.msrb.mxu3 %v3237_v8 }
 0x8a8   : > { %3056 = vadd.xlane.f32.xlu1 %v3045_v63  ;;  %v6467_v63 = vld [vmem:[#allocation16] ss:$0 sm:$0xff] }
 0x8ab   : > { %v3004_v12 = vpop.f32.mrf.mxu2 }
 0x8ac   : > { %v6442_v51 = vadd.f32 %v6406_v47, %v3004_v12 }
 0x8ae   : > { %3026 = vadd.xlane.f32.xlu2 %v6442_v51  ;;  %v3046_v18 = vmul.f32 %v6442_v51, %v6442_v51 }
 0x8b0   : > { %3058 = vadd.xlane.f32.xlu0 %v3046_v18 }
 0x8b3   : > { %v3007_v16 = vpop.f32.mrf.mxu2 }
 0x8b4   : > { %v6448_v44 = vadd.f32 %v6406_v47, %v3007_v16 }
 0x8b6   : > { %3028 = vadd.xlane.f32.xlu1 %v6448_v44  ;;  %v3047_v9 = vmul.f32 %v6448_v44, %v6448_v44 }
 0x8b8   : > { %3060 = vadd.xlane.f32.xlu2 %v3047_v9 }
 0x901   : > { %v3019_v45 = vpop.xlane.xlu0 %3018 }
 0x902   : > { %v3034_v42 = vmul.f32 0.03125, %v3019_v45  ;;  %v1722_v45 = vadd.f32 %v7009_v25, %v5946_v50 }
 0x903   : > { %v3051_v15 = vpop.xlane.xlu1 %3050 }
 0x904   : > { %v3074_v34 = vmul.f32 %v3034_v42, %v3034_v42  ;;  %v3066_v36 = vmul.f32 0.03125, %v3051_v15  ;;  %v3090_v57 = vsub.f32 %v6409_v11, %v3034_v42 }
 0x906   : > { %v3082_v33 = vsub.f32 %v3066_v36, %v3074_v34 }
 0x908   : > { %v3098_v28 = vadd.f32 1e-05, %v3082_v33 }
 0x909   : > { %v3021_v39 = vpop.xlane.xlu2 %3020 }
 0x90a   : > { %4567 = vrsqrt.f32 %v3098_v28  ;;  %v6453_v29 = vmul.f32 0.03125, %v3021_v39  ;;  %vm3112_vm1 = vweird.f32 %v3098_v28 }
 0x90b   : > { %v3053_v17 = vpop.xlane.xlu0 %3052 }
 0x90c   : > { %v3075_v62 = vmul.f32 %v6453_v29, %v6453_v29  ;;  %v3067_v41 = vmul.f32 0.03125, %v3053_v17  ;;  %v3091_v8 = vsub.f32 %v6417_v30, %v6453_v29 }
 0x90e   : > { %v3083_v19 = vsub.f32 %v3067_v41, %v3075_v62 }
 0x910   : > { %v4568_v20 = vpop.eup %4567  ;;  %v3099_v3 = vadd.f32 1e-05, %v3083_v19 }
 0x911   : > { %v3107_v43 = vmul.f32 %v4568_v20, %v3098_v28  ;;  %v3023_v53 = vpop.xlane.xlu1 %3022  ;;  %vm3113_vm0 = vweird.f32 %v4568_v20 }
 0x912   : > { %4569 = vrsqrt.f32 %v3099_v3  ;;  %v6457_v27 = vmul.f32 0.03125, %v3023_v53  ;;  %vm3114_vm2 = vmor %vm3112_vm1, %vm3113_vm0  ;;  %vm3122_vm4 = vweird.f32 %v3099_v3 }
 0x913   : > { %v3108_v32 = vmul.f32 %v4568_v20, %v3107_v43  ;;  %v3055_v35 = vpop.xlane.xlu2 %3054 }
 0x914   : > { %v3076_v60 = vmul.f32 %v6457_v27, %v6457_v27  ;;  %v3068_v24 = vmul.f32 0.03125, %v3055_v35 }
 0x915   : > { %v3109_v37 = vmul.f32 0.5, %v3108_v32  ;;  %v7012_v32 = vld [vmem:[#allocation44_spill] sm:$0xff] }
 0x916   : > { %v3084_v23 = vsub.f32 %v3068_v24, %v3076_v60  ;;  %v1763_v35 = vadd.f32 %v7012_v32, %v5975_v55 }
 0x917   : > { %v3110_v2 = vsub.f32 1.5, %v3109_v37 }
 0x918   : > { %v4570_v38 = vpop.eup %4569  ;;  %v6461_v52 = vadd.f32 1e-05, %v3084_v23 }
 0x919   : > { %v3111_v22 = vmul.f32 %v4568_v20, %v3110_v2  ;;  %v3117_v49 = vmul.f32 %v4570_v38, %v3099_v3  ;;  %v3025_v46 = vpop.xlane.xlu0 %3024  ;;  %vm3123_vm3 = vweird.f32 %v4570_v38 }
 0x91a   : > { %4571 = vrsqrt.f32 %v6461_v52  ;;  %v6465_v59 = vmul.f32 0.03125, %v3025_v46  ;;  %vm6490_vm6 = vmor %vm3122_vm4, %vm3123_vm3  ;;  %vm3132_vm8 = vweird.f32 %v6461_v52 }
 0x91b   : > { %v3115_v12 = vsel %vm3114_vm2, %v4568_v20, %v3111_v22  ;;  %v3118_v18 = vmul.f32 %v4570_v38, %v3117_v49  ;;  %v3057_v16 = vpop.xlane.xlu1 %3056 }
 0x91c   : > { %v3186_v9 = vmul.f32 %v3115_v12, %v3090_v57  ;;  %v3077_v1 = vmul.f32 %v6465_v59, %v6465_v59  ;;  %v3069_v48 = vmul.f32 0.03125, %v3057_v16  ;;  %v2902_v15 = vpop.f32.mrf.mxu0 }
 0x91d   : > { %v3119_v10 = vmul.f32 0.5, %v3118_v18  ;;  %v2903_v62 = vadd.f32 %v2902_v15, %v2860_v13  ;;  %v3092_v18 = vsub.f32 %v6424_v58, %v6457_v27  ;;  %v2861_v27 = vperm.slane %v6473_v21, 2 }
 0x91e   : > { %v3085_v11 = vsub.f32 %v3069_v48, %v3077_v1  ;;  %v3195_v0 = vmul.f32 %v6467_v63, %v3186_v9  ;;  %v3093_v15 = vsub.f32 %v6436_v5, %v6465_v59  ;;  %v7013_v5 = vld [vmem:[#allocation45_spill] sm:$0xff] }
 0x91f   : > { %v3120_v7 = vsub.f32 1.5, %v3119_v10  ;;  %v2936_v57 = vadd.f32 %v2903_v62, %v1763_v35  ;;  %v1804_v59 = vadd.f32 %v7013_v5, %v5981_v14 }
 0x920   : > { %v4572_v61 = vpop.eup %4571  ;;  %v6477_v6 = vadd.f32 1e-05, %v3085_v11  ;;  %v3204_v31 = vadd.f32 %v6471_v4, %v3195_v0 }
 0x921   : > { %v3121_v56 = vmul.f32 %v4570_v38, %v3120_v7  ;;  %v3127_v42 = vmul.f32 %v4572_v61, %v6461_v52  ;;  %v3027_v54 = vpop.xlane.xlu2 %3026  ;;  %vm3133_vm7 = vweird.f32 %v4572_v61 }
 0x922   : > { %4573 = vrsqrt.f32 %v6477_v6  ;;  %v6485_v34 = vmul.f32 0.03125, %v3027_v54  ;;  %v2882_v36 = vpop.f32.mrf.mxu3  ;;  %vm3212_vm5 = vcmp.ge.f32.partialorder %v3204_v31, 0.0  ;;  %v3220_v17 = vmul.f32 0.01, %v3204_v31  ;;  %vm3134_vm9 = vmor %vm3132_vm8, %vm3133_vm7 }
 0x923   : > { %v3128_v50 = vmul.f32 %v4572_v61, %v3127_v42  ;;  %v3059_v28 = vpop.xlane.xlu0 %3058  ;;  %v2883_v39 = vadd.f32 %v2882_v36, %v2859_v40  ;;  %v3125_v3 = vsel %vm6490_vm6, %v4570_v38, %v3121_v56  ;;  %v2937_v40 = vmul.f32 0.5, %v2936_v57  ;;  %v2922_v56 = vpop.f32.mrf.mxu1 }
 0x924   : > { %v3078_v41 = vmul.f32 %v6485_v34, %v6485_v34  ;;  %v3070_v19 = vmul.f32 0.03125, %v3059_v28  ;;  %v3010_v20 = vpop.f32.mrf.mxu2  ;;  %v3228_v53 = vsel %vm3212_vm5, %v3204_v31, %v3220_v17  ;;  %v3187_v24 = vmul.f32 %v3125_v3, %v3091_v8 }
 0x925   : > { %v3129_v43 = vmul.f32 0.5, %v3128_v50  ;;  %v2931_v30 = vadd.f32 %v2883_v39, %v1722_v45  ;;  %v6499_v29 = vadd.f32 %v6406_v47, %v3010_v20  ;;  %3271 = vmatmul.f32.vlgmr.msrb.gmra.mxu3 %v3228_v53  ;;  %vm3142_vm12 = vweird.f32 %v6477_v6 }
 0x926   : > { %v3086_v60 = vsub.f32 %v3070_v19, %v3078_v41  ;;  %v3196_v49 = vmul.f32 %v6467_v63, %v3187_v24  ;;  %v2923_v50 = vadd.f32 %v2922_v56, %v2861_v27  ;;  %v3094_v14 = vsub.f32 %v6442_v51, %v6485_v34 }
 0x927   : > { %v3130_v37 = vsub.f32 1.5, %v3129_v43  ;;  %v2932_v23 = vmul.f32 0.5, %v2931_v30  ;;  %3030 = vadd.xlane.f32.xlu0 %v6499_v29  ;;  %v3048_v2 = vmul.f32 %v6499_v29, %v6499_v29 }
 0x928   : > { %v4574_v38 = vpop.eup %4573  ;;  %v6507_v22 = vadd.f32 1e-05, %v3086_v60  ;;  %v3205_v1 = vadd.f32 %v6471_v4, %v3196_v49 }
 0x929   : > { %v3131_v46 = vmul.f32 %v4572_v61, %v3130_v37  ;;  %v3137_v55 = vmul.f32 %v4574_v38, %v6477_v6  ;;  %4575 = vtanh.f32 %v2932_v23  ;;  %3062 = vadd.xlane.f32.xlu1 %v3048_v2  ;;  %v3029_v12 = vpop.xlane.xlu1 %3028  ;;  %vm3143_vm11 = vweird.f32 %v4574_v38 }
 0x92a   : > { %4577 = vrsqrt.f32 %v6507_v22  ;;  %v6515_v16 = vmul.f32 0.03125, %v3029_v12  ;;  %vm3213_vm10 = vcmp.ge.f32.partialorder %v3205_v1, 0.0  ;;  %v3221_v58 = vmul.f32 0.01, %v3205_v1  ;;  %vm3144_vm13 = vmor %vm3142_vm12, %vm3143_vm11 }
 0x92b   : > { %v3138_v52 = vmul.f32 %v4574_v38, %v3137_v55  ;;  %v3061_v9 = vpop.xlane.xlu2 %3060  ;;  %v3135_v48 = vsel %vm3134_vm9, %v4572_v61, %v3131_v46  ;;  %4579 = vtanh.f32 %v2937_v40  ;;  %vm3152_vm0 = vweird.f32 %v6507_v22 }
 0x92c   : > { %v3079_v10 = vmul.f32 %v6515_v16, %v6515_v16  ;;  %v3071_v11 = vmul.f32 0.03125, %v3061_v9  ;;  %v3188_v0 = vmul.f32 %v3135_v48, %v3092_v18  ;;  %v3229_v42 = vsel %vm3213_vm10, %v3205_v1, %v3221_v58 }
 0x92d   : > { %v3139_v7 = vmul.f32 0.5, %v3138_v52  ;;  %3274 = vmatmul.f32.gmra.mxu3 %v3229_v42  ;;  %v3095_v1 = vsub.f32 %v6448_v44, %v6515_v16  ;;  %v6544_v42 = vld [vmem:[%s6942_s11 + $0x1] ss:$0 sm:$0xff] }
 0x92e   : > { %v3087_v13 = vsub.f32 %v3071_v11, %v3079_v10  ;;  %v3197_v31 = vmul.f32 %v6467_v63, %v3188_v0 }
 0x92f   : > { %v4576_v25 = vpop.eup %4575  ;;  %v3140_v45 = vsub.f32 1.5, %v3139_v7 }
 0x930   : > { %v4578_v61 = vpop.eup %4577  ;;  %v2934_v54 = vmul.f32 0.5, %v4576_v25  ;;  %v3103_v36 = vadd.f32 1e-05, %v3087_v13  ;;  %v3206_v8 = vadd.f32 %v6471_v4, %v3197_v31 }
 0x931   : > { %v3141_v33 = vmul.f32 %v4574_v38, %v3140_v45  ;;  %v3147_v21 = vmul.f32 %v4578_v61, %v6507_v22  ;;  %v4580_v30 = vpop.eup %4579  ;;  %vm3153_vm15 = vweird.f32 %v4578_v61 }
 0x932   : > { %v2935_v28 = vadd.f32 0.5, %v2934_v54  ;;  %4581 = vrsqrt.f32 %v3103_v36  ;;  %vm3214_vm14 = vcmp.ge.f32.partialorder %v3206_v8, 0.0  ;;  %v3222_v17 = vmul.f32 0.01, %v3206_v8  ;;  %vm3154_vm1 = vmor %vm3152_vm0, %vm3153_vm15 }
 0x933   : > { %v3148_v39 = vmul.f32 %v4578_v61, %v3147_v21  ;;  %v3145_v62 = vsel %vm3144_vm13, %v4574_v38, %v3141_v33  ;;  %v2939_v23 = vmul.f32 0.5, %v4580_v30  ;;  %vm3162_vm4 = vweird.f32 %v3103_v36 }
 0x934   : > { %v2941_v41 = vmul.f32 %v2935_v28, %v2923_v50  ;;  %v3189_v19 = vmul.f32 %v3145_v62, %v3093_v15  ;;  %v3230_v3 = vsel %vm3214_vm14, %v3206_v8, %v3222_v17 }
 0x935   : > { %v3149_v20 = vmul.f32 0.5, %v3148_v39  ;;  %3277 = vmatmul.f32.gmra.mxu3 %v3230_v3  ;;  %v2940_v52 = vadd.f32 0.5, %v2939_v23  ;;  %v3530_v23 = vld [vmem:[#allocation15 + $0x168] sm:$0xff] }
 0x936   : > { %v3198_v6 = vmul.f32 %v6467_v63, %v3189_v19  ;;  %v2942_v43 = vadd.f32 %v2941_v41, %v1804_v59 }
 0x937   : > { %v3150_v53 = vsub.f32 1.5, %v3149_v20 }
 0x938   : > { %v4582_v32 = vpop.eup %4581  ;;  %v3207_v35 = vadd.f32 %v6471_v4, %v3198_v6  ;;  %4583 = vtanh.f32 %v2942_v43 }
 0x939   : > { %v3151_v60 = vmul.f32 %v4578_v61, %v3150_v53  ;;  %v3157_v24 = vmul.f32 %v4582_v32, %v3103_v36  ;;  %vm3163_vm3 = vweird.f32 %v4582_v32 }
 0x93a   : > { %vm3215_vm2 = vcmp.ge.f32.partialorder %v3207_v35, 0.0  ;;  %v3223_v37 = vmul.f32 0.01, %v3207_v35  ;;  %vm3164_vm5 = vmor %vm3162_vm4, %vm3163_vm3 }
 0x93b   : > { %v3158_v2 = vmul.f32 %v4582_v32, %v3157_v24  ;;  %v3155_v38 = vsel %vm3154_vm1, %v4578_v61, %v3151_v60  ;;  %v3532_v24 = vld [vmem:[#allocation15 + $0x178] sm:$0xff] }
 0x93c   : > { %v3190_v49 = vmul.f32 %v3155_v38, %v3094_v14  ;;  %v3231_v55 = vsel %vm3215_vm2, %v3207_v35, %v3223_v37  ;;  %3535 = vmatpush.msrb.mxu0 %v3532_v24  ;;  %4258 = vmatpush.msra.mxu2 %v3532_v24  ;;  %v3531_v14 = vld [vmem:[#allocation15 + $0x170] sm:$0xff]  ;;  %v3528_v38 = vld [vmem:[#allocation15 + $0x158] sm:$0xff] }
 0x93d   : > { %v3159_v46 = vmul.f32 0.5, %v3158_v2  ;;  %3280 = vmatmul.f32.gmra.mxu3 %v3231_v55  ;;  %v3529_v2 = vld [vmem:[#allocation15 + $0x160] sm:$0xff] }
 0x93e   : > { %v4584_v57 = vpop.eup %4583  ;;  %v3199_v12 = vmul.f32 %v6467_v63, %v3190_v49  ;;  %3536 = vmatpush.msrb.mxu0 %v3531_v14  ;;  %4259 = vmatpush.msra.mxu2 %v3531_v14  ;;  %v3527_v49 = vld [vmem:[#allocation15 + $0x150] sm:$0xff] }
 0x93f   : > { %v3160_v18 = vsub.f32 1.5, %v3159_v46  ;;  %v2944_v22 = vsub.f32 %v6426_v26, %v4584_v57  ;;  %v3526_v46 = vld [vmem:[#allocation15 + $0x148] sm:$0xff] }
 0x940   : > { %v3208_v51 = vadd.f32 %v6471_v4, %v3199_v12  ;;  %3537 = vmatpush.msrb.mxu0 %v3530_v23  ;;  %4260 = vmatpush.msra.mxu2 %v3530_v23  ;;  %v3524_v12 = vld [vmem:[#allocation15 + $0x138] sm:$0xff] }
 0x941   : > { %v3161_v34 = vmul.f32 %v4582_v32, %v3160_v18  ;;  %v2945_v9 = vmul.f32 %v2944_v22, %v2940_v52  ;;  %v3523_v52 = vld [vmem:[#allocation15 + $0x130] sm:$0xff] }
 0x942   : > { %vm3216_vm6 = vcmp.ge.f32.partialorder %v3208_v51, 0.0  ;;  %v3224_v48 = vmul.f32 0.01, %v3208_v51  ;;  %3538 = vmatpush.msrb.mxu0 %v3529_v2  ;;  %4261 = vmatpush.msra.mxu2 %v3529_v2 }
 0x943   : > { %v2946_v10 = vadd.f32 %v4584_v57, %v2945_v9  ;;  %v3165_v11 = vsel %vm3164_vm5, %v4582_v32, %v3161_v34  ;;  %v3525_v57 = vld [vmem:[#allocation15 + $0x140] sm:$0xff]  ;;  %v3522_v9 = vld [vmem:[#allocation15 + $0x128] sm:$0xff] }
 0x944   : > { %v3191_v0 = vmul.f32 %v3165_v11, %v3095_v1  ;;  %v3232_v7 = vsel %vm3216_vm6, %v3208_v51, %v3224_v48  ;;  %3539 = vmatpush.msrb.mxu0 %v3528_v38  ;;  %4262 = vmatpush.msra.mxu2 %v3528_v38 }
 0x945   : > { %3012 = vmatmul.f32.gmra.mxu2 %v2946_v10  ;;  %3283 = vmatmul.f32.gmra.mxu3 %v3232_v7 }
 0x946   : > { %v3200_v40 = vmul.f32 %v6467_v63, %v3191_v0  ;;  %3540 = vmatpush.msrb.mxu0 %v3527_v49  ;;  %4263 = vmatpush.msra.mxu2 %v3527_v49  ;;  %v3521_v0 = vld [vmem:[#allocation15 + $0x120] sm:$0xff] }
 0x948   : > { %v3209_v26 = vadd.f32 %v6471_v4, %v3200_v40  ;;  %3541 = vmatpush.msrb.mxu0 %v3526_v46  ;;  %4264 = vmatpush.msra.mxu2 %v3526_v46 }
 0x94a   : > { %vm3217_vm7 = vcmp.ge.f32.partialorder %v3209_v26, 0.0  ;;  %v3225_v58 = vmul.f32 0.01, %v3209_v26  ;;  %3542 = vmatpush.msrb.mxu0 %v3525_v57  ;;  %4265 = vmatpush.msra.mxu2 %v3525_v57 }
 0x94c   : > { %v3233_v27 = vsel %vm3217_vm7, %v3209_v26, %v3225_v58  ;;  %3543 = vmatpush.msrb.mxu0 %v3524_v12  ;;  %4266 = vmatpush.msra.mxu2 %v3524_v12  ;;  %v3520_v58 = vld [vmem:[#allocation15 + $0x118] sm:$0xff] }
 0x94d   : > { %3286 = vmatmul.f32.gmra.mxu3 %v3233_v27 }
 0x94e   : > { %3544 = vmatpush.msrb.mxu0 %v3523_v52  ;;  %4267 = vmatpush.msra.mxu2 %v3523_v52 }
 0x950   : > { %3545 = vmatpush.msrb.mxu0 %v3522_v9  ;;  %4268 = vmatpush.msra.mxu2 %v3522_v9 }
 0x952   : > { %3546 = vmatpush.msrb.mxu0 %v3521_v0  ;;  %4269 = vmatpush.msra.mxu2 %v3521_v0 }
 0x954   : > { %3547 = vmatpush.msrb.mxu0 %v3520_v58  ;;  %4270 = vmatpush.msra.mxu2 %v3520_v58 }
 0x99a   : > { %v3031_v13 = vpop.xlane.xlu0 %3030 }
 0x99b   : > { %v3040_v31 = vmul.f32 0.03125, %v3031_v13 }
 0x99c   : > { %v3063_v44 = vpop.xlane.xlu1 %3062 }
 0x99d   : > { %v3080_v16 = vmul.f32 %v3040_v31, %v3040_v31  ;;  %v3072_v25 = vmul.f32 0.03125, %v3063_v44  ;;  %v3096_v28 = vsub.f32 %v6499_v29, %v3040_v31  ;;  %v3519_v31 = vld [vmem:[#allocation15 + $0x110] sm:$0xff] }
 0x99e   : > { %3548 = vmatpush.msrb.mxu0 %v3519_v31  ;;  %4271 = vmatpush.msra.mxu2 %v3519_v31 }
 0x99f   : > { %v3088_v45 = vsub.f32 %v3072_v25, %v3080_v16  ;;  %v3518_v25 = vld [vmem:[#allocation15 + $0x108] sm:$0xff] }
 0x9a0   : > { %3549 = vmatpush.msrb.mxu0 %v3518_v25  ;;  %4272 = vmatpush.msra.mxu2 %v3518_v25 }
 0x9a1   : > { %v3104_v56 = vadd.f32 1e-05, %v3088_v45 }
 0x9a3   : > { %4585 = vrsqrt.f32 %v3104_v56  ;;  %vm3172_vm9 = vweird.f32 %v3104_v56 }
 0x9a8   : > { %v3272_v15 = vpop.f32.mrf.mxu3 }
 0x9a9   : > { %v4586_v61 = vpop.eup %4585  ;;  %v6547_v36 = vadd.f32 %v6544_v42, %v3272_v15 }
 0x9aa   : > { %v3167_v54 = vmul.f32 %v4586_v61, %v3104_v56  ;;  %vm3173_vm8 = vweird.f32 %v4586_v61 }
 0x9ab   : > { %3298 = vadd.xlane.f32.xlu1 %v6547_v36  ;;  %vm3174_vm10 = vmor %vm3172_vm9, %vm3173_vm8  ;;  %v3322_v30 = vmul.f32 %v6547_v36, %v6547_v36 }
 0x9ac   : > { %v3168_v8 = vmul.f32 %v4586_v61, %v3167_v54 }
 0x9ae   : > { %v3169_v33 = vmul.f32 0.5, %v3168_v8 }
 0x9b0   : > { %v3170_v21 = vsub.f32 1.5, %v3169_v33  ;;  %v3275_v39 = vpop.f32.mrf.mxu3 }
 0x9b1   : > { %v6552_v17 = vadd.f32 %v6544_v42, %v3275_v39 }
 0x9b2   : > { %v3171_v50 = vmul.f32 %v4586_v61, %v3170_v21 }
 0x9b3   : > { %v3323_v59 = vmul.f32 %v6552_v17, %v6552_v17 }
 0x9b4   : > { %v3175_v62 = vsel %vm3174_vm10, %v4586_v61, %v3171_v50  ;;  %v3517_v61 = vld [vmem:[#allocation15 + $0x100] sm:$0xff] }
 0x9b5   : > { %v3192_v5 = vmul.f32 %v3175_v62, %v3096_v28  ;;  %3332 = vadd.xlane.f32.xlu1 %v3323_v59  ;;  %3550 = vmatpush.msrb.mxu0 %v3517_v61 }
 0x9b6   : > { %4273 = vmatpush.msra.mxu2 %v3517_v61 }
 0x9b7   : > { %v3201_v41 = vmul.f32 %v6467_v63, %v3192_v5 }
 0x9b8   : > { %v3278_v53 = vpop.f32.mrf.mxu3 }
 0x9b9   : > { %v3210_v19 = vadd.f32 %v6471_v4, %v3201_v41  ;;  %v6568_v32 = vadd.f32 %v6544_v42, %v3278_v53 }
 0x9bb   : > { %vm3218_vm11 = vcmp.ge.f32.partialorder %v3210_v19, 0.0  ;;  %v3226_v20 = vmul.f32 0.01, %v3210_v19 }
 0x9bd   : > { %v3234_v3 = vsel %vm3218_vm11, %v3210_v19, %v3226_v20 }
 0x9be   : > { %3289 = vmatmul.f32.gmra.mxu3 %v3234_v3 }
 0x9c0   : > { %v3281_v35 = vpop.f32.mrf.mxu3 }
 0x9c1   : > { %v6574_v60 = vadd.f32 %v6544_v42, %v3281_v35 }
 0x9c3   : > { %v3325_v8 = vmul.f32 %v6574_v60, %v6574_v60 }
 0x9c8   : > { %v3013_v29 = vpop.f32.mrf.mxu2  ;;  %v6577_v37 = vpop.f32.mrf.mxu3 }
 0x9c9   : > { %v6559_v6 = vadd.f32 %v6406_v47, %v3013_v29  ;;  %v3324_v47 = vmul.f32 %v6568_v32, %v6568_v32  ;;  %v6607_v29 = vadd.f32 %v6544_v42, %v6577_v37 }
 0x9cb   : > { %3032 = vadd.xlane.f32.xlu2 %v6559_v6  ;;  %v3049_v43 = vmul.f32 %v6559_v6, %v6559_v6 }
 0x9cd   : > { %3064 = vadd.xlane.f32.xlu0 %v3049_v43 }
 0x9d0   : > { %v6579_v55 = vpop.f32.mrf.mxu3 }
 0x9d1   : > { %v6612_v14 = vadd.f32 %v6544_v42, %v6579_v55 }
 0x9d3   : > { %3330 = vadd.xlane.f32.xlu2 %v3322_v30  ;;  %v3327_v12 = vmul.f32 %v6612_v14, %v6612_v14 }
 0x9d5   : > { %3300 = vadd.xlane.f32.xlu0 %v6552_v17 }
 0x9db   : > { %3302 = vadd.xlane.f32.xlu2 %v6568_v32 }
 0x9dd   : > { %3334 = vadd.xlane.f32.xlu0 %v3324_v47 }
 0x9e5   : > { %3304 = vadd.xlane.f32.xlu0 %v6574_v60 }
 0xa1e   : > { %v3299_v51 = vpop.xlane.xlu1 %3298 }
 0xa1f   : > { %v6588_v7 = vmul.f32 0.03125, %v3299_v51 }
 0xa21   : > { %v3354_v44 = vmul.f32 %v6588_v7, %v6588_v7 }
 0xa28   : > { %v3333_v45 = vpop.xlane.xlu1 %3332 }
 0xa29   : > { %v3347_v33 = vmul.f32 0.03125, %v3333_v45 }
 0xa3e   : > { %v3033_v18 = vpop.xlane.xlu2 %3032 }
 0xa3f   : > { %v6581_v22 = vmul.f32 0.03125, %v3033_v18 }
 0xa40   : > { %v3065_v34 = vpop.xlane.xlu0 %3064 }
 0xa41   : > { %v3081_v1 = vmul.f32 %v6581_v22, %v6581_v22  ;;  %v3290_v48 = vpop.f32.mrf.mxu3  ;;  %v3073_v10 = vmul.f32 0.03125, %v3065_v34  ;;  %v3097_v37 = vsub.f32 %v6559_v6, %v6581_v22  ;;  %v3370_v6 = vsub.f32 %v6547_v36, %v6588_v7  ;;  %v6621_v22 = vld [vmem:[#allocation16 + $0x1] ss:$0 sm:$0xff] }
 0xa42   : > { %v6586_v11 = vadd.f32 %v6544_v42, %v3290_v48 }
 0xa43   : > { %v3089_v40 = vsub.f32 %v3073_v10, %v3081_v1 }
 0xa44   : > { %3310 = vadd.xlane.f32.xlu1 %v6586_v11  ;;  %v3328_v26 = vmul.f32 %v6586_v11, %v6586_v11 }
 0xa45   : > { %v3105_v27 = vadd.f32 1e-05, %v3089_v40 }
 0xa46   : > { %3342 = vadd.xlane.f32.xlu2 %v3328_v26  ;;  %v3331_v13 = vpop.xlane.xlu2 %3330 }
 0xa47   : > { %4587 = vrsqrt.f32 %v3105_v27  ;;  %v3346_v16 = vmul.f32 0.03125, %v3331_v13  ;;  %vm3182_vm13 = vweird.f32 %v3105_v27 }
 0xa48   : > { %v3301_v56 = vpop.xlane.xlu0 %3300 }
 0xa49   : > { %v3362_v15 = vsub.f32 %v3346_v16, %v3354_v44  ;;  %v6595_v54 = vmul.f32 0.03125, %v3301_v56 }
 0xa4b   : > { %v3378_v21 = vadd.f32 1e-05, %v3362_v15  ;;  %v3355_v50 = vmul.f32 %v6595_v54, %v6595_v54  ;;  %v3371_v36 = vsub.f32 %v6552_v17, %v6595_v54 }
 0xa4c   : > { %3336 = vadd.xlane.f32.xlu1 %v3325_v8 }
 0xa4d   : > { %v4588_v28 = vpop.eup %4587  ;;  %4589 = vrsqrt.f32 %v3378_v21  ;;  %v3363_v39 = vsub.f32 %v3347_v33, %v3355_v50  ;;  %vm3392_vm0 = vweird.f32 %v3378_v21 }
 0xa4e   : > { %v3177_v62 = vmul.f32 %v4588_v28, %v3105_v27  ;;  %v3303_v5 = vpop.xlane.xlu2 %3302  ;;  %vm3183_vm12 = vweird.f32 %v4588_v28  ;;  %v6624_v27 = vld [vmem:[#allocation18 + $0x1] ss:$0 sm:$0xff] }
 0xa4f   : > { %v3379_v59 = vadd.f32 1e-05, %v3363_v39  ;;  %v6601_v41 = vmul.f32 0.03125, %v3303_v5  ;;  %vm3184_vm14 = vmor %vm3182_vm13, %vm3183_vm12 }
 0xa50   : > { %v3178_v19 = vmul.f32 %v4588_v28, %v3177_v62  ;;  %v3335_v20 = vpop.xlane.xlu0 %3334 }
 0xa51   : > { %4591 = vrsqrt.f32 %v3379_v59  ;;  %v3356_v3 = vmul.f32 %v6601_v41, %v6601_v41  ;;  %v3348_v30 = vmul.f32 0.03125, %v3335_v20  ;;  %vm3402_vm3 = vweird.f32 %v3379_v59 }
 0xa52   : > { %v3179_v43 = vmul.f32 0.5, %v3178_v19  ;;  %v3372_v33 = vsub.f32 %v6568_v32, %v6601_v41 }
 0xa53   : > { %v4590_v53 = vpop.eup %4589  ;;  %v3364_v24 = vsub.f32 %v3348_v30, %v3356_v3 }
 0xa54   : > { %v3180_v47 = vsub.f32 1.5, %v3179_v43  ;;  %v3387_v35 = vmul.f32 %v4590_v53, %v3378_v21  ;;  %3306 = vadd.xlane.f32.xlu1 %v6607_v29  ;;  %vm3393_vm15 = vweird.f32 %v4590_v53 }
 0xa55   : > { %v3380_v38 = vadd.f32 1e-05, %v3364_v24  ;;  %vm3394_vm1 = vmor %vm3392_vm0, %vm3393_vm15 }
 0xa56   : > { %v3181_v23 = vmul.f32 %v4588_v28, %v3180_v47  ;;  %v3388_v2 = vmul.f32 %v4590_v53, %v3387_v35 }
 0xa57   : > { %v4592_v49 = vpop.eup %4591  ;;  %4593 = vrsqrt.f32 %v3380_v38  ;;  %vm3412_vm8 = vweird.f32 %v3380_v38 }
 0xa58   : > { %v3389_v46 = vmul.f32 0.5, %v3388_v2  ;;  %v3397_v57 = vmul.f32 %v4592_v49, %v3379_v59  ;;  %v3185_v18 = vsel %vm3184_vm14, %v4588_v28, %v3181_v23  ;;  %vm3403_vm2 = vweird.f32 %v4592_v49  ;;  %v3305_v43 = vpop.xlane.xlu0 %3304 }
 0xa59   : > { %v3193_v51 = vmul.f32 %v3185_v18, %v3097_v37  ;;  %vm3404_vm5 = vmor %vm3402_vm3, %vm3403_vm2 }
 0xa5a   : > { %v3390_v52 = vsub.f32 1.5, %v3389_v46  ;;  %v3398_v55 = vmul.f32 %v4592_v49, %v3397_v57 }
 0xa5b   : > { %v3202_v1 = vmul.f32 %v6467_v63, %v3193_v51 }
 0xa5c   : > { %v3391_v34 = vmul.f32 %v4590_v53, %v3390_v52  ;;  %v3399_v9 = vmul.f32 0.5, %v3398_v55  ;;  %3340 = vadd.xlane.f32.xlu1 %v3327_v12 }
 0xa5d   : > { %v4594_v48 = vpop.eup %4593  ;;  %v3211_v40 = vadd.f32 %v6471_v4, %v3202_v1 }
 0xa5e   : > { %v3395_v10 = vsel %vm3394_vm1, %v4590_v53, %v3391_v34  ;;  %v3400_v0 = vsub.f32 1.5, %v3399_v9  ;;  %v3407_v58 = vmul.f32 %v4594_v48, %v3380_v38  ;;  %vm3413_vm6 = vweird.f32 %v4594_v48 }
 0xa5f   : > { %v3466_v26 = vmul.f32 %v3395_v10, %v3370_v6  ;;  %vm3219_vm4 = vcmp.ge.f32.partialorder %v3211_v40, 0.0  ;;  %v3227_v63 = vmul.f32 0.01, %v3211_v40  ;;  %vm3414_vm9 = vmor %vm3412_vm8, %vm3413_vm6  ;;  %v3317_v53 = vmul.f32 0.03125, %v3305_v43  ;;  %v3806_v43 = vld [vmem:[%s6945_s14 + $0x50] sm:$0xff] }
 0xa60   : > { %v3401_v13 = vmul.f32 %v4592_v49, %v3400_v0  ;;  %v3408_v7 = vmul.f32 %v4594_v48, %v3407_v58 }
 0xa61   : > { %v3475_v31 = vmul.f32 %v6621_v22, %v3466_v26  ;;  %v3235_v16 = vsel %vm3219_vm4, %v3211_v40, %v3227_v63  ;;  %v3357_v23 = vmul.f32 %v3317_v53, %v3317_v53  ;;  %v3373_v26 = vsub.f32 %v6574_v60, %v3317_v53 }
 0xa62   : > { %v3405_v44 = vsel %vm3404_vm5, %v4592_v49, %v3401_v13  ;;  %v3409_v45 = vmul.f32 0.5, %v3408_v7  ;;  %3292 = vmatmul.f32.gmra.mxu3 %v3235_v16 }
 0xa63   : > { %v3467_v25 = vmul.f32 %v3405_v44, %v3371_v36  ;;  %v3484_v4 = vadd.f32 %v6624_v27, %v3475_v31 }
 0xa64   : > { %v3410_v61 = vsub.f32 1.5, %v3409_v45 }
 0xa65   : > { %v3476_v56 = vmul.f32 %v6621_v22, %v3467_v25  ;;  %vm3492_vm7 = vcmp.ge.f32.partialorder %v3484_v4, 0.0  ;;  %v3500_v15 = vmul.f32 0.01, %v3484_v4 }
 0xa66   : > { %v3411_v8 = vmul.f32 %v4594_v48, %v3410_v61 }
 0xa67   : > { %v3508_v17 = vsel %vm3492_vm7, %v3484_v4, %v3500_v15  ;;  %v3485_v54 = vadd.f32 %v6624_v27, %v3476_v56  ;;  %v6651_v56 = vld [vmem:[%s6942_s11 + $0x2] ss:$0 sm:$0xff] }
 0xa68   : > { %3551 = vmatmul.f32.vlgmr.msrb.gmra.mxu0 %v3508_v17  ;;  %v3415_v21 = vsel %vm3414_vm9, %v4594_v48, %v3411_v8  ;;  %v3326_v8 = vmul.f32 %v6607_v29, %v6607_v29 }
 0xa69   : > { %v3468_v50 = vmul.f32 %v3415_v21, %v3372_v33  ;;  %v3501_v28 = vmul.f32 0.01, %v3485_v54  ;;  %vm3493_vm10 = vcmp.ge.f32.partialorder %v3485_v54, 0.0 }
 0xa6b   : > { %v3477_v39 = vmul.f32 %v6621_v22, %v3468_v50  ;;  %v3509_v62 = vsel %vm3493_vm10, %v3485_v54, %v3501_v28  ;;  %v3811_v28 = vld [vmem:[%s6945_s14 + $0x78] sm:$0xff] }
 0xa6c   : > { %3816 = vmatpush.msra.mxu1 %v3811_v28  ;;  %4274 = vmatpush.msra.mxu3 %v3811_v28 }
 0xa6d   : > { %v3486_v5 = vadd.f32 %v6624_v27, %v3477_v39  ;;  %v3810_v39 = vld [vmem:[%s6945_s14 + $0x70] sm:$0xff] }
 0xa6e   : > { %3817 = vmatpush.msra.mxu1 %v3810_v39  ;;  %4275 = vmatpush.msra.mxu3 %v3810_v39 }
 0xa6f   : > { %v3502_v59 = vmul.f32 0.01, %v3486_v5  ;;  %vm3494_vm11 = vcmp.ge.f32.partialorder %v3486_v5, 0.0 }
 0xa70   : > { %3554 = vmatmul.f32.gmra.mxu0 %v3509_v62  ;;  %v3809_v62 = vld [vmem:[%s6945_s14 + $0x68] sm:$0xff] }
 0xa71   : > { %v3510_v19 = vsel %vm3494_vm11, %v3486_v5, %v3502_v59  ;;  %3818 = vmatpush.msra.mxu1 %v3809_v62  ;;  %4276 = vmatpush.msra.mxu3 %v3809_v62  ;;  %v3808_v5 = vld [vmem:[%s6945_s14 + $0x60] sm:$0xff]  ;;  %v3807_v59 = vld [vmem:[%s6945_s14 + $0x58] sm:$0xff] }
 0xa73   : > { %3819 = vmatpush.msra.mxu1 %v3808_v5  ;;  %4277 = vmatpush.msra.mxu3 %v3808_v5 }
 0xa75   : > { %3820 = vmatpush.msra.mxu1 %v3807_v59  ;;  %4278 = vmatpush.msra.mxu3 %v3807_v59 }
 0xa77   : > { %3821 = vmatpush.msra.mxu1 %v3806_v43  ;;  %4279 = vmatpush.msra.mxu3 %v3806_v43 }
 0xa78   : > { %3557 = vmatmul.f32.gmra.mxu0 %v3510_v19 }
 0xab7   : > { %v3311_v20 = vpop.xlane.xlu1 %3310 }
 0xab8   : > { %v3320_v3 = vmul.f32 0.03125, %v3311_v20 }
 0xab9   : > { %v3343_v32 = vpop.xlane.xlu2 %3342 }
 0xaba   : > { %v3360_v41 = vmul.f32 %v3320_v3, %v3320_v3  ;;  %v3352_v30 = vmul.f32 0.03125, %v3343_v32  ;;  %v3376_v9 = vsub.f32 %v6586_v11, %v3320_v3 }
 0xabc   : > { %v3368_v47 = vsub.f32 %v3352_v30, %v3360_v41 }
 0xabe   : > { %v3384_v35 = vadd.f32 1e-05, %v3368_v47 }
 0xabf   : > { %v3337_v24 = vpop.xlane.xlu1 %3336 }
 0xac0   : > { %4595 = vrsqrt.f32 %v3384_v35  ;;  %v3349_v2 = vmul.f32 0.03125, %v3337_v24  ;;  %vm3452_vm13 = vweird.f32 %v3384_v35  ;;  %v3805_v24 = vld [vmem:[%s6945_s14 + $0x48] sm:$0xff] }
 0xac1   : > { %3822 = vmatpush.msra.mxu1 %v3805_v24  ;;  %4280 = vmatpush.msra.mxu3 %v3805_v24 }
 0xac2   : > { %v3365_v38 = vsub.f32 %v3349_v2, %v3357_v23 }
 0xac4   : > { %v3381_v49 = vadd.f32 1e-05, %v3365_v38 }
 0xac6   : > { %v4596_v37 = vpop.eup %4595  ;;  %4597 = vrsqrt.f32 %v3381_v49  ;;  %vm3422_vm0 = vweird.f32 %v3381_v49 }
 0xac7   : > { %v3447_v46 = vmul.f32 %v4596_v37, %v3384_v35  ;;  %vm3453_vm12 = vweird.f32 %v4596_v37  ;;  %v3307_v19 = vpop.xlane.xlu1 %3306 }
 0xac8   : > { %vm3454_vm14 = vmor %vm3452_vm13, %vm3453_vm12  ;;  %v6705_v2 = vmul.f32 0.03125, %v3307_v19 }
 0xac9   : > { %v3448_v57 = vmul.f32 %v4596_v37, %v3447_v46  ;;  %v3803_v46 = vld [vmem:[%s6945_s14 + $0x38] sm:$0xff] }
 0xacb   : > { %v3449_v12 = vmul.f32 0.5, %v3448_v57 }
 0xacc   : > { %v4598_v18 = vpop.eup %4597 }
 0xacd   : > { %v3450_v52 = vsub.f32 1.5, %v3449_v12  ;;  %v3417_v55 = vmul.f32 %v4598_v18, %v3381_v49  ;;  %vm3423_vm15 = vweird.f32 %v4598_v18  ;;  %v3804_v49 = vld [vmem:[%s6945_s14 + $0x40] sm:$0xff] }
 0xace   : > { %vm3424_vm1 = vmor %vm3422_vm0, %vm3423_vm15  ;;  %3823 = vmatpush.msra.mxu1 %v3804_v49  ;;  %4281 = vmatpush.msra.mxu3 %v3804_v49 }
 0xacf   : > { %v3451_v51 = vmul.f32 %v4596_v37, %v3450_v52  ;;  %v3418_v34 = vmul.f32 %v4598_v18, %v3417_v55  ;;  %v3802_v55 = vld [vmem:[%s6945_s14 + $0x30] sm:$0xff] }
 0xad0   : > { %3824 = vmatpush.msra.mxu1 %v3803_v46  ;;  %4282 = vmatpush.msra.mxu3 %v3803_v46 }
 0xad1   : > { %v3455_v1 = vsel %vm3454_vm14, %v4596_v37, %v3451_v51  ;;  %v3419_v6 = vmul.f32 0.5, %v3418_v34  ;;  %v3341_v51 = vpop.xlane.xlu1 %3340 }
 0xad2   : > { %v3472_v48 = vmul.f32 %v3455_v1, %v3376_v9  ;;  %3825 = vmatpush.msra.mxu1 %v3802_v55  ;;  %4283 = vmatpush.msra.mxu3 %v3802_v55 }
 0xad3   : > { %v3420_v10 = vsub.f32 1.5, %v3419_v6  ;;  %v3801_v6 = vld [vmem:[%s6945_s14 + $0x28] sm:$0xff] }
 0xad4   : > { %v3481_v0 = vmul.f32 %v6621_v22, %v3472_v48  ;;  %3826 = vmatpush.msra.mxu1 %v3801_v6  ;;  %4284 = vmatpush.msra.mxu3 %v3801_v6 }
 0xad5   : > { %v3421_v40 = vmul.f32 %v4598_v18, %v3420_v10 }
 0xad6   : > { %v3490_v58 = vadd.f32 %v6624_v27, %v3481_v0  ;;  %v3800_v0 = vld [vmem:[%s6945_s14 + $0x20] sm:$0xff] }
 0xad7   : > { %v3425_v13 = vsel %vm3424_vm1, %v4598_v18, %v3421_v40  ;;  %v3358_v18 = vmul.f32 %v6705_v2, %v6705_v2  ;;  %v3351_v40 = vmul.f32 0.03125, %v3341_v51  ;;  %3827 = vmatpush.msra.mxu1 %v3800_v0  ;;  %4285 = vmatpush.msra.mxu3 %v3800_v0 }
 0xad8   : > { %vm3498_vm2 = vcmp.ge.f32.partialorder %v3490_v58, 0.0  ;;  %v3506_v63 = vmul.f32 0.01, %v3490_v58  ;;  %v3469_v36 = vmul.f32 %v3425_v13, %v3373_v26 }
 0xada   : > { %v3514_v11 = vsel %vm3498_vm2, %v3490_v58, %v3506_v63  ;;  %v3478_v7 = vmul.f32 %v6621_v22, %v3469_v36  ;;  %v3799_v58 = vld [vmem:[%s6945_s14 + $0x18] sm:$0xff] }
 0xadb   : > { %3569 = vmatmul.f32.vlgmr.msra.gmra.mxu2 %v3514_v11  ;;  %3828 = vmatpush.msra.mxu1 %v3799_v58 }
 0xadc   : > { %v3487_v31 = vadd.f32 %v6624_v27, %v3478_v7  ;;  %4286 = vmatpush.msra.mxu3 %v3799_v58 }
 0xade   : > { %vm3495_vm3 = vcmp.ge.f32.partialorder %v3487_v31, 0.0  ;;  %v3503_v44 = vmul.f32 0.01, %v3487_v31 }
 0xae0   : > { %v3511_v16 = vsel %vm3495_vm3, %v3487_v31, %v3503_v44  ;;  %v3798_v31 = vld [vmem:[%s6945_s14 + $0x10] sm:$0xff] }
 0xae1   : > { %3560 = vmatmul.f32.gmra.mxu0 %v3511_v16  ;;  %3829 = vmatpush.msra.mxu1 %v3798_v31 }
 0xae2   : > { %4287 = vmatpush.msra.mxu3 %v3798_v31 }
 0xae5   : > { %v3552_v25 = vpop.f32.mrf.mxu0  ;;  %v3293_v45 = vpop.f32.mrf.mxu3 }
 0xae6   : > { %v6643_v60 = vadd.f32 %v6544_v42, %v3293_v45  ;;  %v6661_v42 = vadd.f32 %v6651_v56, %v3552_v25 }
 0xae8   : > { %3312 = vadd.xlane.f32.xlu2 %v6643_v60  ;;  %v3329_v4 = vmul.f32 %v6643_v60, %v6643_v60  ;;  %v3602_v21 = vmul.f32 %v6661_v42, %v6661_v42 }
 0xaea   : > { %3344 = vadd.xlane.f32.xlu0 %v3329_v4 }
 0xaed   : > { %v3555_v61 = vpop.f32.mrf.mxu0 }
 0xaee   : > { %v6654_v15 = vadd.f32 %v6651_v56, %v3555_v61  ;;  %v3797_v61 = vld [vmem:[%s6945_s14 + $0x8] sm:$0xff] }
 0xaef   : > { %3830 = vmatpush.msra.mxu1 %v3797_v61  ;;  %4288 = vmatpush.msra.mxu3 %v3797_v61 }
 0xaf0   : > { %3580 = vadd.xlane.f32.xlu1 %v6654_v15  ;;  %3338 = vadd.xlane.f32.xlu2 %v3326_v8  ;;  %v3603_v50 = vmul.f32 %v6654_v15, %v6654_v15 }
 0xaf2   : > { %3308 = vadd.xlane.f32.xlu0 %v6612_v14 }
 0xaf5   : > { %v3558_v17 = vpop.f32.mrf.mxu0 }
 0xaf6   : > { %v6664_v54 = vadd.f32 %v6651_v56, %v3558_v17 }
 0xaf8   : > { %v3604_v33 = vmul.f32 %v6664_v54, %v6664_v54  ;;  %3578 = vadd.xlane.f32.xlu2 %v6661_v42 }
 0xafa   : > { %3614 = vadd.xlane.f32.xlu1 %v3604_v33  ;;  %3610 = vadd.xlane.f32.xlu0 %v3602_v21 }
 0xb00   : > { %3612 = vadd.xlane.f32.xlu2 %v3603_v50  ;;  %v3796_v50 = vld [vmem:[%s6945_s14] sm:$0xff] }
 0xb01   : > { %3831 = vmatpush.msra.mxu1 %v3796_v50  ;;  %4289 = vmatpush.msra.mxu3 %v3796_v50 }
 0xb02   : > { %3582 = vadd.xlane.f32.xlu0 %v6664_v54 }
 0xb5b   : > { %v3313_v20 = vpop.xlane.xlu2 %3312 }
 0xb5c   : > { %v6689_v3 = vmul.f32 0.03125, %v3313_v20 }
 0xb5d   : > { %v3345_v35 = vpop.xlane.xlu0 %3344 }
 0xb5e   : > { %v3561_v32 = vpop.f32.mrf.mxu0  ;;  %v3570_v41 = vpop.f32.mrf.mxu2  ;;  %v3361_v30 = vmul.f32 %v6689_v3, %v6689_v3  ;;  %v3353_v23 = vmul.f32 0.03125, %v3345_v35 }
 0xb5f   : > { %v6697_v53 = vadd.f32 %v6651_v56, %v3561_v32  ;;  %v6700_v47 = vadd.f32 %v6651_v56, %v3570_v41 }
 0xb60   : > { %v3369_v37 = vsub.f32 %v3353_v23, %v3361_v30  ;;  %v3377_v30 = vsub.f32 %v6643_v60, %v6689_v3 }
 0xb61   : > { %3590 = vadd.xlane.f32.xlu0 %v6700_v47  ;;  %3584 = vadd.xlane.f32.xlu2 %v6697_v53  ;;  %v3605_v38 = vmul.f32 %v6697_v53, %v6697_v53  ;;  %v3608_v1 = vmul.f32 %v6700_v47, %v6700_v47 }
 0xb62   : > { %v6717_v57 = vadd.f32 1e-05, %v3369_v37 }
 0xb63   : > { %3616 = vadd.xlane.f32.xlu1 %v3605_v38  ;;  %v3339_v12 = vpop.xlane.xlu2 %3338  ;;  %v3581_v44 = vpop.xlane.xlu1 %3580 }
 0xb64   : > { %v3350_v52 = vmul.f32 0.03125, %v3339_v12  ;;  %4599 = vrsqrt.f32 %v6717_v57  ;;  %v6757_v21 = vmul.f32 0.03125, %v3581_v44  ;;  %vm3462_vm5 = vweird.f32 %v6717_v57 }
 0xb65   : > { %v3309_v9 = vpop.xlane.xlu0 %3308 }
 0xb66   : > { %v3366_v34 = vsub.f32 %v3350_v52, %v3358_v18  ;;  %v6730_v48 = vmul.f32 0.03125, %v3309_v9  ;;  %v3635_v43 = vmul.f32 %v6757_v21, %v6757_v21 }
 0xb68   : > { %v6732_v10 = vadd.f32 1e-05, %v3366_v34  ;;  %v3359_v26 = vmul.f32 %v6730_v48, %v6730_v48  ;;  %v3374_v34 = vsub.f32 %v6607_v29, %v6705_v2 }
 0xb69   : > { %3622 = vadd.xlane.f32.xlu2 %v3608_v1 }
 0xb6a   : > { %4601 = vrsqrt.f32 %v6732_v10  ;;  %v4600_v13 = vpop.eup %4599  ;;  %v3367_v63 = vsub.f32 %v3351_v40, %v3359_v26  ;;  %vm3432_vm8 = vweird.f32 %v6732_v10 }
 0xb6b   : > { %v3579_v36 = vpop.xlane.xlu2 %3578  ;;  %v3457_v11 = vmul.f32 %v4600_v13, %v6717_v57  ;;  %vm3463_vm4 = vweird.f32 %v4600_v13 }
 0xb6c   : > { %v6744_v7 = vmul.f32 0.03125, %v3579_v36  ;;  %v6749_v16 = vadd.f32 1e-05, %v3367_v63  ;;  %vm3464_vm6 = vmor %vm3462_vm5, %vm3463_vm4 }
 0xb6d   : > { %v3458_v25 = vmul.f32 %v4600_v13, %v3457_v11  ;;  %v3611_v4 = vpop.xlane.xlu0 %3610  ;;  %v3615_v23 = vpop.xlane.xlu1 %3614  ;;  %v3375_v11 = vsub.f32 %v6612_v14, %v6730_v48 }
 0xb6e   : > { %v3634_v45 = vmul.f32 %v6744_v7, %v6744_v7  ;;  %4603 = vrsqrt.f32 %v6749_v16  ;;  %v3626_v8 = vmul.f32 0.03125, %v3611_v4  ;;  %v3628_v3 = vmul.f32 0.03125, %v3615_v23 }
 0xb6f   : > { %v3459_v33 = vmul.f32 0.5, %v3458_v25  ;;  %vm3442_vm12 = vweird.f32 %v6749_v16 }
 0xb70   : > { %v4602_v17 = vpop.eup %4601  ;;  %v3642_v39 = vsub.f32 %v3626_v8, %v3634_v45 }
 0xb71   : > { %v3427_v28 = vmul.f32 %v4602_v17, %v6732_v10  ;;  %v3460_v62 = vsub.f32 1.5, %v3459_v33  ;;  %vm3433_vm7 = vweird.f32 %v4602_v17 }
 0xb72   : > { %v6763_v59 = vadd.f32 1e-05, %v3642_v39  ;;  %vm3434_vm9 = vmor %vm3432_vm8, %vm3433_vm7  ;;  %v3650_v39 = vsub.f32 %v6661_v42, %v6744_v7  ;;  %v3651_v7 = vsub.f32 %v6654_v15, %v6757_v21 }
 0xb73   : > { %v3428_v5 = vmul.f32 %v4602_v17, %v3427_v28  ;;  %v3613_v19 = vpop.xlane.xlu2 %3612  ;;  %v3461_v20 = vmul.f32 %v4600_v13, %v3460_v62 }
 0xb74   : > { %v3627_v32 = vmul.f32 0.03125, %v3613_v19  ;;  %v4604_v41 = vpop.eup %4603  ;;  %4605 = vrsqrt.f32 %v6763_v59  ;;  %vm3672_vm0 = vweird.f32 %v6763_v59 }
 0xb75   : > { %v3429_v35 = vmul.f32 0.5, %v3428_v5  ;;  %v3437_v24 = vmul.f32 %v4604_v41, %v6749_v16  ;;  %v3583_v49 = vpop.xlane.xlu0 %3582  ;;  %v3465_v37 = vsel %vm3464_vm6, %v4600_v13, %v3461_v20  ;;  %vm3443_vm10 = vweird.f32 %v4604_v41  ;;  %v6795_v5 = vld [vmem:[#allocation16 + $0x2] ss:$0 sm:$0xff] }
 0xb76   : > { %v3643_v38 = vsub.f32 %v3627_v32, %v3635_v43  ;;  %v6772_v57 = vmul.f32 0.03125, %v3583_v49  ;;  %v3473_v12 = vmul.f32 %v3465_v37, %v3377_v30  ;;  %vm3444_vm13 = vmor %vm3442_vm12, %vm3443_vm10 }
 0xb77   : > { %v3430_v46 = vsub.f32 1.5, %v3429_v35  ;;  %v3438_v18 = vmul.f32 %v4604_v41, %v3437_v24 }
 0xb78   : > { %v6775_v52 = vadd.f32 1e-05, %v3643_v38  ;;  %v3636_v55 = vmul.f32 %v6772_v57, %v6772_v57  ;;  %v3482_v51 = vmul.f32 %v6621_v22, %v3473_v12 }
 0xb79   : > { %v3431_v60 = vmul.f32 %v4602_v17, %v3430_v46  ;;  %v3439_v9 = vmul.f32 0.5, %v3438_v18 }
 0xb7a   : > { %4607 = vrsqrt.f32 %v6775_v52  ;;  %v4606_v1 = vpop.eup %4605  ;;  %v3644_v10 = vsub.f32 %v3628_v3, %v3636_v55  ;;  %v3491_v0 = vadd.f32 %v6624_v27, %v3482_v51  ;;  %vm3682_vm3 = vweird.f32 %v6775_v52 }
 0xb7b   : > { %v3435_v6 = vsel %vm3434_vm9, %v4602_v17, %v3431_v60  ;;  %v3440_v40 = vsub.f32 1.5, %v3439_v9  ;;  %v3667_v26 = vmul.f32 %v4606_v1, %v6763_v59  ;;  %vm3673_vm14 = vweird.f32 %v4606_v1 }
 0xb7c   : > { %v3470_v58 = vmul.f32 %v3435_v6, %v3374_v34  ;;  %v3660_v13 = vadd.f32 1e-05, %v3644_v10  ;;  %vm3499_vm11 = vcmp.ge.f32.partialorder %v3491_v0, 0.0  ;;  %v3507_v63 = vmul.f32 0.01, %v3491_v0  ;;  %vm3674_vm1 = vmor %vm3672_vm0, %vm3673_vm14 }
 0xb7d   : > { %v3441_v36 = vmul.f32 %v4604_v41, %v3440_v40  ;;  %v3668_v29 = vmul.f32 %v4606_v1, %v3667_v26 }
 0xb7e   : > { %v3479_v2 = vmul.f32 %v6621_v22, %v3470_v58  ;;  %4609 = vrsqrt.f32 %v3660_v13  ;;  %v3515_v31 = vsel %vm3499_vm11, %v3491_v0, %v3507_v63  ;;  %vm3692_vm8 = vweird.f32 %v3660_v13 }
 0xb7f   : > { %v3445_v25 = vsel %vm3444_vm13, %v4604_v41, %v3441_v36  ;;  %v3669_v45 = vmul.f32 0.5, %v3668_v29  ;;  %3572 = vmatmul.f32.gmra.mxu2 %v3515_v31  ;;  %v6798_v41 = vld [vmem:[#allocation18 + $0x2] ss:$0 sm:$0xff] }
 0xb80   : > { %v4608_v44 = vpop.eup %4607  ;;  %v3488_v4 = vadd.f32 %v6624_v27, %v3479_v2  ;;  %v3471_v61 = vmul.f32 %v3445_v25, %v3375_v11 }
 0xb81   : > { %v3677_v8 = vmul.f32 %v4608_v44, %v6775_v52  ;;  %v3670_v17 = vsub.f32 1.5, %v3669_v45  ;;  %vm3683_vm2 = vweird.f32 %v4608_v44  ;;  %v3652_v52 = vsub.f32 %v6664_v54, %v6772_v57 }
 0xb82   : > { %vm3496_vm15 = vcmp.ge.f32.partialorder %v3488_v4, 0.0  ;;  %v3504_v16 = vmul.f32 0.01, %v3488_v4  ;;  %v3480_v33 = vmul.f32 %v6621_v22, %v3471_v61  ;;  %vm3684_vm5 = vmor %vm3682_vm3, %vm3683_vm2 }
 0xb83   : > { %v3678_v50 = vmul.f32 %v4608_v44, %v3677_v8  ;;  %v3671_v14 = vmul.f32 %v4606_v1, %v3670_v17 }
 0xb84   : > { %v3512_v48 = vsel %vm3496_vm15, %v3488_v4, %v3504_v16  ;;  %v4610_v28 = vpop.eup %4609  ;;  %v3489_v19 = vadd.f32 %v6624_v27, %v3480_v33 }
 0xb85   : > { %v3679_v62 = vmul.f32 0.5, %v3678_v50  ;;  %3563 = vmatmul.f32.gmra.mxu0 %v3512_v48  ;;  %v3675_v20 = vsel %vm3674_vm1, %v4606_v1, %v3671_v14  ;;  %v3687_v43 = vmul.f32 %v4610_v28, %v3660_v13  ;;  %vm3693_vm6 = vweird.f32 %v4610_v28 }
 0xb86   : > { %v3746_v32 = vmul.f32 %v3675_v20, %v3650_v39  ;;  %v3505_v30 = vmul.f32 0.01, %v3489_v19  ;;  %vm3497_vm4 = vcmp.ge.f32.partialorder %v3489_v19, 0.0  ;;  %vm3694_vm9 = vmor %vm3692_vm8, %vm3693_vm6 }
 0xb87   : > { %v3680_v22 = vsub.f32 1.5, %v3679_v62  ;;  %v3688_v59 = vmul.f32 %v4610_v28, %v3687_v43 }
 0xb88   : > { %v3755_v42 = vmul.f32 %v6795_v5, %v3746_v32  ;;  %v3513_v49 = vsel %vm3497_vm4, %v3489_v19, %v3505_v30 }
 0xb89   : > { %v3681_v35 = vmul.f32 %v4608_v44, %v3680_v22  ;;  %v3689_v27 = vmul.f32 0.5, %v3688_v59 }
 0xb8a   : > { %v3764_v24 = vadd.f32 %v6798_v41, %v3755_v42 }
 0xb8b   : > { %v3685_v23 = vsel %vm3684_vm5, %v4608_v44, %v3681_v35  ;;  %v3690_v38 = vsub.f32 1.5, %v3689_v27 }
 0xb8c   : > { %v3747_v37 = vmul.f32 %v3685_v23, %v3651_v7  ;;  %vm3772_vm7 = vcmp.ge.f32.partialorder %v3764_v24, 0.0  ;;  %v3780_v46 = vmul.f32 0.01, %v3764_v24 }
 0xb8d   : > { %3566 = vmatmul.f32.gmra.mxu0 %v3513_v49  ;;  %v3691_v12 = vmul.f32 %v4610_v28, %v3690_v38 }
 0xb8e   : > { %v3756_v18 = vmul.f32 %v6795_v5, %v3747_v37  ;;  %v3788_v15 = vsel %vm3772_vm7, %v3764_v24, %v3780_v46  ;;  %v6830_v37 = vld [vmem:[%s7014_s17] ss:$0 sm:$0xff] }
 0xb8f   : > { %v3695_v21 = vsel %vm3694_vm9, %v4610_v28, %v3691_v12  ;;  %3832 = vmatmul.f32.vlgmr.msra.gmra.mxu1 %v3788_v15 }
 0xb90   : > { %v3765_v60 = vadd.f32 %v6798_v41, %v3756_v18  ;;  %v3748_v3 = vmul.f32 %v3695_v21, %v3652_v52 }
 0xb92   : > { %v3757_v55 = vmul.f32 %v6795_v5, %v3748_v3  ;;  %v3781_v51 = vmul.f32 0.01, %v3765_v60  ;;  %vm3773_vm10 = vcmp.ge.f32.partialorder %v3765_v60, 0.0 }
 0xb94   : > { %v3789_v34 = vsel %vm3773_vm10, %v3765_v60, %v3781_v51  ;;  %v3766_v9 = vadd.f32 %v6798_v41, %v3757_v55 }
 0xb96   : > { %v3782_v1 = vmul.f32 0.01, %v3766_v9  ;;  %vm3774_vm11 = vcmp.ge.f32.partialorder %v3766_v9, 0.0 }
 0xb97   : > { %3835 = vmatmul.f32.gmra.mxu1 %v3789_v34 }
 0xb98   : > { %v3790_v6 = vsel %vm3774_vm11, %v3766_v9, %v3782_v1 }
 0xb9f   : > { %3838 = vmatmul.f32.gmra.mxu1 %v3790_v6 }
 0xbd4   : > { %v3585_v54 = vpop.xlane.xlu2 %3584  ;;  %v3591_v10 = vpop.xlane.xlu0 %3590 }
 0xbd5   : > { %v3597_v57 = vmul.f32 0.03125, %v3585_v54  ;;  %v3600_v58 = vmul.f32 0.03125, %v3591_v10 }
 0xbd6   : > { %v3617_v0 = vpop.xlane.xlu1 %3616 }
 0xbd7   : > { %v3637_v40 = vmul.f32 %v3597_v57, %v3597_v57  ;;  %v3629_v26 = vmul.f32 0.03125, %v3617_v0  ;;  %v3640_v29 = vmul.f32 %v3600_v58, %v3600_v58  ;;  %v3653_v50 = vsub.f32 %v6697_v53, %v3597_v57 }
 0xbd8   : > { %v3656_v20 = vsub.f32 %v6700_v47, %v3600_v58 }
 0xbd9   : > { %v3645_v13 = vsub.f32 %v3629_v26, %v3637_v40 }
 0xbdb   : > { %v3661_v63 = vadd.f32 1e-05, %v3645_v13 }
 0xbdc   : > { %v3623_v36 = vpop.xlane.xlu2 %3622 }
 0xbdd   : > { %v3632_v2 = vmul.f32 0.03125, %v3623_v36  ;;  %4611 = vrsqrt.f32 %v3661_v63  ;;  %vm3702_vm13 = vweird.f32 %v3661_v63 }
 0xbdf   : > { %v3648_v11 = vsub.f32 %v3632_v2, %v3640_v29 }
 0xbe1   : > { %v3664_v31 = vadd.f32 1e-05, %v3648_v11 }
 0xbe3   : > { %4613 = vrsqrt.f32 %v3664_v31  ;;  %v4612_v44 = vpop.eup %4611  ;;  %vm3732_vm0 = vweird.f32 %v3664_v31 }
 0xbe4   : > { %v3697_v25 = vmul.f32 %v4612_v44, %v3661_v63  ;;  %vm3703_vm12 = vweird.f32 %v4612_v44 }
 0xbe5   : > { %vm3704_vm14 = vmor %vm3702_vm13, %vm3703_vm12 }
 0xbe6   : > { %v3698_v45 = vmul.f32 %v4612_v44, %v3697_v25 }
 0xbe8   : > { %v3699_v61 = vmul.f32 0.5, %v3698_v45 }
 0xbe9   : > { %v4614_v4 = vpop.eup %4613 }
 0xbea   : > { %v3727_v8 = vmul.f32 %v4614_v4, %v3664_v31  ;;  %v3700_v17 = vsub.f32 1.5, %v3699_v61  ;;  %vm3733_vm15 = vweird.f32 %v4614_v4 }
 0xbeb   : > { %vm3734_vm1 = vmor %vm3732_vm0, %vm3733_vm15 }
 0xbec   : > { %v3728_v16 = vmul.f32 %v4614_v4, %v3727_v8  ;;  %v3701_v33 = vmul.f32 %v4612_v44, %v3700_v17 }
 0xbee   : > { %v3729_v14 = vmul.f32 0.5, %v3728_v16  ;;  %v3705_v48 = vsel %vm3704_vm14, %v4612_v44, %v3701_v33 }
 0xbef   : > { %v3749_v39 = vmul.f32 %v3705_v48, %v3653_v50 }
 0xbf0   : > { %v3730_v28 = vsub.f32 1.5, %v3729_v14 }
 0xbf1   : > { %v3758_v19 = vmul.f32 %v6795_v5, %v3749_v39 }
 0xbf2   : > { %v3731_v62 = vmul.f32 %v4614_v4, %v3730_v28 }
 0xbf3   : > { %v3767_v32 = vadd.f32 %v6798_v41, %v3758_v19 }
 0xbf4   : > { %v3735_v43 = vsel %vm3734_vm1, %v4614_v4, %v3731_v62 }
 0xbf5   : > { %v3752_v22 = vmul.f32 %v3735_v43, %v3656_v20  ;;  %vm3775_vm2 = vcmp.ge.f32.partialorder %v3767_v32, 0.0  ;;  %v3783_v59 = vmul.f32 0.01, %v3767_v32 }
 0xbf7   : > { %v3761_v53 = vmul.f32 %v6795_v5, %v3752_v22  ;;  %v3791_v30 = vsel %vm3775_vm2, %v3767_v32, %v3783_v59 }
 0xbf8   : > { %3841 = vmatmul.f32.gmra.mxu1 %v3791_v30 }
 0xbf9   : > { %v3770_v35 = vadd.f32 %v6798_v41, %v3761_v53 }
 0xbfb   : > { %vm3778_vm3 = vcmp.ge.f32.partialorder %v3770_v35, 0.0  ;;  %v3786_v42 = vmul.f32 0.01, %v3770_v35 }
 0xbfd   : > { %v3794_v7 = vsel %vm3778_vm3, %v3770_v35, %v3786_v42 }
 0xbfe   : > { %3850 = vmatmul.f32.vlgmr.msra.gmra.mxu3 %v3794_v7 }
 0xc02   : > { %v3564_v27 = vpop.f32.mrf.mxu0  ;;  %v3573_v24 = vpop.f32.mrf.mxu2 }
 0xc03   : > { %v6818_v47 = vadd.f32 %v6651_v56, %v3564_v27  ;;  %v6821_v23 = vadd.f32 %v6651_v56, %v3573_v24 }
 0xc05   : > { %3586 = vadd.xlane.f32.xlu0 %v6818_v47  ;;  %v3606_v38 = vmul.f32 %v6818_v47, %v6818_v47  ;;  %3592 = vadd.xlane.f32.xlu1 %v6821_v23  ;;  %v3609_v12 = vmul.f32 %v6821_v23, %v6821_v23 }
 0xc07   : > { %3618 = vadd.xlane.f32.xlu2 %v3606_v38 }
 0xc0a   : > { %v3567_v49 = vpop.f32.mrf.mxu0 }
 0xc0b   : > { %v6833_v46 = vadd.f32 %v6651_v56, %v3567_v49 }
 0xc0c   : > { %v3833_v18 = vpop.f32.mrf.mxu1 }
 0xc0d   : > { %3624 = vadd.xlane.f32.xlu0 %v3609_v12  ;;  %v3607_v52 = vmul.f32 %v6833_v46, %v6833_v46  ;;  %v3834_v15 = vadd.f32 %v6830_v37, %v3833_v18  ;;  %3588 = vadd.xlane.f32.xlu1 %v6833_v46 }
 0xc0f   : > { %3620 = vadd.xlane.f32.xlu2 %v3607_v52  ;;  %v4243_v21 = vmul.f32 -1.442695, %v3834_v15 }
 0xc11   : > { %4615 = vpow2.f32 %v4243_v21 }
 0xc14   : > { %v3836_v60 = vpop.f32.mrf.mxu1 }
 0xc15   : > { %v3837_v56 = vadd.f32 %v6830_v37, %v3836_v60 }
 0xc17   : > { %v4616_v3 = vpop.eup %4615  ;;  %v4244_v55 = vmul.f32 -1.442695, %v3837_v56 }
 0xc18   : > { %v3881_v51 = vadd.f32 1.0, %v4616_v3 }
 0xc19   : > { %4617 = vpow2.f32 %v4244_v55 }
 0xc1a   : > { %4619 = vrcp.f32 %v3881_v51  ;;  %v3900_v40 = vand.u32 2147483648, %v3881_v51  ;;  %v3898_v58 = vand.u32 2147483647, %v3881_v51  ;;  %vm3894_vm5 = vweird.f32 %v3881_v51 }
 0xc1c   : > { %v3839_v34 = vpop.f32.mrf.mxu1  ;;  %v3901_v29 = vor.u32 1.1754944e-38, %v3900_v40  ;;  %vm3899_vm7 = vcmp.eq.f32.partialorder %v3898_v58, 8.507059e+37 }
 0xc1d   : > { %v3840_v9 = vadd.f32 %v6830_v37, %v3839_v34 }
 0xc1f   : > { %v4618_v1 = vpop.eup %4617  ;;  %v4245_v6 = vmul.f32 -1.442695, %v3840_v9 }
 0xc20   : > { %v4620_v54 = vpop.eup %4619  ;;  %v3882_v57 = vadd.f32 1.0, %v4618_v1 }
 0xc21   : > { %v3890_v10 = vmul.f32 %v4620_v54, %v3881_v51  ;;  %4621 = vpow2.f32 %v4245_v6  ;;  %vm3895_vm4 = vweird.f32 %v4620_v54 }
 0xc22   : > { %4623 = vrcp.f32 %v3882_v57  ;;  %vm3896_vm6 = vmor %vm3894_vm5, %vm3895_vm4  ;;  %v3915_v45 = vand.u32 2147483648, %v3882_v57  ;;  %v3913_v61 = vand.u32 2147483647, %v3882_v57  ;;  %vm3909_vm9 = vweird.f32 %v3882_v57 }
 0xc23   : > { %v3891_v0 = vsub.f32 1.0, %v3890_v10 }
 0xc24   : > { %v3916_v16 = vor.u32 1.1754944e-38, %v3915_v45  ;;  %vm3914_vm11 = vcmp.eq.f32.partialorder %v3913_v61, 8.507059e+37 }
 0xc25   : > { %v3892_v26 = vmul.f32 %v4620_v54, %v3891_v0 }
 0xc27   : > { %v4622_v13 = vpop.eup %4621  ;;  %v3893_v63 = vadd.f32 %v4620_v54, %v3892_v26 }
 0xc28   : > { %v4624_v36 = vpop.eup %4623  ;;  %v3883_v2 = vadd.f32 1.0, %v4622_v13 }
 0xc29   : > { %v3897_v11 = vsel %vm3896_vm6, %v4620_v54, %v3893_v63  ;;  %v3905_v31 = vmul.f32 %v4624_v36, %v3882_v57  ;;  %vm3910_vm8 = vweird.f32 %v4624_v36 }
 0xc2a   : > { %v3902_v44 = vsel %vm3899_vm7, %v3901_v29, %v3897_v11  ;;  %4625 = vrcp.f32 %v3883_v2  ;;  %vm3911_vm10 = vmor %vm3909_vm9, %vm3910_vm8  ;;  %v3930_v28 = vand.u32 2147483648, %v3883_v2  ;;  %v3928_v62 = vand.u32 2147483647, %v3883_v2 }
 0xc2b   : > { %4009 = vst [vmem:[%s6846_s15] sm:$0xff] %v3902_v44  ;;  %v3906_v25 = vsub.f32 1.0, %v3905_v31  ;;  %vm3924_vm13 = vweird.f32 %v3883_v2 }
 0xc2c   : > { %v3931_v20 = vor.u32 1.1754944e-38, %v3930_v28  ;;  %vm3929_vm15 = vcmp.eq.f32.partialorder %v3928_v62, 8.507059e+37 }
 0xc2d   : > { %v3907_v4 = vmul.f32 %v4624_v36, %v3906_v25 }
 0xc2f   : > { %v3908_v8 = vadd.f32 %v4624_v36, %v3907_v4 }
 0xc30   : > { %v4626_v17 = vpop.eup %4625 }
 0xc31   : > { %v3912_v33 = vsel %vm3911_vm10, %v4624_v36, %v3908_v8  ;;  %v3920_v50 = vmul.f32 %v4626_v17, %v3883_v2  ;;  %vm3925_vm12 = vweird.f32 %v4626_v17 }
 0xc32   : > { %v3917_v14 = vsel %vm3914_vm11, %v3916_v16, %v3912_v33  ;;  %vm3926_vm14 = vmor %vm3924_vm13, %vm3925_vm12 }
 0xc33   : > { %4010 = vst [vmem:[%s6846_s15 + $0x8] sm:$0xff] %v3917_v14  ;;  %v3921_v48 = vsub.f32 1.0, %v3920_v50 }
 0xc35   : > { %v3922_v39 = vmul.f32 %v4626_v17, %v3921_v48 }
 0xc37   : > { %v3923_v19 = vadd.f32 %v4626_v17, %v3922_v39 }
 0xc39   : > { %v3927_v43 = vsel %vm3926_vm14, %v4626_v17, %v3923_v19 }
 0xc3a   : > { %v3932_v32 = vsel %vm3929_vm15, %v3931_v20, %v3927_v43 }
 0xc3b   : > { %4011 = vst [vmem:[%s6846_s15 + $0x10] sm:$0xff] %v3932_v32 }
 0xc75   : > { %v3842_v22 = vpop.f32.mrf.mxu1 }
 0xc76   : > { %v3843_v59 = vadd.f32 %v6830_v37, %v3842_v22 }
 0xc78   : > { %v4246_v53 = vmul.f32 -1.442695, %v3843_v59  ;;  %v3587_v30 = vpop.xlane.xlu0 %3586  ;;  %v3593_v35 = vpop.xlane.xlu1 %3592 }
 0xc79   : > { %v6852_v42 = vmul.f32 0.03125, %v3587_v30  ;;  %v6856_v49 = vmul.f32 0.03125, %v3593_v35 }
 0xc7a   : > { %4627 = vpow2.f32 %v4246_v53  ;;  %v3619_v7 = vpop.xlane.xlu2 %3618 }
 0xc7b   : > { %v3638_v27 = vmul.f32 %v6852_v42, %v6852_v42  ;;  %v3630_v24 = vmul.f32 0.03125, %v3619_v7  ;;  %v3641_v3 = vmul.f32 %v6856_v49, %v6856_v49  ;;  %v3654_v50 = vsub.f32 %v6818_v47, %v6852_v42 }
 0xc7c   : > { %v3657_v47 = vsub.f32 %v6821_v23, %v6856_v49 }
 0xc7d   : > { %v3646_v38 = vsub.f32 %v3630_v24, %v3638_v27 }
 0xc7f   : > { %v3662_v12 = vadd.f32 1e-05, %v3646_v38 }
 0xc80   : > { %v4628_v18 = vpop.eup %4627  ;;  %v3625_v15 = vpop.xlane.xlu0 %3624 }
 0xc81   : > { %v3851_v52 = vpop.f32.mrf.mxu3  ;;  %v3884_v21 = vadd.f32 1.0, %v4628_v18  ;;  %4629 = vrsqrt.f32 %v3662_v12  ;;  %v3589_v56 = vpop.xlane.xlu1 %3588  ;;  %v3633_v51 = vmul.f32 0.03125, %v3625_v15  ;;  %vm3712_vm4 = vweird.f32 %v3662_v12 }
 0xc82   : > { %v3852_v60 = vadd.f32 %v6830_v37, %v3851_v52  ;;  %v6861_v55 = vmul.f32 0.03125, %v3589_v56  ;;  %v3621_v34 = vpop.xlane.xlu2 %3620 }
 0xc83   : > { %4631 = vrcp.f32 %v3884_v21  ;;  %v3649_v6 = vsub.f32 %v3633_v51, %v3641_v3  ;;  %v3631_v54 = vmul.f32 0.03125, %v3621_v34  ;;  %v3945_v11 = vand.u32 2147483648, %v3884_v21 }
 0xc84   : > { %v4249_v9 = vmul.f32 -1.442695, %v3852_v60  ;;  %v3639_v1 = vmul.f32 %v6861_v55, %v6861_v55  ;;  %v3943_v45 = vand.u32 2147483647, %v3884_v21  ;;  %vm3939_vm2 = vweird.f32 %v3884_v21 }
 0xc85   : > { %v3665_v57 = vadd.f32 1e-05, %v3649_v6  ;;  %v3946_v33 = vor.u32 1.1754944e-38, %v3945_v11  ;;  %v3655_v23 = vsub.f32 %v6833_v46, %v6861_v55 }
 0xc86   : > { %4633 = vpow2.f32 %v4249_v9  ;;  %v3647_v0 = vsub.f32 %v3631_v54, %v3639_v1  ;;  %vm3944_vm5 = vcmp.eq.f32.partialorder %v3943_v45, 8.507059e+37 }
 0xc87   : > { %v4630_v10 = vpop.eup %4629  ;;  %4635 = vrsqrt.f32 %v3665_v57  ;;  %vm3742_vm8 = vweird.f32 %v3665_v57 }
 0xc88   : > { %v3707_v40 = vmul.f32 %v4630_v10, %v3662_v12  ;;  %v3663_v58 = vadd.f32 1e-05, %v3647_v0  ;;  %vm3713_vm1 = vweird.f32 %v4630_v10 }
 0xc89   : > { %v4632_v26 = vpop.eup %4631  ;;  %vm3714_vm6 = vmor %vm3712_vm4, %vm3713_vm1 }
 0xc8a   : > { %v3935_v13 = vmul.f32 %v4632_v26, %v3884_v21  ;;  %v3708_v63 = vmul.f32 %v4630_v10, %v3707_v40  ;;  %4637 = vrsqrt.f32 %v3663_v58  ;;  %vm3940_vm0 = vweird.f32 %v4632_v26 }
 0xc8b   : > { %vm3941_vm3 = vmor %vm3939_vm2, %vm3940_vm0  ;;  %vm3722_vm11 = vweird.f32 %v3663_v58 }
 0xc8c   : > { %v4634_v36 = vpop.eup %4633  ;;  %v3936_v29 = vsub.f32 1.0, %v3935_v13  ;;  %v3709_v2 = vmul.f32 0.5, %v3708_v63 }
 0xc8d   : > { %v6865_v31 = vadd.f32 1.0, %v4634_v36  ;;  %v4636_v44 = vpop.eup %4635 }
 0xc8e   : > { %v3937_v25 = vmul.f32 %v4632_v26, %v3936_v29  ;;  %v3710_v4 = vsub.f32 1.5, %v3709_v2  ;;  %v3737_v17 = vmul.f32 %v4636_v44, %v3665_v57  ;;  %vm3743_vm7 = vweird.f32 %v4636_v44 }
 0xc8f   : > { %4639 = vrcp.f32 %v6865_v31  ;;  %v3988_v27 = vand.u32 2147483647, %v6865_v31  ;;  %v3990_v24 = vand.u32 2147483648, %v6865_v31  ;;  %vm3744_vm10 = vmor %vm3742_vm8, %vm3743_vm7  ;;  %vm3984_vm15 = vweird.f32 %v6865_v31 }
 0xc90   : > { %v3938_v61 = vadd.f32 %v4632_v26, %v3937_v25  ;;  %v3711_v8 = vmul.f32 %v4630_v10, %v3710_v4  ;;  %v4638_v16 = vpop.eup %4637  ;;  %v3738_v48 = vmul.f32 %v4636_v44, %v3737_v17 }
 0xc91   : > { %v3717_v28 = vmul.f32 %v4638_v16, %v3663_v58  ;;  %vm3723_vm9 = vweird.f32 %v4638_v16  ;;  %v3991_v56 = vor.u32 1.1754944e-38, %v3990_v24  ;;  %vm3989_vm1 = vcmp.eq.f32.partialorder %v3988_v27, 8.507059e+37 }
 0xc92   : > { %v3942_v14 = vsel %vm3941_vm3, %v4632_v26, %v3938_v61  ;;  %v3715_v62 = vsel %vm3714_vm6, %v4630_v10, %v3711_v8  ;;  %v3739_v19 = vmul.f32 0.5, %v3738_v48  ;;  %vm3724_vm13 = vmor %vm3722_vm11, %vm3723_vm9 }
 0xc93   : > { %v3947_v39 = vsel %vm3944_vm5, %v3946_v33, %v3942_v14  ;;  %v3718_v20 = vmul.f32 %v4638_v16, %v3717_v28  ;;  %v3750_v43 = vmul.f32 %v3715_v62, %v3654_v50 }
 0xc94   : > { %4012 = vst [vmem:[%s6846_s15 + $0x18] sm:$0xff] %v3947_v39  ;;  %v3740_v59 = vsub.f32 1.5, %v3739_v19 }
 0xc95   : > { %v4640_v32 = vpop.eup %4639  ;;  %v3719_v53 = vmul.f32 0.5, %v3718_v20  ;;  %v3759_v30 = vmul.f32 %v6795_v5, %v3750_v43 }
 0xc96   : > { %v3980_v22 = vmul.f32 %v4640_v32, %v6865_v31  ;;  %v3741_v42 = vmul.f32 %v4636_v44, %v3740_v59  ;;  %vm3985_vm12 = vweird.f32 %v4640_v32 }
 0xc97   : > { %v3720_v7 = vsub.f32 1.5, %v3719_v53  ;;  %v3768_v38 = vadd.f32 %v6798_v41, %v3759_v30  ;;  %vm3986_vm0 = vmor %vm3984_vm15, %vm3985_vm12 }
 0xc98   : > { %v3981_v35 = vsub.f32 1.0, %v3980_v22  ;;  %v3745_v52 = vsel %vm3744_vm10, %v4636_v44, %v3741_v42 }
 0xc99   : > { %v3721_v18 = vmul.f32 %v4638_v16, %v3720_v7  ;;  %vm3776_vm14 = vcmp.ge.f32.partialorder %v3768_v38, 0.0  ;;  %v3784_v49 = vmul.f32 0.01, %v3768_v38  ;;  %v3753_v15 = vmul.f32 %v3745_v52, %v3657_v47 }
 0xc9a   : > { %v3982_v12 = vmul.f32 %v4640_v32, %v3981_v35 }
 0xc9b   : > { %v3725_v60 = vsel %vm3724_vm13, %v4638_v16, %v3721_v18  ;;  %v3792_v3 = vsel %vm3776_vm14, %v3768_v38, %v3784_v49  ;;  %v3762_v51 = vmul.f32 %v6795_v5, %v3753_v15 }
 0xc9c   : > { %v3983_v21 = vadd.f32 %v4640_v32, %v3982_v12  ;;  %v3751_v34 = vmul.f32 %v3725_v60, %v3655_v23  ;;  %3844 = vmatmul.f32.gmra.mxu1 %v3792_v3 }
 0xc9d   : > { %v3771_v46 = vadd.f32 %v6798_v41, %v3762_v51 }
 0xc9e   : > { %v3987_v9 = vsel %vm3986_vm0, %v4640_v32, %v3983_v21  ;;  %v3760_v55 = vmul.f32 %v6795_v5, %v3751_v34 }
 0xc9f   : > { %v3992_v1 = vsel %vm3989_vm1, %v3991_v56, %v3987_v9  ;;  %vm3779_vm2 = vcmp.ge.f32.partialorder %v3771_v46, 0.0  ;;  %v3787_v6 = vmul.f32 0.01, %v3771_v46 }
 0xca0   : > { %4015 = vst [vmem:[%s6846_s15 + $0x30] sm:$0xff] %v3992_v1  ;;  %v3769_v54 = vadd.f32 %v6798_v41, %v3760_v55 }
 0xca1   : > { %v3795_v57 = vsel %vm3779_vm2, %v3771_v46, %v3787_v6 }
 0xca2   : > { %vm3777_vm3 = vcmp.ge.f32.partialorder %v3769_v54, 0.0  ;;  %v3785_v10 = vmul.f32 0.01, %v3769_v54  ;;  %3853 = vmatmul.f32.gmra.mxu3 %v3795_v57 }
 0xca4   : > { %v3793_v0 = vsel %vm3777_vm3, %v3769_v54, %v3785_v10 }
 0xca5   : > { %3847 = vmatmul.f32.gmra.mxu1 %v3793_v0 }
 0xd19   : > { %v3845_v40 = vpop.f32.mrf.mxu1 }
 0xd1a   : > { %v3846_v26 = vadd.f32 %v6830_v37, %v3845_v40 }
 0xd1c   : > { %v4247_v58 = vmul.f32 -1.442695, %v3846_v26 }
 0xd1e   : > { %4641 = vpow2.f32 %v4247_v58 }
 0xd22   : > { %v3848_v13 = vpop.f32.mrf.mxu1 }
 0xd23   : > { %v3849_v63 = vadd.f32 %v6830_v37, %v3848_v13 }
 0xd24   : > { %v4642_v5 = vpop.eup %4641 }
 0xd25   : > { %v4248_v36 = vmul.f32 -1.442695, %v3849_v63  ;;  %v3885_v29 = vadd.f32 1.0, %v4642_v5  ;;  %v3854_v2 = vpop.f32.mrf.mxu3 }
 0xd26   : > { %v3855_v41 = vadd.f32 %v6830_v37, %v3854_v2 }
 0xd27   : > { %4643 = vpow2.f32 %v4248_v36  ;;  %v3960_v8 = vand.u32 2147483648, %v3885_v29  ;;  %v3958_v33 = vand.u32 2147483647, %v3885_v29  ;;  %vm3954_vm5 = vweird.f32 %v3885_v29 }
 0xd28   : > { %4645 = vrcp.f32 %v3885_v29  ;;  %v4250_v11 = vmul.f32 -1.442695, %v3855_v41 }
 0xd29   : > { %v3961_v14 = vor.u32 1.1754944e-38, %v3960_v8  ;;  %vm3959_vm7 = vcmp.eq.f32.partialorder %v3958_v33, 8.507059e+37 }
 0xd2a   : > { %4647 = vpow2.f32 %v4250_v11 }
 0xd2d   : > { %v4644_v31 = vpop.eup %4643 }
 0xd2e   : > { %v4646_v44 = vpop.eup %4645  ;;  %v3886_v25 = vadd.f32 1.0, %v4644_v31 }
 0xd2f   : > { %v3950_v45 = vmul.f32 %v4646_v44, %v3885_v29  ;;  %vm3955_vm4 = vweird.f32 %v4646_v44 }
 0xd30   : > { %4649 = vrcp.f32 %v3886_v25  ;;  %v4648_v4 = vpop.eup %4647  ;;  %vm3956_vm6 = vmor %vm3954_vm5, %vm3955_vm4  ;;  %v3973_v20 = vand.u32 2147483647, %v3886_v25  ;;  %v3975_v43 = vand.u32 2147483648, %v3886_v25  ;;  %vm3969_vm9 = vweird.f32 %v3886_v25 }
 0xd31   : > { %v3951_v61 = vsub.f32 1.0, %v3950_v45  ;;  %v3888_v17 = vadd.f32 1.0, %v4648_v4 }
 0xd32   : > { %vm3974_vm11 = vcmp.eq.f32.partialorder %v3973_v20, 8.507059e+37  ;;  %v3976_v47 = vor.u32 1.1754944e-38, %v3975_v43 }
 0xd33   : > { %v3952_v16 = vmul.f32 %v4646_v44, %v3951_v61  ;;  %4651 = vrcp.f32 %v3888_v17  ;;  %v4005_v30 = vand.u32 2147483648, %v3888_v17  ;;  %v4003_v7 = vand.u32 2147483647, %v3888_v17 }
 0xd34   : > { %vm3999_vm13 = vweird.f32 %v3888_v17 }
 0xd35   : > { %v3953_v50 = vadd.f32 %v4646_v44, %v3952_v16  ;;  %v4006_v38 = vor.u32 1.1754944e-38, %v4005_v30  ;;  %vm4004_vm15 = vcmp.eq.f32.partialorder %v4003_v7, 8.507059e+37 }
 0xd36   : > { %v4650_v37 = vpop.eup %4649 }
 0xd37   : > { %v3957_v48 = vsel %vm3956_vm6, %v4646_v44, %v3953_v50  ;;  %v3965_v28 = vmul.f32 %v4650_v37, %v3886_v25  ;;  %vm3970_vm8 = vweird.f32 %v4650_v37 }
 0xd38   : > { %v3962_v39 = vsel %vm3959_vm7, %v3961_v14, %v3957_v48  ;;  %vm3971_vm10 = vmor %vm3969_vm9, %vm3970_vm8 }
 0xd39   : > { %4013 = vst [vmem:[%s6846_s15 + $0x20] sm:$0xff] %v3962_v39  ;;  %v3966_v62 = vsub.f32 1.0, %v3965_v28  ;;  %v4652_v19 = vpop.eup %4651 }
 0xd3a   : > { %v3995_v22 = vmul.f32 %v4652_v19, %v3888_v17  ;;  %vm4000_vm12 = vweird.f32 %v4652_v19 }
 0xd3b   : > { %v3967_v32 = vmul.f32 %v4650_v37, %v3966_v62  ;;  %vm4001_vm14 = vmor %vm3999_vm13, %vm4000_vm12 }
 0xd3c   : > { %v3996_v53 = vsub.f32 1.0, %v3995_v22 }
 0xd3d   : > { %v3968_v59 = vadd.f32 %v4650_v37, %v3967_v32 }
 0xd3e   : > { %v3997_v42 = vmul.f32 %v4652_v19, %v3996_v53 }
 0xd3f   : > { %v3972_v35 = vsel %vm3971_vm10, %v4650_v37, %v3968_v59 }
 0xd40   : > { %v3977_v27 = vsel %vm3974_vm11, %v3976_v47, %v3972_v35  ;;  %v3998_v24 = vadd.f32 %v4652_v19, %v3997_v42 }
 0xd41   : > { %4014 = vst [vmem:[%s6846_s15 + $0x28] sm:$0xff] %v3977_v27 }
 0xd42   : > { %v4002_v12 = vsel %vm4001_vm14, %v4652_v19, %v3998_v24 }
 0xd43   : > { %v4007_v18 = vsel %vm4004_vm15, %v4006_v38, %v4002_v12 }
 0xd44   : > { %4016 = vst [vmem:[%s6846_s15 + $0x38] sm:$0xff] %v4007_v18 }
 0xd45   : > { %4950 = shalt.err (!%p4947_p9)
}
 0xd46   : > { %s5039_s16 = smov 128   ;;  %s5040_s30 = smov 8  }
 0xd47   : > { %4326 = dma.vmem_to_hbm [thread:$0]  (%p5166_p4), %s4033_s24, 1024, %s4035_s20, %s4018_s0, %s5039_s16, %s5039_s16, %s5040_s30  }
 0xd48 PF: > { %s7018_s15 = sld [smem:[#allocation30_spill]] }
 0xd49   : > { %s7019_s22 = sld [smem:[#allocation26_spill]] }
 0xd4e   : > { %p4378_p10 = scmp.ge.s32.totalorder %s7018_s15, 2 }
 0xd4f   : > { %s4049_s2 = sand.u32 1, %s7019_s22  }
 0xd50   : > { %p4357_p11 = pnand %p4378_p10, %p5173_p8  ;;  %s4050_s19 = scalar_lea.sflag [#allocation6], %s4049_s2 }
 0xd52   : > { %p4358_p12 = pneg %p4357_p11 }
 0xd54   : > { %4996 = dma.done.wait (%p4358_p12), %s4050_s19, 1024  }
 0xd55   : > { %4998 = vsyncadd (%p4358_p12), %s4050_s19, 4294966272  ;;  %s34_s26 = sadd.s32 1, %s7018_s15   ;;  %s7021_s21 = sld [smem:[#allocation27_spill]] }
 0xd56   : > { %p31_p13 = scmp.ge.s32.totalorder %s34_s26, 4   ;;  %s7022_s22 = sld [smem:[#allocation28_spill]] }
 0xd57   : > { %s7023_s23 = sld [smem:[#allocation34_spill]] }
 0xd58   : > { %s7024_s24 = sld [smem:[#allocation29_spill]]  ;;  %33 = sbr.rel (!%p31_p13) target bundleno = 15 (0xf), region = 171 }
 0xd59   : > { %s7025_s25 = sld [smem:[#allocation31_spill]] }
 0xd5d   :  { %4056 = vsyncpa [#allocation5], 1 }
 0xd5e   :  { %4058 = vsyncpa [#allocation5 + $0x1], 1 }
 0xd5f   :  { %4059 = vsyncpa [#allocation8], 1 }
 0xd60   :  { %4060 = vsyncpa [#allocation11], 1 }
 0xd61   :  { %4061 = vsyncpa [#allocation14], 1 }
 0xd62   :  { %4062 = vsyncpa [#allocation17], 1 }
 0xd63   :  { %4063 = vsyncpa [#allocation6], 1 }
 0xd64   :  { %4065 = vsyncpa [#allocation6 + $0x1], 1 }

</bundles_post_ra>
